<compile_context>
chip_gen: v6e
topology: v6e:2x2x1
jax: 0.10.0
libtpu: 0.0.40
codegen_flags: <defaults>
</compile_context>

<pallas_src>
import jax
import jax.numpy as jnp
from jax import lax
from jax.experimental import pallas as pl
from jax.experimental.pallas import tpu as pltpu

EPS = 1e-5  # torch.nn.LayerNorm default
_VMEM_LIMIT = 48 * 1024 * 1024  # explicit scoped-VMEM budget (fits v5e/v6e/v7x)


def _layernorm(x, gamma, beta):
    mean = jnp.mean(x, axis=-1, keepdims=True)
    var = jnp.mean(jnp.square(x - mean), axis=-1, keepdims=True)
    return (x - mean) * lax.rsqrt(var + EPS) * gamma + beta


# ---------------- Pass 1: LayerNorm1 + fused gated projections ----------------
def _proj_kernel(z_ref, ln1_g_ref, ln1_b_ref, w_all_ref, b_all_ref,
                 left_t_ref, right_t_ref, g_ref):
    c = left_t_ref.shape[1]
    d = z_ref.shape[2]

    z = z_ref[0].astype(jnp.float32)                       # (TR, D), f32 statistics
    zn = _layernorm(z, ln1_g_ref[...], ln1_b_ref[...])
    # One wide MXU matmul for all five projections (4C + D output columns).
    h = jnp.dot(zn.astype(w_all_ref.dtype), w_all_ref[...],
                preferred_element_type=jnp.float32) + b_all_ref[...]
    lp = h[:, 0 * c:1 * c]
    rp = h[:, 1 * c:2 * c]
    lg = h[:, 2 * c:3 * c]
    rg = h[:, 3 * c:4 * c]
    og = h[:, 4 * c:4 * c + d]

    left = lp * jax.nn.sigmoid(lg)                         # (TR, C) f32
    right = rp * jax.nn.sigmoid(rg)                        # (TR, C) f32
    # Store channel-major so pass 2 feeds the MXU without per-step relayouts.
    left_t_ref[0] = left.T.astype(left_t_ref.dtype)        # (C, TR)
    right_t_ref[0] = right.T.astype(right_t_ref.dtype)     # (C, TR)
    g_ref[0] = jax.nn.sigmoid(og)                          # (TR, D) f32


# ---------------- Pass 2: triangle contraction on the MXU ----------------
def _contract_kernel(lt_ref, rt_ref, ab_ref, acc_ref):
    k = pl.program_id(3)

    @pl.when(k == 0)
    def _():
        acc_ref[...] = jnp.zeros_like(acc_ref)

    # ab[c, i, j] += sum_k L[c, i, k] * R[c, j, k]  -- per-channel MXU matmuls,
    # f32 accumulation in VMEM scratch.
    acc_ref[...] += jnp.einsum("cik,cjk->cij", lt_ref[0], rt_ref[0],
                               preferred_element_type=jnp.float32)

    @pl.when(k == pl.num_programs(3) - 1)
    def _():
        ab_ref[0] = acc_ref[...].astype(ab_ref.dtype)


# ---------------- Pass 3: LayerNorm2 + output projection + gate + residual ----------------
def _finalize_kernel(ab_ref, g_ref, z_ref,
                     ln2_g_ref, ln2_b_ref, w_op_ref, out_b_ref, o_ref):
    ab = ab_ref[0].astype(jnp.float32).T                    # (C, TS) -> (TS, C)
    abn = _layernorm(ab, ln2_g_ref[...], ln2_b_ref[...])    # f32 statistics
    ab_proj = jnp.dot(abn.astype(w_op_ref.dtype), w_op_ref[...],
                      preferred_element_type=jnp.float32)   # (TS, D)
    g = g_ref[0]                                            # (TS, D) f32
    z = z_ref[0].astype(jnp.float32)                        # (TS, D)
    # bias_ele_dropout_residual with dropout_mask == ones_like(Z[:, 0:1, :, :]):
    #   out = Z_raw + mask * (g * (ab + output_bias))
    # TODO(synk): FastFold's fused op may add inverted-dropout 1/(1-p) scaling in
    # training; with an all-ones mask we use the plain residual form.
    out = z + g * (ab_proj + out_b_ref[...])
    o_ref[0] = out.astype(o_ref.dtype)


def _pick_tile(total, target, multiple):
    """Largest divisor t of `total` with t <= target and t % multiple == 0 (else `total`)."""
    if total <= target:
        return total
    t = (min(target, total) // multiple) * multiple
    while t >= multiple:
        if total % t == 0:
            return t
        t -= multiple
    return total


def triangle_multiplication_outgoing(z_raw, params, *, ti=None, tj=None, tk=None,
                                     tr=None, mxu_dtype=None):
    B, N, N2, D = z_raw.shape
    assert N == N2, "pair representation must be square"
    C = params["w_lp"].shape[1]
    # Module constraint: LayerNorm(c) then Linear(d_pair, d_pair) applied to `ab`.
    assert C == D, f"module requires c == d_pair (got c={C}, d_pair={D})"
    assert params["w_op"].shape == (C, D)

    if mxu_dtype is None:
        mxu_dtype = jnp.bfloat16 if z_raw.dtype == jnp.bfloat16 else jnp.float32
    f32 = jnp.float32

    # Tile sizes (defaults sized for the MXU / (8,128) layout constraints).
    ti = ti or _pick_tile(N, 128, 8)       # i rows per contraction tile
    tj = tj or _pick_tile(N, 128, 128)     # j cols per contraction tile (lane dim of ab)
    tk = tk or _pick_tile(N, 128, 128)     # k reduction block (lane dim of left/right)
    tr = tr or _pick_tile(N * N, 2048, 128)  # rows per projection / finalize step
    assert N % ti == 0 and N % tj == 0 and N % tk == 0 and (N * N) % tr == 0

    # Fuse the five projection weights into one (D, 4C + D) matmul (and the biases).
    w_all = jnp.concatenate([params["w_lp"], params["w_rp"], params["w_lg"],
                             params["w_rg"], params["w_og"]], axis=1).astype(mxu_dtype)
    b_all = jnp.concatenate([params["b_lp"], params["b_rp"], params["b_lg"],
                             params["b_rg"], params["b_og"]], axis=1).astype(f32)
    W = 4 * C + D

    ln1_g = params["ln1_g"].astype(f32)
    ln1_b = params["ln1_b"].astype(f32)
    ln2_g = params["ln2_g"].astype(f32)
    ln2_b = params["ln2_b"].astype(f32)
    w_op = params["w_op"].astype(mxu_dtype)
    out_b = params["out_b"].astype(f32)

    S = N * N
    z2 = z_raw.reshape(B, S, D)

    # -------- Pass 1: LayerNorm1 + fused gated projections --------
    left_t, right_t, g = pl.pallas_call(
        _proj_kernel,
        grid=(B, S // tr),
        in_specs=[
            pl.BlockSpec((1, tr, D), lambda b, r: (b, r, 0)),
            pl.BlockSpec((1, D), lambda b, r: (0, 0)),
            pl.BlockSpec((1, D), lambda b, r: (0, 0)),
            pl.BlockSpec((D, W), lambda b, r: (0, 0)),
            pl.BlockSpec((1, W), lambda b, r: (0, 0)),
        ],
        out_specs=[
            pl.BlockSpec((1, C, tr), lambda b, r: (b, 0, r)),
            pl.BlockSpec((1, C, tr), lambda b, r: (b, 0, r)),
            pl.BlockSpec((1, tr, D), lambda b, r: (b, r, 0)),
        ],
        out_shape=[
            jax.ShapeDtypeStruct((B, C, S), mxu_dtype),   # left, channel-major
            jax.ShapeDtypeStruct((B, C, S), mxu_dtype),   # right, channel-major
            jax.ShapeDtypeStruct((B, S, D), f32),         # output gate
        ],
        compiler_params=pltpu.CompilerParams(
            dimension_semantics=("parallel", "parallel"),
            vmem_limit_bytes=_VMEM_LIMIT),
    )(z2, ln1_g, ln1_b, w_all, b_all)

    left_t4 = left_t.reshape(B, C, N, N)    # [b, c, i, k]
    right_t4 = right_t.reshape(B, C, N, N)  # [b, c, j, k]

    # -------- Pass 2: triangle contraction (MXU), k-reduction accumulator --------
    ab_t = pl.pallas_call(
        _contract_kernel,
        grid=(B, N // ti, N // tj, N // tk),
        in_specs=[
            pl.BlockSpec((1, C, ti, tk), lambda b, i, j, k: (b, 0, i, k)),
            pl.BlockSpec((1, C, tj, tk), lambda b, i, j, k: (b, 0, j, k)),
        ],
        out_specs=pl.BlockSpec((1, C, ti, tj), lambda b, i, j, k: (b, 0, i, j)),
        out_shape=jax.ShapeDtypeStruct((B, C, N, N), f32),
        scratch_shapes=[pltpu.VMEM((C, ti, tj), f32)],
        compiler_params=pltpu.CompilerParams(
            dimension_semantics=("parallel", "parallel", "parallel", "arbitrary"),
            vmem_limit_bytes=_VMEM_LIMIT),
    )(left_t4, right_t4)

    # -------- Pass 3: LayerNorm2 + output projection + gate + bias + residual --------
    out2 = pl.pallas_call(
        _finalize_kernel,
        grid=(B, S // tr),
        in_specs=[
            pl.BlockSpec((1, C, tr), lambda b, s: (b, 0, s)),
            pl.BlockSpec((1, tr, D), lambda b, s: (b, s, 0)),
            pl.BlockSpec((1, tr, D), lambda b, s: (b, s, 0)),
            pl.BlockSpec((1, C), lambda b, s: (0, 0)),
            pl.BlockSpec((1, C), lambda b, s: (0, 0)),
            pl.BlockSpec((C, D), lambda b, s: (0, 0)),
            pl.BlockSpec((1, D), lambda b, s: (0, 0)),
        ],
        out_specs=pl.BlockSpec((1, tr, D), lambda b, s: (b, s, 0)),
        out_shape=jax.ShapeDtypeStruct((B, S, D), z_raw.dtype),
        compiler_params=pltpu.CompilerParams(
            dimension_semantics=("parallel", "parallel"),
            vmem_limit_bytes=_VMEM_LIMIT),
    )(ab_t.reshape(B, C, S), g, z2, ln2_g, ln2_b, w_op, out_b)

    return out2.reshape(B, N, N, D)


def reference(z_raw, p):
    """Pure-JAX reference mirroring the PyTorch forward (eval, all-ones dropout mask)."""
    zf = z_raw.astype(jnp.float32)
    z = _layernorm(zf, p["ln1_g"], p["ln1_b"])
    lin = lambda w, b: jnp.einsum("bijd,dc->bijc", z, w,
                                  preferred_element_type=jnp.float32) + b
    left = lin(p["w_lp"], p["b_lp"]) * jax.nn.sigmoid(lin(p["w_lg"], p["b_lg"]))
    right = lin(p["w_rp"], p["b_rp"]) * jax.nn.sigmoid(lin(p["w_rg"], p["b_rg"]))
    g = jax.nn.sigmoid(lin(p["w_og"], p["b_og"]))
    ab = jnp.einsum("bikd,bjkd->bijd", left, right, preferred_element_type=jnp.float32)
    abn = _layernorm(ab, p["ln2_g"], p["ln2_b"])
    ab_proj = jnp.einsum("bijc,cd->bijd", abn, p["w_op"],
                         preferred_element_type=jnp.float32)
    return (zf + g * (ab_proj + p["out_b"])).astype(z_raw.dtype)


def make_params(key, d_pair, c):
    """Deterministic synthetic parameters (random so the math is exercised)."""
    ks = jax.random.split(key, 16)
    n = lambda k, shape, s=0.1: s * jax.random.normal(k, shape, jnp.float32)
    return {
        "ln1_g": 1.0 + n(ks[0], (1, d_pair)),
        "ln1_b": n(ks[1], (1, d_pair)),
        "w_lp": n(ks[2], (d_pair, c)),
        "b_lp": n(ks[3], (1, c)),
        "w_rp": n(ks[4], (d_pair, c)),
        "b_rp": n(ks[5], (1, c)),
        "w_lg": n(ks[6], (d_pair, c)),
        "b_lg": jnp.ones((1, c), jnp.float32),       # gate bias_init = 1.0
        "w_rg": n(ks[7], (d_pair, c)),
        "b_rg": jnp.ones((1, c), jnp.float32),       # gate bias_init = 1.0
        "w_og": n(ks[8], (d_pair, d_pair)),
        "b_og": jnp.ones((1, d_pair), jnp.float32),  # gate bias_init = 1.0
        "ln2_g": 1.0 + n(ks[9], (1, c)),
        "ln2_b": n(ks[10], (1, c)),
        "w_op": n(ks[11], (c, d_pair)),              # output_projection, no bias
        "out_b": n(ks[12], (1, d_pair)),             # output_bias parameter
    }


if __name__ == "__main__":
    # c must equal d_pair (module applies LayerNorm(c) then Linear(d_pair, d_pair) to ab).
    # d_pair = c = 128 matches real AlphaFold pair channels and keeps every last dim
    # lane-dense (multiples of 128).
    B, N, d_pair = 2, 16, 128
    c = d_pair

    key = jax.random.PRNGKey(0)
    k_z, k_p = jax.random.split(key)
    z_raw = jax.random.normal(k_z, (B, N, N, d_pair), jnp.float32)
    params = make_params(k_p, d_pair, c)

    out = jax.block_until_ready(triangle_multiplication_outgoing(z_raw, params))
    ref = jax.block_until_ready(reference(z_raw, params))
    assert out.shape == z_raw.shape and out.dtype == z_raw.dtype
    err = float(jnp.max(jnp.abs(out - ref)))
    assert jnp.allclose(out, ref, rtol=2e-3, atol=2e-3), f"f32 max abs err {err}"

    # bf16 input path: MXU operands in bf16 (2x MXU throughput on v6e/v7x); LayerNorm
    # statistics and the contraction accumulator stay in f32. Compared loosely against
    # the f32 reference (output itself is bf16).
    z_bf16 = z_raw.astype(jnp.bfloat16)
    out_bf16 = jax.block_until_ready(triangle_multiplication_outgoing(z_bf16, params))
    assert out_bf16.shape == z_raw.shape and out_bf16.dtype == jnp.bfloat16
    err_bf16 = float(jnp.max(jnp.abs(out_bf16.astype(jnp.float32) - ref)))
    assert jnp.allclose(out_bf16.astype(jnp.float32), ref, rtol=1e-1, atol=3e-1), \
        f"bf16 max abs err {err_bf16}"

    print("KERNEL_OK")
</pallas_src>

<mosaic_0001>
module attributes {stable_mosaic.version = 11 : i64} {
  func.func @_proj_kernel(%arg0: i32, %arg1: i32, %arg2: memref<1x256x128xf32, #tpu.memory_space<vmem>>, %arg3: memref<1x128xf32, #tpu.memory_space<vmem>>, %arg4: memref<1x128xf32, #tpu.memory_space<vmem>>, %arg5: memref<128x640xf32, #tpu.memory_space<vmem>>, %arg6: memref<1x640xf32, #tpu.memory_space<vmem>>, %arg7: memref<1x128x256xf32, #tpu.memory_space<vmem>>, %arg8: memref<1x128x256xf32, #tpu.memory_space<vmem>>, %arg9: memref<1x256x128xf32, #tpu.memory_space<vmem>>) attributes {dimension_semantics = [#tpu.dimension_semantics<parallel>, #tpu.dimension_semantics<parallel>], iteration_bounds = array<i64: 2, 1>, scalar_prefetch = 0 : i64, scratch_operands = 0 : i64, tpu.core_type = #tpu.core_type<tc>, window_params = [{transform_indices = @transform_0, window_bounds = array<i64: 1, 256, 128>}, {pipeline_mode = #tpu.pipeline_mode<synchronous>, transform_indices = @transform_1, window_bounds = array<i64: 1, 128>}, {pipeline_mode = #tpu.pipeline_mode<synchronous>, transform_indices = @transform_2, window_bounds = array<i64: 1, 128>}, {pipeline_mode = #tpu.pipeline_mode<synchronous>, transform_indices = @transform_3, window_bounds = array<i64: 128, 640>}, {pipeline_mode = #tpu.pipeline_mode<synchronous>, transform_indices = @transform_4, window_bounds = array<i64: 1, 640>}, {transform_indices = @transform_5, window_bounds = array<i64: 1, 128, 256>}, {transform_indices = @transform_6, window_bounds = array<i64: 1, 128, 256>}, {transform_indices = @transform_7, window_bounds = array<i64: 1, 256, 128>}]} {
    %c0 = arith.constant 0 : index
    %c0_0 = arith.constant 0 : index
    %c0_1 = arith.constant 0 : index
    %0 = vector.load %arg2[%c0, %c0_0, %c0_1] : memref<1x256x128xf32, #tpu.memory_space<vmem>>, vector<1x256x128xf32>
    %1 = vector.shape_cast %0 : vector<1x256x128xf32> to vector<256x128xf32>
    %c0_2 = arith.constant 0 : index
    %c0_3 = arith.constant 0 : index
    %2 = vector.load %arg3[%c0_2, %c0_3] : memref<1x128xf32, #tpu.memory_space<vmem>>, vector<1x128xf32>
    %c0_4 = arith.constant 0 : index
    %c0_5 = arith.constant 0 : index
    %3 = vector.load %arg4[%c0_4, %c0_5] : memref<1x128xf32, #tpu.memory_space<vmem>>, vector<1x128xf32>
    %cst = arith.constant dense<0.000000e+00> : vector<256xf32>
    %4 = vector.multi_reduction <add>, %1, %cst [1] : vector<256x128xf32> to vector<256xf32>
    %5 = vector.shape_cast %4 : vector<256xf32> to vector<256x1xf32>
    %cst_6 = arith.constant 1.280000e+02 : f32
    %6 = vector.broadcast %cst_6 : f32 to vector<256x1xf32>
    %7 = arith.divf %5, %6 : vector<256x1xf32>
    %8 = vector.broadcast %7 : vector<256x1xf32> to vector<256x128xf32>
    %9 = arith.subf %1, %8 : vector<256x128xf32>
    %10 = arith.mulf %9, %9 : vector<256x128xf32>
    %cst_7 = arith.constant dense<0.000000e+00> : vector<256xf32>
    %11 = vector.multi_reduction <add>, %10, %cst_7 [1] : vector<256x128xf32> to vector<256xf32>
    %12 = vector.shape_cast %11 : vector<256xf32> to vector<256x1xf32>
    %cst_8 = arith.constant 1.280000e+02 : f32
    %13 = vector.broadcast %cst_8 : f32 to vector<256x1xf32>
    %14 = arith.divf %12, %13 : vector<256x1xf32>
    %15 = vector.broadcast %7 : vector<256x1xf32> to vector<256x128xf32>
    %16 = arith.subf %1, %15 : vector<256x128xf32>
    %cst_9 = arith.constant 9.99999974E-6 : f32
    %17 = vector.broadcast %cst_9 : f32 to vector<256x1xf32>
    %18 = arith.addf %14, %17 : vector<256x1xf32>
    %19 = math.rsqrt %18 : vector<256x1xf32>
    %20 = vector.broadcast %19 : vector<256x1xf32> to vector<256x128xf32>
    %21 = arith.mulf %16, %20 : vector<256x128xf32>
    %22 = vector.broadcast %2 : vector<1x128xf32> to vector<256x128xf32>
    %23 = arith.mulf %21, %22 : vector<256x128xf32>
    %24 = vector.broadcast %3 : vector<1x128xf32> to vector<256x128xf32>
    %25 = arith.addf %23, %24 : vector<256x128xf32>
    %c0_10 = arith.constant 0 : index
    %c0_11 = arith.constant 0 : index
    %26 = vector.load %arg5[%c0_10, %c0_11] : memref<128x640xf32, #tpu.memory_space<vmem>>, vector<128x640xf32>
    %cst_12 = arith.constant dense<0.000000e+00> : vector<256x640xf32>
    %27 = tpu.matmul %25, %26, %cst_12 {dimension_numbers = #tpu.dot_dimension_numbers<[1], [0], [0], [1], [0, 0, 1, 1], [], []>} : vector<256x128xf32>, vector<128x640xf32>, vector<256x640xf32> -> vector<256x640xf32>
    %c0_13 = arith.constant 0 : index
    %c0_14 = arith.constant 0 : index
    %28 = vector.load %arg6[%c0_13, %c0_14] : memref<1x640xf32, #tpu.memory_space<vmem>>, vector<1x640xf32>
    %29 = vector.broadcast %28 : vector<1x640xf32> to vector<256x640xf32>
    %30 = arith.addf %27, %29 : vector<256x640xf32>
    %31 = vector.extract_strided_slice %30 {offsets = [0, 0], sizes = [256, 128], strides = [1, 1]} : vector<256x640xf32> to vector<256x128xf32>
    %32 = vector.extract_strided_slice %30 {offsets = [0, 128], sizes = [256, 128], strides = [1, 1]} : vector<256x640xf32> to vector<256x128xf32>
    %33 = vector.extract_strided_slice %30 {offsets = [0, 256], sizes = [256, 128], strides = [1, 1]} : vector<256x640xf32> to vector<256x128xf32>
    %34 = vector.extract_strided_slice %30 {offsets = [0, 384], sizes = [256, 128], strides = [1, 1]} : vector<256x640xf32> to vector<256x128xf32>
    %35 = vector.extract_strided_slice %30 {offsets = [0, 512], sizes = [256, 128], strides = [1, 1]} : vector<256x640xf32> to vector<256x128xf32>
    %36 = arith.negf %33 : vector<256x128xf32>
    %37 = math.exp %36 : vector<256x128xf32>
    %cst_15 = arith.constant 1.000000e+00 : f32
    %38 = vector.broadcast %cst_15 : f32 to vector<256x128xf32>
    %39 = arith.addf %38, %37 : vector<256x128xf32>
    %40 = arith.divf %38, %39 : vector<256x128xf32>
    %41 = arith.mulf %31, %40 : vector<256x128xf32>
    %42 = arith.negf %34 : vector<256x128xf32>
    %43 = math.exp %42 : vector<256x128xf32>
    %cst_16 = arith.constant 1.000000e+00 : f32
    %44 = vector.broadcast %cst_16 : f32 to vector<256x128xf32>
    %45 = arith.addf %44, %43 : vector<256x128xf32>
    %46 = arith.divf %44, %45 : vector<256x128xf32>
    %47 = arith.mulf %32, %46 : vector<256x128xf32>
    %48 = tpu.transpose %41, [1, 0] : vector<256x128xf32> -> vector<128x256xf32>
    %c0_17 = arith.constant 0 : index
    %c0_18 = arith.constant 0 : index
    %c0_19 = arith.constant 0 : index
    %49 = vector.load %arg7[%c0_17, %c0_18, %c0_19] : memref<1x128x256xf32, #tpu.memory_space<vmem>>, vector<1x128x256xf32>
    %50 = vector.shape_cast %49 : vector<1x128x256xf32> to vector<128x256xf32>
    %51 = vector.shape_cast %48 : vector<128x256xf32> to vector<1x128x256xf32>
    tpu.vector_store %arg7[%c0_17, %c0_18, %c0_19], %51 {strides = array<i32>} : memref<1x128x256xf32, #tpu.memory_space<vmem>>, vector<1x128x256xf32>,
    %52 = tpu.transpose %47, [1, 0] : vector<256x128xf32> -> vector<128x256xf32>
    %c0_20 = arith.constant 0 : index
    %c0_21 = arith.constant 0 : index
    %c0_22 = arith.constant 0 : index
    %53 = vector.load %arg8[%c0_20, %c0_21, %c0_22] : memref<1x128x256xf32, #tpu.memory_space<vmem>>, vector<1x128x256xf32>
    %54 = vector.shape_cast %53 : vector<1x128x256xf32> to vector<128x256xf32>
    %55 = vector.shape_cast %52 : vector<128x256xf32> to vector<1x128x256xf32>
    tpu.vector_store %arg8[%c0_20, %c0_21, %c0_22], %55 {strides = array<i32>} : memref<1x128x256xf32, #tpu.memory_space<vmem>>, vector<1x128x256xf32>,
    %56 = arith.negf %35 : vector<256x128xf32>
    %57 = math.exp %56 : vector<256x128xf32>
    %cst_23 = arith.constant 1.000000e+00 : f32
    %58 = vector.broadcast %cst_23 : f32 to vector<256x128xf32>
    %59 = arith.addf %58, %57 : vector<256x128xf32>
    %60 = arith.divf %58, %59 : vector<256x128xf32>
    %c0_24 = arith.constant 0 : index
    %c0_25 = arith.constant 0 : index
    %c0_26 = arith.constant 0 : index
    %61 = vector.load %arg9[%c0_24, %c0_25, %c0_26] : memref<1x256x128xf32, #tpu.memory_space<vmem>>, vector<1x256x128xf32>
    %62 = vector.shape_cast %61 : vector<1x256x128xf32> to vector<256x128xf32>
    %63 = vector.shape_cast %60 : vector<256x128xf32> to vector<1x256x128xf32>
    tpu.vector_store %arg9[%c0_24, %c0_25, %c0_26], %63 {strides = array<i32>} : memref<1x256x128xf32, #tpu.memory_space<vmem>>, vector<1x256x128xf32>,
    return
  }
  func.func @transform_0(%arg0: i32, %arg1: i32) -> (i32, i32, i32) {
    %c0_i32 = arith.constant 0 : i32
    %c0_i32_0 = arith.constant 0 : i32
    return %arg0, %arg1, %c0_i32 : i32, i32, i32
  }
  func.func @transform_1(%arg0: i32, %arg1: i32) -> (i32, i32) {
    %c0_i32 = arith.constant 0 : i32
    %c0_i32_0 = arith.constant 0 : i32
    %c0_i32_1 = arith.constant 0 : i32
    return %c0_i32, %c0_i32_0 : i32, i32
  }
  func.func @transform_2(%arg0: i32, %arg1: i32) -> (i32, i32) {
    %c0_i32 = arith.constant 0 : i32
    %c0_i32_0 = arith.constant 0 : i32
    %c0_i32_1 = arith.constant 0 : i32
    return %c0_i32, %c0_i32_0 : i32, i32
  }
  func.func @transform_3(%arg0: i32, %arg1: i32) -> (i32, i32) {
    %c0_i32 = arith.constant 0 : i32
    %c0_i32_0 = arith.constant 0 : i32
    %c0_i32_1 = arith.constant 0 : i32
    return %c0_i32, %c0_i32_0 : i32, i32
  }
  func.func @transform_4(%arg0: i32, %arg1: i32) -> (i32, i32) {
    %c0_i32 = arith.constant 0 : i32
    %c0_i32_0 = arith.constant 0 : i32
    %c0_i32_1 = arith.constant 0 : i32
    return %c0_i32, %c0_i32_0 : i32, i32
  }
  func.func @transform_5(%arg0: i32, %arg1: i32) -> (i32, i32, i32) {
    %c0_i32 = arith.constant 0 : i32
    %c0_i32_0 = arith.constant 0 : i32
    return %arg0, %c0_i32, %arg1 : i32, i32, i32
  }
  func.func @transform_6(%arg0: i32, %arg1: i32) -> (i32, i32, i32) {
    %c0_i32 = arith.constant 0 : i32
    %c0_i32_0 = arith.constant 0 : i32
    return %arg0, %c0_i32, %arg1 : i32, i32, i32
  }
  func.func @transform_7(%arg0: i32, %arg1: i32) -> (i32, i32, i32) {
    %c0_i32 = arith.constant 0 : i32
    %c0_i32_0 = arith.constant 0 : i32
    return %arg0, %arg1, %c0_i32 : i32, i32, i32
  }
}

</mosaic_0001>

<bundles_post_ra>
// kernel: tpu_custom_call.1
= control target key start
LH: loop header
LB: loop body
LE: loop exit
PB: predicated region body
PF: predicated region fallthrough
CT: control target
= control target key end

     0   :  { %s5336_s0 = inlined_call_operand.hbm [shape: f32[2,256,128], index: 0, kind: input, shape index: {}]   ;;  %s5337_s1 = inlined_call_operand.vmem [shape: f32[1,128], index: 1, kind: input, shape index: {}]   ;;  %s5338_s2 = inlined_call_operand.vmem [shape: f32[1,128], index: 2, kind: input, shape index: {}]   ;;  %s5339_s3 = inlined_call_operand.hbm [shape: f32[128,640], index: 3, kind: input, shape index: {}]   ;;  %s5340_s4 = inlined_call_operand.vmem [shape: f32[1,640], index: 4, kind: input, shape index: {}]   ;;  %s5341_s5 = inlined_call_operand.hbm [shape: f32[2,128,256], index: 5, kind: output, shape index: {0}]   ;;  %s5342_s6 = inlined_call_operand.hbm [shape: f32[2,128,256], index: 6, kind: output, shape index: {1}]   ;;  %s5343_s7 = inlined_call_operand.hbm [shape: f32[2,256,128], index: 7, kind: output, shape index: {2}]  }
   0x1   :  { %5349 = sst [smem:[#allocation43_spill]] %s5339_s3 }
   0x2   :  { %13 = vsyncpa [#allocation3], 0 }
   0x3   :  { %15 = vsyncpa [#allocation3 + $0x1], 0 }
   0x4   :  { %16 = vsyncpa [#allocation6], 0 }
   0x5   :  { %17 = vsyncpa [#allocation4], 0 }
   0x6   :  { %19 = vsyncpa [#allocation4 + $0x1], 0 }
   0x7   :  { %20 = vsyncpa [#allocation9], 0 }
   0x8   :  { %22 = vsyncpa [#allocation9 + $0x1], 0  ;;  %s3832_s24 = smov 0   ;;  %s3834_s25 = smov 0  }
   0x9   :  { %s3836_s26 = smov 0   ;;  %s3838_s27 = smov 0  }
   0xa   :  { %s3840_s28 = smov 0   ;;  %s3842_s29 = smov 0  }
   0xb LB: > { %5350 = sst [smem:[#allocation15_spill]] %s3772_s28  ;;  %s3863_s30 = sadd.s32 4294967295, %s3776_s29   ;;  %s3776_s29 = sphi %s3842_s29, %s28_s29   ;;  %s3772_s28 = sphi %s3840_s28, %s5419_s28   ;;  %s3768_s27 = sphi %s3838_s27, %s5418_s27   ;;  %s3764_s26 = sphi %s3836_s26, %s5422_s26   ;;  %s3760_s25 = sphi %s3834_s25, %s5421_s25   ;;  %s3756_s24 = sphi %s3832_s24, %s5420_s24  }
   0xc   : > { %s5344_s8 = sadd.s32 4294967294, %s3776_s29   ;;  %p62_p0 = scmp.ne.s32.totalorder %s3760_s25, %s3756_s24 }
   0xd   : > { %p5348_p1 = scmp.eq.s32.totalorder %s3863_s30, 0  ;;  %p178_p3 = scmp.eq.s32.totalorder %s5344_s8, 1 }
   0xe   : > { %p2757_p5 = scmp.ge.s32.totalorder %s3776_s29, 1  ;;  %p241_p7 = scmp.lt.s32.totalorder %s3776_s29, 3 }
   0xf   : > { %p3874_p4 = por %p5348_p1, %p62_p0  ;;  %p3879_p6 = por %p178_p3, %p62_p0 }
  0x10   : > { %p3884_p8 = pnand %p2757_p5, %p241_p7  ;;  %s3778_s12 = smov [#allocation5]  }
  0x11   : > { %s5352_s10 = scalar_select %p3879_p6, 1, 0 }
  0x12   : > { %s259_s13 = sshll.u32 %s3778_s12, 4  ;;  %p3054_p9 = pneg %p3884_p8  ;;  %s260_s13 = int_to_ptr.vmem [resolvable:$true] %s259_s13 }
  0x13   : > { %5353 = sst [smem:[#allocation16_spill]] %s5352_s10  ;;  %s40_s15 = sadd.s32 1, %s3772_s28 }
  0x14   : > { %p3893_p11 = pnand %p3054_p9, %p5348_p1  ;;  %s3593_s16 = scalar_lea.vmem %s260_s13, 10240 }
  0x15   : > { %p3594_p13 = scmp.ne.s32.totalorder %s260_s13, %s3593_s16  ;;  %p3601_p5 = scmp.lt.s32.totalorder %s260_s13, %s260_s13 }
  0x16   : > { %p3584_p12 = pneg %p3893_p11  ;;  %p3602_p7 = scmp.lt.s32.totalorder %s3593_s16, %s3593_s16 }
  0x18   : > { %p3596_p0 = pnand %p3594_p13, %p3584_p12  ;;  %p3603_p2 = por %p3602_p7, %p3601_p5 }
  0x1a   : > { %p3597_p3 = pneg %p3596_p0 }
  0x1c   : > { %p3604_p6 = pnand %p3603_p2, %p3597_p3 }
  0x1e   : > { %3607 = shalt.err (!%p3604_p6)
}
  0x1f   : > { %s3779_s17 = smov 640   ;;  %s3780_s18 = smov 40  }
  0x20   : > { %s5356_s3 = sld [smem:[#allocation43_spill]]  ;;  %p42_p2 = scmp.ge.s32.totalorder %s40_s15, 2 }
  0x21   : > { %s49_s21 = sadd.s32 1, %s3764_s26  ;;  %p56_p6 = scmp.ne.s32.totalorder %s3764_s26, %s3760_s25 }
  0x22   : > { %p57_p9 = scmp.eq.s32.totalorder %s3776_s29, 0  ;;  %s5424_s15 = smov (%p42_p2, %s40_s15), 0 }
  0x23   : > { %5357 = sst [smem:[#allocation17_spill]] %s5424_s15  ;;  %p5359_p13 = scmp.eq.s32.totalorder %s3863_s30, 1 }
  0x24   : > { %p3911_p12 = por %p57_p9, %p56_p6  ;;  %s44_s12 = ssub.s32 %s3772_s28, %s5424_s15 }
  0x25   : > { %p3917_p0 = por %p5359_p13, %p56_p6  ;;  %p3073_p3 = scmp.lt.s32.totalorder %s3776_s29, 2 }
  0x26   : > { %3057 = dma.hbm_to_vmem [thread:$0]  (!%p3893_p11), %s5356_s3, 10240, %s260_s13, [#allocation6], %s3779_s17, %s3779_s17, %s3780_s18  }
  0x27   : > { %p47_p11 = scmp.eq.s32.totalorder %s44_s12, 0  ;;  %s276_s13 = sand.u32 1, %s3764_s26  }
  0x28   : > { %s2760_s14 = sshll.u32 %s276_s13, 8  ;;  %s2878_s17 = sshll.u32 %s3772_s28, 12 }
  0x29   : > { %s3926_s16 = scalar_select %p47_p11, %s3764_s26, %s49_s21  }
  0x2a   : > { %s288_s20 = scalar_lea.hbm %s5336_s0, %s2878_s17  ;;  %s280_s8 = scalar_lea.vmem [#allocation2], %s2760_s14 }
  0x2b   : > { %s289_s3 = sshll.u32 %s280_s8, 4  ;;  %p3934_p5 = pnand %p3073_p3, %p3911_p12  ;;  %s290_s3 = int_to_ptr.vmem [resolvable:$true] %s289_s3 }
  0x2c   : > { %s277_s15 = scalar_lea.sflag [#allocation3], %s276_s13  ;;  %s3621_s12 = scalar_lea.vmem %s290_s3, 4096 }
  0x2d   : > { %p3610_p7 = pneg %p3934_p5  ;;  %p3622_p2 = scmp.ne.s32.totalorder %s290_s3, %s3621_s12 }
  0x2e   : > { %s3781_s21 = smov [#allocation2]  }
  0x2f   : > { %p3624_p6 = pnand %p3622_p2, %p3610_p7  ;;  %s3626_s28 = sshll.u32 %s3781_s21, 4  ;;  %s3627_s28 = int_to_ptr.vmem [resolvable:$false] %s3626_s28 }
  0x30   : > { %s3628_s17 = scalar_lea.vmem %s3627_s28, 8192  ;;  %p3629_p13 = scmp.lt.s32.totalorder %s290_s3, %s3627_s28 }
  0x31   : > { %p3625_p9 = pneg %p3624_p6  ;;  %p3630_p11 = scmp.lt.s32.totalorder %s3628_s17, %s3621_s12 }
  0x33   : > { %p3631_p10 = por %p3630_p11, %p3629_p13 }
  0x35   : > { %p3632_p1 = pnand %p3631_p10, %p3625_p9 }
  0x37   : > { %3635 = shalt.err (!%p3632_p1)
}
  0x38   : > { %s3782_s8 = smov 128   ;;  %s3783_s22 = smov 8  }
  0x39   : > { %3061 = dma.hbm_to_vmem [thread:$0]  (!%p3934_p5), %s288_s20, 4096, %s290_s3, %s277_s15, %s3782_s8, %s3782_s8, %s3783_s22  }
  0x3a   : > { %301 = sbr.rel (%p3884_p8) target bundleno = 1025 (0x401), region = 40 }
  0x3f   : > { %s3945_s13 = sand.u32 1, %s3760_s25  }
  0x40   : > { %s3948_s14 = sshll.u32 %s3945_s13, 8  ;;  %s304_s28 = scalar_lea.sflag [#allocation3], %s3945_s13 }
  0x41   : > { %s3952_s18 = scalar_lea.vmem [#allocation2], %s3948_s14 }
  0x42   : > { %3739 = dma.done.wait (%p3874_p4), %s304_s28, 4096  }
  0x43   : > { %3741 = vsyncadd (%p3874_p4), %s304_s28, 4294963200  ;;  %p5362_p1 = scmp.eq.s32.totalorder %s3863_s30, 0 }
  0x45   : > { %3743 = dma.done.wait (%p5362_p1), [#allocation6], 10240   ;;  %p5363_p8 = pmov %p5362_p1 }
  0x46   : > { %v3963_v0 = vld [vmem:[%s3952_s18 + $0xd0] sm:$0xff]  ;;  %v3966_v1 = vld [vmem:[%s3952_s18 + $0xc0] sm:$0xff]  ;;  %v3971_v2 = vld [vmem:[%s3952_s18 + $0xd8] sm:$0xff]  ;;  %s4965_s20 = scalar_lea.vmem [#allocation10], %s3948_s14  ;;  %s5061_s12 = scalar_lea.vmem [#allocation7], %s3948_s14 }
  0x47   : > { %3745 = vsyncadd (%p5363_p8), [#allocation6], 4294957056  ;;  %442 = vadd.xlane.f32.xlu1 %v3963_v0  ;;  %438 = vadd.xlane.f32.xlu0 %v3966_v1  ;;  %v3974_v3 = vld [vmem:[%s3952_s18 + $0xc8] sm:$0xff]  ;;  %v3982_v5 = vld [vmem:[%s3952_s18 + $0xe0] sm:$0xff]  ;;  %s5148_s21 = scalar_lea.vmem [#allocation8], %s3948_s14  ;;  %s5190_s17 = sshll.u32 %s3768_s27, 12 }
  0x48   : > { %v3979_v4 = vld [vmem:[%s3952_s18 + $0xe8] sm:$0xff]  ;;  %v3987_v6 = vld [vmem:[%s3952_s18 + $0xf8] sm:$0xff]  ;;  %v3990_v7 = vld [vmem:[%s3952_s18 + $0xf0] sm:$0xff]  ;;  %s2555_s8 = sshll.u32 %s5061_s12, 4  ;;  %s5198_s28 = scalar_lea.hbm %s5341_s5, %s5190_s17  ;;  %s5200_s8 = int_to_ptr.vmem [resolvable:$true] %s2555_s8 }
  0x49   : > { %v3995_v8 = vld [vmem:[%s3952_s18 + $0x8] sm:$0xff]  ;;  %v3998_v9 = vld [vmem:[%s3952_s18] sm:$0xff]  ;;  %v4003_v10 = vld [vmem:[%s3952_s18 + $0x18] sm:$0xff]  ;;  %s3636_s3 = scalar_lea.vmem %s5200_s8, 4096  ;;  %s3785_s27 = smov [#allocation7]  }
  0x4a   : > { %v4006_v11 = vld [vmem:[%s3952_s18 + $0x10] sm:$0xff]  ;;  %v4011_v12 = vld [vmem:[%s3952_s18 + $0x28] sm:$0xff]  ;;  %v4014_v13 = vld [vmem:[%s3952_s18 + $0x20] sm:$0xff]  ;;  %p3637_p4 = scmp.ne.s32.totalorder %s5200_s8, %s3636_s3  ;;  %s3640_s9 = sshll.u32 %s3785_s27, 4  ;;  %s3641_s9 = int_to_ptr.vmem [resolvable:$false] %s3640_s9 }
  0x4b   : > { %444 = vadd.xlane.f32.xlu1 %v3971_v2  ;;  %440 = vadd.xlane.f32.xlu0 %v3974_v3  ;;  %v4019_v14 = vld [vmem:[%s3952_s18 + $0x38] sm:$0xff]  ;;  %v4022_v15 = vld [vmem:[%s3952_s18 + $0x30] sm:$0xff]  ;;  %v4027_v16 = vld [vmem:[%s3952_s18 + $0x48] sm:$0xff]  ;;  %s3642_s10 = scalar_lea.vmem %s3641_s9, 8192  ;;  %p3643_p3 = scmp.lt.s32.totalorder %s5200_s8, %s3641_s9 }
  0x4c   : > { %v4030_v17 = vld [vmem:[%s3952_s18 + $0x40] sm:$0xff]  ;;  %v4035_v18 = vld [vmem:[%s3952_s18 + $0x58] sm:$0xff]  ;;  %v4038_v19 = vld [vmem:[%s3952_s18 + $0x50] sm:$0xff]  ;;  %p3638_p10 = pnand %p3637_p4, %p3917_p0  ;;  %p3644_p5 = scmp.lt.s32.totalorder %s3642_s10, %s3636_s3 }
  0x4d   : > { %v4043_v20 = vld [vmem:[%s3952_s18 + $0x60] sm:$0xff]  ;;  %v4047_v21 = vld [vmem:[%s3952_s18 + $0x68] sm:$0xff]  ;;  %v4051_v22 = vld [vmem:[%s3952_s18 + $0x70] sm:$0xff] }
  0x4e   : > { %v4055_v23 = vld [vmem:[%s3952_s18 + $0x78] sm:$0xff]  ;;  %v4059_v24 = vld [vmem:[%s3952_s18 + $0x80] sm:$0xff]  ;;  %v4063_v25 = vld [vmem:[%s3952_s18 + $0x88] sm:$0xff]  ;;  %p3639_p12 = pneg %p3638_p10  ;;  %p3645_p7 = por %p3644_p5, %p3643_p3 }
  0x4f   : > { %448 = vadd.xlane.f32.xlu1 %v3979_v4  ;;  %446 = vadd.xlane.f32.xlu0 %v3982_v5  ;;  %v4067_v26 = vld [vmem:[%s3952_s18 + $0x90] sm:$0xff]  ;;  %v4071_v27 = vld [vmem:[%s3952_s18 + $0x98] sm:$0xff]  ;;  %v4075_v28 = vld [vmem:[%s3952_s18 + $0xa0] sm:$0xff] }
  0x50   : > { %v4079_v29 = vld [vmem:[%s3952_s18 + $0xa8] sm:$0xff]  ;;  %v4083_v30 = vld [vmem:[%s3952_s18 + $0xb0] sm:$0xff]  ;;  %v4087_v31 = vld [vmem:[%s3952_s18 + $0xb8] sm:$0xff]  ;;  %s2530_s18 = scalar_lea.sflag [#allocation4], %s3945_s13  ;;  %p3646_p2 = pnand %p3645_p7, %p3639_p12 }
  0x51   : > { %v895_v32 = vld [vmem:[#allocation5 + $0x260] sm:$0xff]  ;;  %v894_v33 = vld [vmem:[#allocation5 + $0x258] sm:$0xff]  ;;  %v889_v35 = vld [vmem:[#allocation5 + $0x230] sm:$0xff] }
  0x52   : > { %v890_v34 = vld [vmem:[#allocation5 + $0x238] sm:$0xff]  ;;  %3010 = vmatprep.subr.mxu1 %v895_v32  ;;  %926 = vmatprep.subr.mxu0 %v895_v32  ;;  %v885_v36 = vld [vmem:[#allocation5 + $0x210] sm:$0xff]  ;;  %v884_v37 = vld [vmem:[#allocation5 + $0x208] sm:$0xff] }
  0x53   : > { %452 = vadd.xlane.f32.xlu1 %v3987_v6  ;;  %450 = vadd.xlane.f32.xlu0 %v3990_v7  ;;  %v880_v38 = vld [vmem:[#allocation5 + $0x1e8] sm:$0xff]  ;;  %v879_v39 = vld [vmem:[#allocation5 + $0x1e0] sm:$0xff] }
  0x54   : > { %3026 = vmatpush1.msra.mxu1 %v894_v33  ;;  %927 = vmatpush1.msra.mxu0 %v894_v33  ;;  %v875_v40 = vld [vmem:[#allocation5 + $0x1c0] sm:$0xff] }
  0x55   : > { %3011 = vmatprep.subr.mxu1 %v890_v34  ;;  %928 = vmatprep.subr.mxu0 %v890_v34 }
  0x56   : > { %3027 = vmatpush1.msra.mxu1 %v889_v35  ;;  %929 = vmatpush1.msra.mxu0 %v889_v35  ;;  %v865_v35 = vld [vmem:[#allocation5 + $0x170] sm:$0xff] }
  0x57   : > { %392 = vadd.xlane.f32.xlu1 %v3995_v8  ;;  %390 = vadd.xlane.f32.xlu0 %v3998_v9 }
  0x58   : > { %3012 = vmatprep.subr.mxu1 %v885_v36  ;;  %930 = vmatprep.subr.mxu0 %v885_v36  ;;  %v864_v36 = vld [vmem:[#allocation5 + $0x168] sm:$0xff] }
  0x59   : > { %3028 = vmatpush1.msra.mxu1 %v884_v37  ;;  %931 = vmatpush1.msra.mxu0 %v884_v37  ;;  %v860_v37 = vld [vmem:[#allocation5 + $0x148] sm:$0xff] }
  0x5a   : > { %3013 = vmatprep.subr.mxu1 %v880_v38  ;;  %932 = vmatprep.subr.mxu0 %v880_v38 }
  0x5b   : > { %396 = vadd.xlane.f32.xlu1 %v4003_v10  ;;  %394 = vadd.xlane.f32.xlu0 %v4006_v11 }
  0x5c   : > { %3029 = vmatpush1.msra.mxu1 %v879_v39  ;;  %933 = vmatpush1.msra.mxu0 %v879_v39 }
  0x5d   : > { %3014 = vmatprep.subr.mxu1 %v875_v40  ;;  %934 = vmatprep.subr.mxu0 %v875_v40  ;;  %v859_v40 = vld [vmem:[#allocation5 + $0x140] sm:$0xff] }
  0x5f   : > { %400 = vadd.xlane.f32.xlu1 %v4011_v12  ;;  %398 = vadd.xlane.f32.xlu0 %v4014_v13 }
  0x63   : > { %404 = vadd.xlane.f32.xlu1 %v4019_v14  ;;  %402 = vadd.xlane.f32.xlu0 %v4022_v15 }
  0x67   : > { %408 = vadd.xlane.f32.xlu1 %v4027_v16  ;;  %406 = vadd.xlane.f32.xlu0 %v4030_v17 }
  0x6b   : > { %412 = vadd.xlane.f32.xlu1 %v4035_v18  ;;  %410 = vadd.xlane.f32.xlu0 %v4038_v19 }
  0x6f   : > { %414 = vadd.xlane.f32.xlu1 %v4043_v20 }
  0x73   : > { %416 = vadd.xlane.f32.xlu1 %v4047_v21 }
  0x77   : > { %418 = vadd.xlane.f32.xlu1 %v4051_v22 }
  0x7b   : > { %420 = vadd.xlane.f32.xlu1 %v4055_v23 }
  0x7f   : > { %422 = vadd.xlane.f32.xlu1 %v4059_v24 }
  0x83   : > { %424 = vadd.xlane.f32.xlu1 %v4063_v25 }
  0x87   : > { %426 = vadd.xlane.f32.xlu1 %v4067_v26 }
  0x8b   : > { %428 = vadd.xlane.f32.xlu1 %v4071_v27 }
  0x8f   : > { %430 = vadd.xlane.f32.xlu1 %v4075_v28 }
  0x93   : > { %432 = vadd.xlane.f32.xlu1 %v4079_v29 }
  0x97   : > { %434 = vadd.xlane.f32.xlu1 %v4083_v30 }
  0x9b   : > { %436 = vadd.xlane.f32.xlu1 %v4087_v31 }
  0xd0   : > { %v443_v41 = vpop.xlane.xlu1 %442  ;;  %v439_v42 = vpop.xlane.xlu0 %438 }
  0xd1   : > { %v479_v43 = vmul.f32 0.0078125, %v439_v42  ;;  %v481_v44 = vmul.f32 0.0078125, %v443_v41 }
  0xd3   : > { %v4091_v45 = vsub.f32 %v3966_v1, %v479_v43  ;;  %v4096_v50 = vsub.f32 %v3963_v0, %v481_v44  ;;  %v874_v1 = vld [vmem:[#allocation5 + $0x1b8] sm:$0xff]  ;;  %v855_v43 = vld [vmem:[#allocation5 + $0x120] sm:$0xff] }
  0xd4   : > { %v445_v46 = vpop.xlane.xlu1 %444  ;;  %v441_v47 = vpop.xlane.xlu0 %440  ;;  %3030 = vmatpush1.msra.mxu1 %v874_v1  ;;  %935 = vmatpush1.msra.mxu0 %v874_v1 }
  0xd5   : > { %v480_v48 = vmul.f32 0.0078125, %v441_v47  ;;  %v543_v49 = vmul.f32 %v4091_v45, %v4091_v45  ;;  %v482_v51 = vmul.f32 0.0078125, %v445_v46  ;;  %v545_v57 = vmul.f32 %v4096_v50, %v4096_v50  ;;  %v854_v46 = vld [vmem:[#allocation5 + $0x118] sm:$0xff] }
  0xd6   : > { %v850_v47 = vld [vmem:[#allocation5 + $0xf8] sm:$0xff] }
  0xd7   : > { %v4099_v52 = vsub.f32 %v3974_v3, %v480_v48  ;;  %599 = vadd.xlane.f32.xlu0 %v543_v49  ;;  %v4104_v56 = vsub.f32 %v3971_v2, %v482_v51  ;;  %v870_v2 = vld [vmem:[#allocation5 + $0x198] sm:$0xff] }
  0xd8   : > { %v449_v53 = vpop.xlane.xlu1 %448  ;;  %v447_v54 = vpop.xlane.xlu0 %446  ;;  %3015 = vmatprep.subr.mxu1 %v870_v2  ;;  %936 = vmatprep.subr.mxu0 %v870_v2  ;;  %v839_v2 = vld [vmem:[#allocation5 + $0xa0] sm:$0xff] }
  0xd9   : > { %v544_v55 = vmul.f32 %v4099_v52, %v4099_v52  ;;  %v483_v58 = vmul.f32 0.0078125, %v447_v54  ;;  %v484_v60 = vmul.f32 0.0078125, %v449_v53  ;;  %v546_v62 = vmul.f32 %v4104_v56, %v4104_v56  ;;  %v849_v53 = vld [vmem:[#allocation5 + $0xf0] sm:$0xff] }
  0xdb   : > { %601 = vadd.xlane.f32.xlu0 %v544_v55  ;;  %v4109_v61 = vsub.f32 %v3982_v5, %v483_v58  ;;  %v4114_v3 = vsub.f32 %v3979_v4, %v484_v60  ;;  %v869_v5 = vld [vmem:[#allocation5 + $0x190] sm:$0xff] }
  0xdc   : > { %v453_v59 = vpop.xlane.xlu1 %452  ;;  %v451_v0 = vpop.xlane.xlu0 %450  ;;  %3031 = vmatpush1.msra.mxu1 %v869_v5  ;;  %937 = vmatpush1.msra.mxu0 %v869_v5  ;;  %v845_v55 = vld [vmem:[#allocation5 + $0xd0] sm:$0xff] }
  0xdd   : > { %v547_v32 = vmul.f32 %v4109_v61, %v4109_v61  ;;  %v485_v33 = vmul.f32 0.0078125, %v451_v0  ;;  %3016 = vmatprep.subr.mxu1 %v865_v35  ;;  %938 = vmatprep.subr.mxu0 %v865_v35  ;;  %v486_v4 = vmul.f32 0.0078125, %v453_v59  ;;  %v548_v39 = vmul.f32 %v4114_v3, %v4114_v3  ;;  %v840_v59 = vld [vmem:[#allocation5 + $0xa8] sm:$0xff] }
  0xde   : > { %3032 = vmatpush1.msra.mxu1 %v864_v36  ;;  %939 = vmatpush1.msra.mxu0 %v864_v36  ;;  %v830_v36 = vld [vmem:[#allocation5 + $0x58] sm:$0xff] }
  0xdf   : > { %603 = vadd.xlane.f32.xlu0 %v545_v57  ;;  %v4121_v38 = vsub.f32 %v3990_v7, %v485_v33  ;;  %3017 = vmatprep.subr.mxu1 %v860_v37  ;;  %v4126_v7 = vsub.f32 %v3987_v6, %v486_v4  ;;  %v844_v6 = vld [vmem:[#allocation5 + $0xc8] sm:$0xff]  ;;  %v835_v33 = vld [vmem:[#allocation5 + $0x80] sm:$0xff] }
  0xe0   : > { %v393_v63 = vpop.xlane.xlu1 %392  ;;  %v391_v42 = vpop.xlane.xlu0 %390  ;;  %3033 = vmatpush1.msra.mxu1 %v859_v40  ;;  %940 = vmatprep.subr.mxu0 %v860_v37 }
  0xe1   : > { %3018 = vmatprep.subr.mxu1 %v855_v43  ;;  %941 = vmatpush1.msra.mxu0 %v859_v40  ;;  %v549_v49 = vmul.f32 %v4121_v38, %v4121_v38  ;;  %v455_v51 = vmul.f32 0.0078125, %v391_v42  ;;  %v456_v60 = vmul.f32 0.0078125, %v393_v63  ;;  %v550_v1 = vmul.f32 %v4126_v7, %v4126_v7  ;;  %v829_v40 = vld [vmem:[#allocation5 + $0x50] sm:$0xff] }
  0xe2   : > { %3034 = vmatpush1.msra.mxu1 %v854_v46  ;;  %942 = vmatprep.subr.mxu0 %v855_v43 }
  0xe3   : > { %605 = vadd.xlane.f32.xlu0 %v546_v62  ;;  %3019 = vmatprep.subr.mxu1 %v850_v47  ;;  %v4139_v0 = vsub.f32 %v3998_v9, %v455_v51  ;;  %v4146_v9 = vsub.f32 %v3995_v8, %v456_v60  ;;  %v825_v8 = vld [vmem:[#allocation5 + $0x30] sm:$0xff]  ;;  %v820_v51 = vld [vmem:[#allocation5 + $0x8] sm:$0xff] }
  0xe4   : > { %v4118_v34 = vpop.xlane.xlu1 %396  ;;  %3035 = vmatpush1.msra.mxu1 %v849_v53  ;;  %943 = vmatpush1.msra.mxu0 %v854_v46 }
  0xe5   : > { %3020 = vmatprep.subr.mxu1 %v845_v55  ;;  %944 = vmatprep.subr.mxu0 %v850_v47  ;;  %v519_v4 = vmul.f32 %v4139_v0, %v4139_v0 }
  0xe6   : > { %3036 = vmatpush1.msra.mxu1 %v844_v6  ;;  %945 = vmatpush1.msra.mxu0 %v849_v53 }
  0xe7   : > { %607 = vadd.xlane.f32.xlu0 %v547_v32  ;;  %3021 = vmatprep.subr.mxu1 %v840_v59 }
  0xe8   : > { %v401_v41 = vpop.xlane.xlu1 %400  ;;  %3037 = vmatpush1.msra.mxu1 %v839_v2  ;;  %946 = vmatprep.subr.mxu0 %v845_v55  ;;  %v3784_v55 = vmov 0.0  }
  0xe9   : > { %v460_v44 = vmul.f32 0.0078125, %v401_v41  ;;  %3022 = vmatprep.subr.mxu1 %v835_v33  ;;  %947 = vmatpush1.msra.mxu0 %v844_v6 }
  0xea   : > { %948 = vmatprep.subr.mxu0 %v840_v59  ;;  %1134 = vmatprep.mubr.f32.mxu1 %v3784_v55 }
  0xeb   : > { %v4129_v48 = vsub.f32 %v4011_v12, %v460_v44  ;;  %609 = vadd.xlane.f32.xlu0 %v548_v39  ;;  %v395_v12 = vpop.xlane.xlu0 %394  ;;  %949 = vmatpush1.msra.mxu0 %v839_v2  ;;  %v824_v44 = vld [vmem:[#allocation5 + $0x28] sm:$0xff] }
  0xec   : > { %v405_v54 = vpop.xlane.xlu1 %404  ;;  %v457_v39 = vmul.f32 0.0078125, %v395_v12  ;;  %950 = vmatprep.subr.mxu0 %v835_v33  ;;  %990 = vmatprep.mubr.f32.mxu0 %v3784_v55 }
  0xed   : > { %v462_v57 = vmul.f32 0.0078125, %v405_v54  ;;  %v524_v58 = vmul.f32 %v4129_v48, %v4129_v48 }
  0xee   : > { %v4160_v47 = vsub.f32 %v4006_v11, %v457_v39 }
  0xef   : > { %v4136_v62 = vsub.f32 %v4019_v14, %v462_v57  ;;  %561 = vadd.xlane.f32.xlu1 %v524_v58  ;;  %611 = vadd.xlane.f32.xlu0 %v549_v49  ;;  %v834_v14 = vld [vmem:[#allocation5 + $0x78] sm:$0xff]  ;;  %v399_v35 = vpop.xlane.xlu0 %398  ;;  %v520_v49 = vmul.f32 %v4146_v9, %v4146_v9  ;;  %v897_v57 = vld [vmem:[#allocation5 + $0x270] sm:$0xff] }
  0xf0   : > { %v409_v32 = vpop.xlane.xlu1 %408  ;;  %3038 = vmatpush1.msra.mxu1 %v834_v14  ;;  %951 = vmatpush1.msra.mxu0 %v834_v14  ;;  %v521_v58 = vmul.f32 %v4160_v47, %v4160_v47  ;;  %v459_v6 = vmul.f32 0.0078125, %v399_v35 }
  0xf1   : > { %v464_v5 = vmul.f32 0.0078125, %v409_v32  ;;  %v526_v63 = vmul.f32 %v4136_v62, %v4136_v62  ;;  %3023 = vmatprep.subr.mxu1 %v830_v36  ;;  %952 = vmatprep.subr.mxu0 %v830_v36 }
  0xf2   : > { %3039 = vmatpush1.msra.mxu1 %v829_v40  ;;  %953 = vmatpush1.msra.mxu0 %v829_v40 }
  0xf3   : > { %v4149_v37 = vsub.f32 %v4027_v16, %v464_v5  ;;  %565 = vadd.xlane.f32.xlu1 %v526_v63  ;;  %613 = vadd.xlane.f32.xlu0 %v550_v1  ;;  %v458_v16 = vmul.f32 0.0078125, %v4118_v34  ;;  %v403_v54 = vpop.xlane.xlu0 %402 }
  0xf4   : > { %v413_v41 = vpop.xlane.xlu1 %412  ;;  %3024 = vmatprep.subr.mxu1 %v825_v8  ;;  %954 = vmatprep.subr.mxu0 %v825_v8  ;;  %v461_v32 = vmul.f32 0.0078125, %v403_v54 }
  0xf5   : > { %v466_v42 = vmul.f32 0.0078125, %v413_v41  ;;  %v528_v43 = vmul.f32 %v4149_v37, %v4149_v37  ;;  %3040 = vmatpush1.msra.mxu1 %v824_v44  ;;  %v4168_v11 = vsub.f32 %v4003_v10, %v458_v16  ;;  %955 = vmatpush1.msra.mxu0 %v824_v44  ;;  %v4177_v10 = vsub.f32 %v4014_v13, %v459_v6 }
  0xf6   : > { %3025 = vmatprep.subr.mxu1 %v820_v51  ;;  %956 = vmatprep.subr.mxu0 %v820_v51  ;;  %v4184_v63 = vsub.f32 %v4022_v15, %v461_v32 }
  0xf7   : > { %v4157_v46 = vsub.f32 %v4035_v18, %v466_v42  ;;  %569 = vadd.xlane.f32.xlu1 %v528_v43  ;;  %551 = vadd.xlane.f32.xlu0 %v519_v4  ;;  %v819_v18 = vld [vmem:[#allocation5] sm:$0xff]  ;;  %v407_v60 = vpop.xlane.xlu0 %406  ;;  %v522_v2 = vmul.f32 %v4168_v11, %v4168_v11 }
  0xf8   : > { %v415_v53 = vpop.xlane.xlu1 %414  ;;  %3041 = vmatpush1.msra.mxu1 %v819_v18  ;;  %957 = vmatpush1.msra.mxu0 %v819_v18  ;;  %v463_v13 = vmul.f32 0.0078125, %v407_v60  ;;  %v525_v40 = vmul.f32 %v4184_v63, %v4184_v63 }
  0xf9   : > { %v530_v34 = vmul.f32 %v4157_v46, %v4157_v46  ;;  %1183 = vmatprep.subr.mxu1 %v897_v57  ;;  %v467_v43 = vmul.f32 0.0078125, %v415_v53 }
  0xfa   : > { %v4192_v39 = vsub.f32 %v4030_v17, %v463_v13 }
  0xfb   : > { %573 = vadd.xlane.f32.xlu1 %v530_v34  ;;  %553 = vadd.xlane.f32.xlu0 %v520_v49  ;;  %v411_v35 = vpop.xlane.xlu0 %410  ;;  %v4204_v44 = vsub.f32 %v4043_v20, %v467_v43 }
  0xfc   : > { %v417_v12 = vpop.xlane.xlu1 %416  ;;  %v465_v41 = vmul.f32 0.0078125, %v411_v35 }
  0xfd   : > { %v468_v59 = vmul.f32 0.0078125, %v417_v12  ;;  %v531_v20 = vmul.f32 %v4204_v44, %v4204_v44 }
  0xfe   : > { %v4199_v8 = vsub.f32 %v4038_v19, %v465_v41 }
  0xff   : > { %v4174_v1 = vsub.f32 %v4047_v21, %v468_v59  ;;  %555 = vadd.xlane.f32.xlu0 %v521_v58  ;;  %v523_v21 = vmul.f32 %v4177_v10, %v4177_v10 }
 0x100   : > { %v419_v33 = vpop.xlane.xlu1 %418  ;;  %v529_v53 = vmul.f32 %v4199_v8, %v4199_v8 }
 0x101   : > { %v532_v5 = vmul.f32 %v4174_v1, %v4174_v1  ;;  %v469_v49 = vmul.f32 0.0078125, %v419_v33 }
 0x103   : > { %577 = vadd.xlane.f32.xlu1 %v532_v5  ;;  %557 = vadd.xlane.f32.xlu0 %v522_v2  ;;  %v4214_v34 = vsub.f32 %v4051_v22, %v469_v49 }
 0x104   : > { %v421_v14 = vpop.xlane.xlu1 %420 }
 0x105   : > { %v470_v36 = vmul.f32 0.0078125, %v421_v14  ;;  %v533_v12 = vmul.f32 %v4214_v34, %v4214_v34 }
 0x107   : > { %v4189_v4 = vsub.f32 %v4055_v23, %v470_v36  ;;  %559 = vadd.xlane.f32.xlu0 %v523_v21  ;;  %v527_v23 = vmul.f32 %v4192_v39, %v4192_v39 }
 0x108   : > { %v423_v15 = vpop.xlane.xlu1 %422 }
 0x109   : > { %v534_v42 = vmul.f32 %v4189_v4, %v4189_v4  ;;  %v471_v18 = vmul.f32 0.0078125, %v423_v15 }
 0x10b   : > { %581 = vadd.xlane.f32.xlu1 %v534_v42  ;;  %563 = vadd.xlane.f32.xlu0 %v525_v40  ;;  %v4224_v59 = vsub.f32 %v4059_v24, %v471_v18 }
 0x10c   : > { %v425_v16 = vpop.xlane.xlu1 %424 }
 0x10d   : > { %v472_v17 = vmul.f32 0.0078125, %v425_v16 }
 0x10f   : > { %v4207_v51 = vsub.f32 %v4063_v25, %v472_v17  ;;  %567 = vadd.xlane.f32.xlu0 %v527_v23 }
 0x110   : > { %v427_v54 = vpop.xlane.xlu1 %426 }
 0x111   : > { %v536_v19 = vmul.f32 %v4207_v51, %v4207_v51  ;;  %v473_v58 = vmul.f32 0.0078125, %v427_v54 }
 0x113   : > { %585 = vadd.xlane.f32.xlu1 %v536_v19  ;;  %571 = vadd.xlane.f32.xlu0 %v529_v53  ;;  %v4229_v2 = vsub.f32 %v4067_v26, %v473_v58 }
 0x114   : > { %v429_v57 = vpop.xlane.xlu1 %428 }
 0x115   : > { %v474_v25 = vmul.f32 0.0078125, %v429_v57  ;;  %v537_v13 = vmul.f32 %v4229_v2, %v4229_v2 }
 0x117   : > { %v4219_v6 = vsub.f32 %v4071_v27, %v474_v25  ;;  %575 = vadd.xlane.f32.xlu0 %v531_v20  ;;  %v535_v27 = vmul.f32 %v4224_v59, %v4224_v59 }
 0x118   : > { %v431_v22 = vpop.xlane.xlu1 %430 }
 0x119   : > { %v538_v60 = vmul.f32 %v4219_v6, %v4219_v6  ;;  %v475_v32 = vmul.f32 0.0078125, %v431_v22  ;;  %v4261_v22 = vld [vmem:[%s5337_s1] ss:$0 sm:$0xff] }
 0x11b   : > { %589 = vadd.xlane.f32.xlu1 %v538_v60  ;;  %579 = vadd.xlane.f32.xlu0 %v533_v12  ;;  %v4234_v21 = vsub.f32 %v4075_v28, %v475_v32 }
 0x11c   : > { %v433_v33 = vpop.xlane.xlu1 %432 }
 0x11d   : > { %v476_v5 = vmul.f32 0.0078125, %v433_v33  ;;  %v539_v28 = vmul.f32 %v4234_v21, %v4234_v21  ;;  %v4267_v33 = vld [vmem:[%s5338_s2] ss:$0 sm:$0xff] }
 0x11f   : > { %v4237_v24 = vsub.f32 %v4079_v29, %v476_v5  ;;  %583 = vadd.xlane.f32.xlu0 %v535_v27 }
 0x120   : > { %v435_v26 = vpop.xlane.xlu1 %434 }
 0x121   : > { %v477_v14 = vmul.f32 0.0078125, %v435_v26  ;;  %v540_v35 = vmul.f32 %v4237_v24, %v4237_v24 }
 0x123   : > { %v4244_v36 = vsub.f32 %v4083_v30, %v477_v14  ;;  %593 = vadd.xlane.f32.xlu1 %v540_v35  ;;  %587 = vadd.xlane.f32.xlu0 %v537_v13  ;;  %v4255_v30 = vld [vmem:[#allocation5 + $0x278] sm:$0xff] }
 0x124   : > { %v437_v40 = vpop.xlane.xlu1 %436  ;;  %2930 = vmatprep.subr.mxu0 %v4255_v30 }
 0x125   : > { %v478_v29 = vmul.f32 0.0078125, %v437_v40  ;;  %v541_v15 = vmul.f32 %v4244_v36, %v4244_v36 }
 0x127   : > { %v4249_v41 = vsub.f32 %v4087_v31, %v478_v29  ;;  %591 = vadd.xlane.f32.xlu0 %v539_v28  ;;  %v896_v28 = vld [vmem:[#allocation5 + $0x268] sm:$0xff] }
 0x129   : > { %v542_v42 = vmul.f32 %v4249_v41, %v4249_v41 }
 0x12b   : > { %597 = vadd.xlane.f32.xlu1 %v542_v42  ;;  %595 = vadd.xlane.f32.xlu0 %v541_v15  ;;  %v891_v42 = vld [vmem:[#allocation5 + $0x240] sm:$0xff] }
 0x160   : > { %v600_v43 = vpop.xlane.xlu0 %599 }
 0x161   : > { %v639_v23 = vmul.f32 0.0078125, %v600_v43 }
 0x163   : > { %v671_v16 = vadd.f32 1e-05, %v639_v23 }
 0x164   : > { %v602_v17 = vpop.xlane.xlu0 %601 }
 0x165   : > { %3134 = vrsqrt.f32 %v671_v16  ;;  %v640_v31 = vmul.f32 0.0078125, %v602_v17  ;;  %v887_v16 = vld [vmem:[#allocation5 + $0x220] sm:$0xff] }
 0x167   : > { %v672_v49 = vadd.f32 1e-05, %v640_v31 }
 0x168   : > { %v604_v53 = vpop.xlane.xlu0 %603 }
 0x169   : > { %3136 = vrsqrt.f32 %v672_v49  ;;  %v641_v54 = vmul.f32 0.0078125, %v604_v53 }
 0x16b   : > { %v673_v19 = vadd.f32 1e-05, %v641_v54  ;;  %v882_v54 = vld [vmem:[#allocation5 + $0x1f8] sm:$0xff] }
 0x16c   : > { %v606_v18 = vpop.xlane.xlu0 %605 }
 0x16d   : > { %3138 = vrsqrt.f32 %v673_v19  ;;  %v642_v20 = vmul.f32 0.0078125, %v606_v18  ;;  %v881_v18 = vld [vmem:[#allocation5 + $0x1f0] sm:$0xff] }
 0x16f   : > { %v674_v57 = vadd.f32 1e-05, %v642_v20 }
 0x170   : > { %v608_v25 = vpop.xlane.xlu0 %607 }
 0x171   : > { %3140 = vrsqrt.f32 %v674_v57  ;;  %v643_v58 = vmul.f32 0.0078125, %v608_v25  ;;  %v877_v25 = vld [vmem:[#allocation5 + $0x1d0] sm:$0xff] }
 0x172   : > { %v3135_v12 = vpop.eup %3134 }
 0x173   : > { %v675_v60 = vadd.f32 1e-05, %v643_v58  ;;  %v735_v32 = vmul.f32 %v3135_v12, %v4091_v45  ;;  %v892_v45 = vld [vmem:[#allocation5 + $0x248] sm:$0xff] }
 0x174   : > { %v610_v27 = vpop.xlane.xlu0 %609  ;;  %v876_v12 = vld [vmem:[#allocation5 + $0x1c8] sm:$0xff] }
 0x175   : > { %3142 = vrsqrt.f32 %v675_v60  ;;  %v644_v5 = vmul.f32 0.0078125, %v610_v27  ;;  %v773_v13 = vmul.f32 %v4261_v22, %v735_v32  ;;  %v872_v27 = vld [vmem:[#allocation5 + $0x1a8] sm:$0xff] }
 0x176   : > { %v3137_v26 = vpop.eup %3136 }
 0x177   : > { %v676_v14 = vadd.f32 1e-05, %v644_v5  ;;  %v4271_v35 = vadd.f32 %v4267_v33, %v773_v13  ;;  %v736_v40 = vmul.f32 %v3137_v26, %v4099_v52  ;;  %v886_v52 = vld [vmem:[#allocation5 + $0x218] sm:$0xff]  ;;  %v871_v13 = vld [vmem:[#allocation5 + $0x1a0] sm:$0xff] }
 0x178   : > { %v612_v29 = vpop.xlane.xlu0 %611 }
 0x179   : > { %3144 = vrsqrt.f32 %v676_v14  ;;  %v645_v15 = vmul.f32 0.0078125, %v612_v29  ;;  %1135 = vmatmul.mubr.f32.vlgmr.msra.gmra.mxu1 %v4271_v35  ;;  %v774_v43 = vmul.f32 %v4261_v22, %v736_v40  ;;  %v866_v29 = vld [vmem:[#allocation5 + $0x178] sm:$0xff] }
 0x17a   : > { %v3139_v23 = vpop.eup %3138  ;;  %1184 = vmatpush1.msra.mxu1 %v896_v28  ;;  %1140 = vmatprep.mubr.f32.mxu1 %v3784_v55  ;;  %v867_v28 = vld [vmem:[#allocation5 + $0x180] sm:$0xff] }
 0x17b   : > { %v677_v17 = vadd.f32 1e-05, %v645_v15  ;;  %1185 = vmatprep.subr.mxu1 %v892_v45  ;;  %v4278_v31 = vadd.f32 %v4267_v33, %v774_v43  ;;  %v737_v49 = vmul.f32 %v3139_v23, %v4096_v50  ;;  %v861_v23 = vld [vmem:[#allocation5 + $0x150] sm:$0xff] }
 0x17c   : > { %1186 = vmatpush1.msra.mxu1 %v891_v42  ;;  %v614_v53 = vpop.xlane.xlu0 %613  ;;  %v862_v42 = vld [vmem:[#allocation5 + $0x158] sm:$0xff] }
 0x17d   : > { %1187 = vmatprep.subr.mxu1 %v887_v16  ;;  %v646_v19 = vmul.f32 0.0078125, %v614_v53  ;;  %1141 = vmatmul.mubr.f32.gmra.mxu1 %v4278_v31  ;;  %v775_v20 = vmul.f32 %v4261_v22, %v737_v49  ;;  %3146 = vrsqrt.f32 %v677_v17  ;;  %v856_v53 = vld [vmem:[#allocation5 + $0x128] sm:$0xff] }
 0x17e   : > { %v3141_v57 = vpop.eup %3140  ;;  %1188 = vmatpush1.msra.mxu1 %v886_v52  ;;  %1146 = vmatprep.mubr.f32.mxu1 %v3784_v55  ;;  %v857_v52 = vld [vmem:[#allocation5 + $0x130] sm:$0xff] }
 0x17f   : > { %v678_v58 = vadd.f32 1e-05, %v646_v19  ;;  %1189 = vmatprep.subr.mxu1 %v882_v54  ;;  %v4285_v50 = vadd.f32 %v4267_v33, %v775_v20  ;;  %v738_v60 = vmul.f32 %v3141_v57, %v4104_v56  ;;  %v562_v20 = vpop.xlane.xlu1 %561 }
 0x180   : > { %1190 = vmatpush1.msra.mxu1 %v881_v18  ;;  %v552_v32 = vpop.xlane.xlu0 %551  ;;  %v852_v18 = vld [vmem:[#allocation5 + $0x108] sm:$0xff] }
 0x181   : > { %1191 = vmatprep.subr.mxu1 %v877_v25  ;;  %v615_v5 = vmul.f32 0.0078125, %v552_v32  ;;  %1147 = vmatmul.mubr.f32.gmra.mxu1 %v4285_v50  ;;  %v776_v26 = vmul.f32 %v4261_v22, %v738_v60  ;;  %3148 = vrsqrt.f32 %v678_v58  ;;  %v851_v25 = vld [vmem:[#allocation5 + $0x100] sm:$0xff] }
 0x182   : > { %v3143_v14 = vpop.eup %3142  ;;  %1192 = vmatpush1.msra.mxu1 %v876_v12  ;;  %1152 = vmatprep.mubr.f32.mxu1 %v3784_v55  ;;  %v847_v12 = vld [vmem:[#allocation5 + $0xe0] sm:$0xff] }
 0x183   : > { %v647_v40 = vadd.f32 1e-05, %v615_v5  ;;  %1193 = vmatprep.subr.mxu1 %v872_v27  ;;  %v4292_v56 = vadd.f32 %v4267_v33, %v776_v26  ;;  %v739_v45 = vmul.f32 %v3143_v14, %v4109_v61  ;;  %v846_v27 = vld [vmem:[#allocation5 + $0xd8] sm:$0xff]  ;;  %v620_v5 = vmul.f32 0.0078125, %v562_v20 }
 0x184   : > { %1194 = vmatpush1.msra.mxu1 %v871_v13  ;;  %v554_v15 = vpop.xlane.xlu0 %553  ;;  %v842_v26 = vld [vmem:[#allocation5 + $0xb8] sm:$0xff] }
 0x185   : > { %1195 = vmatprep.subr.mxu1 %v867_v28  ;;  %v616_v43 = vmul.f32 0.0078125, %v554_v15  ;;  %1153 = vmatmul.mubr.f32.gmra.mxu1 %v4292_v56  ;;  %v777_v16 = vmul.f32 %v4261_v22, %v739_v45  ;;  %3150 = vrsqrt.f32 %v647_v40  ;;  %v841_v40 = vld [vmem:[#allocation5 + $0xb0] sm:$0xff] }
 0x186   : > { %v3145_v17 = vpop.eup %3144  ;;  %1196 = vmatpush1.msra.mxu1 %v866_v29  ;;  %1158 = vmatprep.mubr.f32.mxu1 %v3784_v55  ;;  %v837_v29 = vld [vmem:[#allocation5 + $0x90] sm:$0xff] }
 0x187   : > { %v648_v49 = vadd.f32 1e-05, %v616_v43  ;;  %1197 = vmatprep.subr.mxu1 %v862_v42  ;;  %v4299_v61 = vadd.f32 %v4267_v33, %v777_v16  ;;  %v740_v54 = vmul.f32 %v3145_v17, %v4114_v3  ;;  %v652_v43 = vadd.f32 1e-05, %v620_v5  ;;  %v836_v17 = vld [vmem:[#allocation5 + $0x88] sm:$0xff]  ;;  %v821_v5 = vld [vmem:[#allocation5 + $0x10] sm:$0xff] }
 0x188   : > { %1198 = vmatpush1.msra.mxu1 %v861_v23  ;;  %v556_v19 = vpop.xlane.xlu0 %555  ;;  %v566_v23 = vpop.xlane.xlu1 %565 }
 0x189   : > { %1199 = vmatprep.subr.mxu1 %v857_v52  ;;  %v617_v57 = vmul.f32 0.0078125, %v556_v19  ;;  %1159 = vmatmul.mubr.f32.gmra.mxu1 %v4299_v61  ;;  %v778_v58 = vmul.f32 %v4261_v22, %v740_v54  ;;  %3152 = vrsqrt.f32 %v648_v49  ;;  %v831_v54 = vld [vmem:[#allocation5 + $0x60] sm:$0xff]  ;;  %v622_v20 = vmul.f32 0.0078125, %v566_v23  ;;  %v893_v23 = vld [vmem:[#allocation5 + $0x250] sm:$0xff] }
 0x18a   : > { %1200 = vmatpush1.msra.mxu1 %v856_v53  ;;  %1164 = vmatprep.mubr.f32.mxu1 %v3784_v55  ;;  %v3147_v60 = vpop.eup %3146  ;;  %v832_v53 = vld [vmem:[#allocation5 + $0x68] sm:$0xff] }
 0x18b   : > { %v649_v32 = vadd.f32 1e-05, %v617_v57  ;;  %1201 = vmatprep.subr.mxu1 %v852_v18  ;;  %v4306_v3 = vadd.f32 %v4267_v33, %v778_v58  ;;  %v741_v14 = vmul.f32 %v3147_v60, %v4121_v38 }
 0x18c   : > { %1202 = vmatpush1.msra.mxu1 %v851_v25  ;;  %v558_v13 = vpop.xlane.xlu0 %557  ;;  %v827_v25 = vld [vmem:[#allocation5 + $0x40] sm:$0xff] }
 0x18d   : > { %3154 = vrsqrt.f32 %v649_v32  ;;  %1203 = vmatprep.subr.mxu1 %v847_v12  ;;  %v618_v28 = vmul.f32 0.0078125, %v558_v13  ;;  %1165 = vmatmul.mubr.f32.gmra.mxu1 %v4306_v3  ;;  %v779_v45 = vmul.f32 %v4261_v22, %v741_v14  ;;  %v826_v12 = vld [vmem:[#allocation5 + $0x38] sm:$0xff]  ;;  %v654_v14 = vadd.f32 1e-05, %v622_v20 }
 0x18e   : > { %1204 = vmatpush1.msra.mxu1 %v846_v27  ;;  %1170 = vmatprep.mubr.f32.mxu1 %v3784_v55  ;;  %v3149_v15 = vpop.eup %3148  ;;  %v822_v27 = vld [vmem:[#allocation5 + $0x18] sm:$0xff] }
 0x18f   : > { %v650_v42 = vadd.f32 1e-05, %v618_v28  ;;  %1205 = vmatprep.subr.mxu1 %v842_v26  ;;  %v4313_v38 = vadd.f32 %v4267_v33, %v779_v45  ;;  %v742_v52 = vmul.f32 %v3149_v15, %v4126_v7 }
 0x190   : > { %1206 = vmatpush1.msra.mxu1 %v841_v40  ;;  %v560_v16 = vpop.xlane.xlu0 %559  ;;  %v570_v40 = vpop.xlane.xlu1 %569 }
 0x191   : > { %1207 = vmatprep.subr.mxu1 %v837_v29  ;;  %v619_v49 = vmul.f32 0.0078125, %v560_v16  ;;  %3156 = vrsqrt.f32 %v650_v42  ;;  %1171 = vmatmul.mubr.f32.gmra.mxu1 %v4313_v38  ;;  %v780_v19 = vmul.f32 %v4261_v22, %v742_v52  ;;  %v624_v16 = vmul.f32 0.0078125, %v570_v40 }
 0x192   : > { %v3151_v18 = vpop.eup %3150  ;;  %1208 = vmatpush1.msra.mxu1 %v836_v17  ;;  %1176 = vmatprep.mubr.f32.mxu1 %v3784_v55  ;;  %3158 = vrsqrt.f32 %v652_v43 }
 0x193   : > { %v651_v57 = vadd.f32 1e-05, %v619_v49  ;;  %1209 = vmatprep.subr.mxu1 %v832_v53  ;;  %v4320_v7 = vadd.f32 %v4267_v33, %v780_v19  ;;  %v711_v60 = vmul.f32 %v3151_v18, %v4139_v0  ;;  %v656_v18 = vadd.f32 1e-05, %v624_v16 }
 0x194   : > { %v564_v58 = vpop.xlane.xlu0 %563  ;;  %1210 = vmatpush1.msra.mxu1 %v831_v54  ;;  %v888_v54 = vld [vmem:[#allocation5 + $0x228] sm:$0xff]  ;;  %v574_v20 = vpop.xlane.xlu1 %573 }
 0x195   : > { %3160 = vrsqrt.f32 %v651_v57  ;;  %v621_v32 = vmul.f32 0.0078125, %v564_v58  ;;  %1211 = vmatprep.subr.mxu1 %v827_v25  ;;  %1177 = vmatmul.mubr.f32.gmra.mxu1 %v4320_v7  ;;  %v749_v13 = vmul.f32 %v4261_v22, %v711_v60  ;;  %v883_v60 = vld [vmem:[#allocation5 + $0x200] sm:$0xff] }
 0x196   : > { %v3153_v26 = vpop.eup %3152  ;;  %1212 = vmatpush1.msra.mxu1 %v826_v12  ;;  %1247 = vmatprep.mubr.f32.mxu1 %v3784_v55 }
 0x197   : > { %v653_v28 = vadd.f32 1e-05, %v621_v32  ;;  %1213 = vmatprep.subr.mxu1 %v822_v27  ;;  %v4327_v0 = vadd.f32 %v4267_v33, %v749_v13  ;;  %v712_v45 = vmul.f32 %v3153_v26, %v4146_v9  ;;  %v626_v32 = vmul.f32 0.0078125, %v574_v20 }
 0x198   : > { %v568_v29 = vpop.xlane.xlu0 %567  ;;  %1214 = vmatpush1.msra.mxu1 %v821_v5 }
 0x199   : > { %v623_v15 = vmul.f32 0.0078125, %v568_v29  ;;  %3162 = vrsqrt.f32 %v653_v28  ;;  %991 = vmatmul.mubr.f32.vlgmr.msra.gmra.mxu0 %v4327_v0  ;;  %1248 = vmatmul.mubr.f32.vlgmr.msra.gmra.mxu1 %v4327_v0  ;;  %v750_v43 = vmul.f32 %v4261_v22, %v712_v45  ;;  %v878_v28 = vld [vmem:[#allocation5 + $0x1d8] sm:$0xff]  ;;  %v658_v29 = vadd.f32 1e-05, %v626_v32  ;;  %v578_v45 = vpop.xlane.xlu1 %577 }
 0x19a   : > { %v3155_v42 = vpop.eup %3154  ;;  %3164 = vrsqrt.f32 %v654_v14  ;;  %996 = vmatprep.mubr.f32.mxu0 %v3784_v55  ;;  %1253 = vmatprep.mubr.f32.mxu1 %v3784_v55  ;;  %v628_v16 = vmul.f32 0.0078125, %v578_v45 }
 0x19b   : > { %v713_v17 = vmul.f32 %v3155_v42, %v4160_v47  ;;  %v655_v9 = vadd.f32 1e-05, %v623_v15  ;;  %v4337_v52 = vadd.f32 %v4267_v33, %v750_v43  ;;  %2931 = vmatpush3.msra.mxu0 %v4255_v30 }
 0x19c   : > { %v572_v49 = vpop.xlane.xlu0 %571  ;;  %2932 = vmatprep.subr.mxu0 %v893_v23 }
 0x19d   : > { %v751_v53 = vmul.f32 %v4261_v22, %v713_v17  ;;  %997 = vmatmul.mubr.f32.gmra.mxu0 %v4337_v52  ;;  %1254 = vmatmul.mubr.f32.gmra.mxu1 %v4337_v52  ;;  %3166 = vrsqrt.f32 %v655_v9  ;;  %v625_v30 = vmul.f32 0.0078125, %v572_v49 }
 0x19e   : > { %v3157_v19 = vpop.eup %3156  ;;  %1002 = vmatprep.mubr.f32.mxu0 %v3784_v55  ;;  %1259 = vmatprep.mubr.f32.mxu1 %v3784_v55  ;;  %3168 = vrsqrt.f32 %v656_v18  ;;  %v660_v18 = vadd.f32 1e-05, %v628_v16 }
 0x19f   : > { %v4346_v47 = vadd.f32 %v4267_v33, %v751_v53  ;;  %v714_v57 = vmul.f32 %v3157_v19, %v4168_v11  ;;  %2933 = vmatpush3.msra.mxu0 %v893_v23  ;;  %v3159_v25 = vpop.eup %3158  ;;  %v657_v11 = vadd.f32 1e-05, %v625_v30  ;;  %v873_v23 = vld [vmem:[#allocation5 + $0x1b0] sm:$0xff]  ;;  %v868_v19 = vld [vmem:[#allocation5 + $0x188] sm:$0xff]  ;;  %v582_v30 = vpop.xlane.xlu1 %581 }
 0x1a0   : > { %2934 = vmatprep.subr.mxu0 %v888_v54  ;;  %v716_v13 = vmul.f32 %v3159_v25, %v4129_v48  ;;  %v576_v26 = vpop.xlane.xlu0 %575 }
 0x1a1   : > { %1003 = vmatmul.mubr.f32.gmra.mxu0 %v4346_v47  ;;  %1260 = vmatmul.mubr.f32.gmra.mxu1 %v4346_v47  ;;  %v752_v12 = vmul.f32 %v4261_v22, %v714_v57  ;;  %3170 = vrsqrt.f32 %v657_v11  ;;  %v627_v15 = vmul.f32 0.0078125, %v576_v26 }
 0x1a2   : > { %v3161_v58 = vpop.eup %3160  ;;  %1008 = vmatprep.mubr.f32.mxu0 %v3784_v55  ;;  %1265 = vmatprep.mubr.f32.mxu1 %v3784_v55  ;;  %v754_v42 = vmul.f32 %v4261_v22, %v716_v13  ;;  %3172 = vrsqrt.f32 %v658_v29 }
 0x1a3   : > { %v715_v27 = vmul.f32 %v3161_v58, %v4177_v10  ;;  %v4356_v5 = vadd.f32 %v4267_v33, %v752_v12  ;;  %2935 = vmatpush3.msra.mxu0 %v888_v54  ;;  %v659_v9 = vadd.f32 1e-05, %v627_v15  ;;  %v863_v12 = vld [vmem:[#allocation5 + $0x160] sm:$0xff]  ;;  %v586_v29 = vpop.xlane.xlu1 %585 }
 0x1a4   : > { %2936 = vmatprep.subr.mxu0 %v883_v60  ;;  %v4375_v49 = vadd.f32 %v4267_v33, %v754_v42  ;;  %v580_v54 = vpop.xlane.xlu0 %579  ;;  %v853_v42 = vld [vmem:[#allocation5 + $0x110] sm:$0xff] }
 0x1a5   : > { %v753_v14 = vmul.f32 %v4261_v22, %v715_v27  ;;  %1009 = vmatmul.mubr.f32.gmra.mxu0 %v4356_v5  ;;  %1266 = vmatmul.mubr.f32.gmra.mxu1 %v4356_v5  ;;  %3174 = vrsqrt.f32 %v659_v9  ;;  %v629_v57 = vmul.f32 0.0078125, %v580_v54 }
 0x1a6   : > { %v3163_v40 = vpop.eup %3162  ;;  %1014 = vmatprep.mubr.f32.mxu0 %v3784_v55  ;;  %1271 = vmatprep.mubr.f32.mxu1 %v3784_v55  ;;  %3176 = vrsqrt.f32 %v660_v18 }
 0x1a7   : > { %v4365_v10 = vadd.f32 %v4267_v33, %v753_v14  ;;  %v3165_v48 = vpop.eup %3164  ;;  %v717_v43 = vmul.f32 %v3163_v40, %v4184_v63  ;;  %2937 = vmatpush3.msra.mxu0 %v883_v60  ;;  %v630_v60 = vmul.f32 0.0078125, %v582_v30  ;;  %v661_v27 = vadd.f32 1e-05, %v629_v57  ;;  %v858_v14 = vld [vmem:[#allocation5 + $0x138] sm:$0xff]  ;;  %v590_v18 = vpop.xlane.xlu1 %589  ;;  %v843_v57 = vld [vmem:[#allocation5 + $0xc0] sm:$0xff] }
 0x1a8   : > { %2938 = vmatprep.subr.mxu0 %v878_v28  ;;  %v718_v17 = vmul.f32 %v3165_v48, %v4136_v62  ;;  %v584_v26 = vpop.xlane.xlu0 %583 }
 0x1a9   : > { %1015 = vmatmul.mubr.f32.gmra.mxu0 %v4365_v10  ;;  %1272 = vmatmul.mubr.f32.gmra.mxu1 %v4365_v10  ;;  %v755_v63 = vmul.f32 %v4261_v22, %v717_v43  ;;  %3178 = vrsqrt.f32 %v661_v27  ;;  %v631_v48 = vmul.f32 0.0078125, %v584_v26  ;;  %v632_v43 = vmul.f32 0.0078125, %v586_v29 }
 0x1aa   : > { %1020 = vmatprep.mubr.f32.mxu0 %v3784_v55  ;;  %1277 = vmatprep.mubr.f32.mxu1 %v3784_v55  ;;  %v3167_v53 = vpop.eup %3166  ;;  %v756_v62 = vmul.f32 %v4261_v22, %v718_v17 }
 0x1ab   : > { %2939 = vmatpush3.msra.mxu0 %v878_v28  ;;  %v3169_v20 = vpop.eup %3168  ;;  %v4384_v25 = vadd.f32 %v4267_v33, %v755_v63  ;;  %v719_v58 = vmul.f32 %v3167_v53, %v4192_v39  ;;  %v662_v28 = vadd.f32 1e-05, %v630_v60  ;;  %v663_v16 = vadd.f32 1e-05, %v631_v48  ;;  %v848_v53 = vld [vmem:[#allocation5 + $0xe8] sm:$0xff]  ;;  %v833_v48 = vld [vmem:[#allocation5 + $0x70] sm:$0xff] }
 0x1ac   : > { %2940 = vmatprep.subr.mxu0 %v873_v23  ;;  %v720_v32 = vmul.f32 %v3169_v20, %v4149_v37  ;;  %v4393_v11 = vadd.f32 %v4267_v33, %v756_v62  ;;  %v588_v63 = vpop.xlane.xlu0 %587  ;;  %v664_v54 = vadd.f32 1e-05, %v632_v43 }
 0x1ad   : > { %1021 = vmatmul.mubr.f32.gmra.mxu0 %v4375_v49  ;;  %1278 = vmatmul.mubr.f32.gmra.mxu1 %v4375_v49  ;;  %v757_v39 = vmul.f32 %v4261_v22, %v719_v58  ;;  %3180 = vrsqrt.f32 %v662_v28  ;;  %v633_v62 = vmul.f32 0.0078125, %v588_v63  ;;  %v634_v58 = vmul.f32 0.0078125, %v590_v18  ;;  %v594_v28 = vpop.xlane.xlu1 %593 }
 0x1ae   : > { %1026 = vmatprep.mubr.f32.mxu0 %v3784_v55  ;;  %1283 = vmatprep.mubr.f32.mxu1 %v3784_v55  ;;  %v3171_v13 = vpop.eup %3170  ;;  %v758_v37 = vmul.f32 %v4261_v22, %v720_v32  ;;  %3182 = vrsqrt.f32 %v663_v16 }
 0x1af   : > { %2941 = vmatpush3.msra.mxu0 %v873_v23  ;;  %v3173_v40 = vpop.eup %3172  ;;  %v4402_v45 = vadd.f32 %v4267_v33, %v757_v39  ;;  %v721_v15 = vmul.f32 %v3171_v13, %v4199_v8  ;;  %3184 = vrsqrt.f32 %v664_v54  ;;  %v665_v60 = vadd.f32 1e-05, %v633_v62  ;;  %v838_v13 = vld [vmem:[#allocation5 + $0x98] sm:$0xff]  ;;  %v823_v62 = vld [vmem:[#allocation5 + $0x20] sm:$0xff] }
 0x1b0   : > { %2942 = vmatprep.subr.mxu0 %v868_v19  ;;  %v722_v23 = vmul.f32 %v3173_v40, %v4157_v46  ;;  %v4411_v17 = vadd.f32 %v4267_v33, %v758_v37  ;;  %v592_v39 = vpop.xlane.xlu0 %591  ;;  %v666_v26 = vadd.f32 1e-05, %v634_v58 }
 0x1b1   : > { %1027 = vmatmul.mubr.f32.gmra.mxu0 %v4384_v25  ;;  %1284 = vmatmul.mubr.f32.gmra.mxu1 %v4384_v25  ;;  %v759_v8 = vmul.f32 %v4261_v22, %v721_v15  ;;  %3186 = vrsqrt.f32 %v665_v60  ;;  %v635_v37 = vmul.f32 0.0078125, %v592_v39  ;;  %v636_v15 = vmul.f32 0.0078125, %v594_v28 }
 0x1b2   : > { %1032 = vmatprep.mubr.f32.mxu0 %v3784_v55  ;;  %1289 = vmatprep.mubr.f32.mxu1 %v3784_v55  ;;  %v3175_v9 = vpop.eup %3174  ;;  %v760_v46 = vmul.f32 %v4261_v22, %v722_v23  ;;  %3188 = vrsqrt.f32 %v666_v26 }
 0x1b3   : > { %2943 = vmatpush3.msra.mxu0 %v868_v19  ;;  %v3177_v19 = vpop.eup %3176  ;;  %v4420_v20 = vadd.f32 %v4267_v33, %v759_v8  ;;  %v723_v30 = vmul.f32 %v3175_v9, %v4204_v44  ;;  %v667_v43 = vadd.f32 1e-05, %v635_v37  ;;  %v828_v9 = vld [vmem:[#allocation5 + $0x48] sm:$0xff]  ;;  %v668_v63 = vadd.f32 1e-05, %v636_v15 }
 0x1b4   : > { %2944 = vmatprep.subr.mxu0 %v863_v12  ;;  %v4429_v32 = vadd.f32 %v4267_v33, %v760_v46  ;;  %v596_v8 = vpop.xlane.xlu0 %595  ;;  %v598_v18 = vpop.xlane.xlu1 %597 }
 0x1b5   : > { %1033 = vmatmul.mubr.f32.gmra.mxu0 %v4393_v11  ;;  %1290 = vmatmul.mubr.f32.gmra.mxu1 %v4393_v11  ;;  %v761_v44 = vmul.f32 %v4261_v22, %v723_v30  ;;  %3190 = vrsqrt.f32 %v667_v43  ;;  %v637_v54 = vmul.f32 0.0078125, %v596_v8  ;;  %v638_v58 = vmul.f32 0.0078125, %v598_v18 }
 0x1b6   : > { %1038 = vmatprep.mubr.f32.mxu0 %v3784_v55  ;;  %1295 = vmatprep.mubr.f32.mxu1 %v3784_v55  ;;  %v3179_v27 = vpop.eup %3178  ;;  %3192 = vrsqrt.f32 %v668_v63 }
 0x1b7   : > { %2945 = vmatpush3.msra.mxu0 %v863_v12  ;;  %v724_v12 = vmul.f32 %v3177_v19, %v4174_v1  ;;  %v4438_v40 = vadd.f32 %v4267_v33, %v761_v44  ;;  %v725_v29 = vmul.f32 %v3179_v27, %v4214_v34  ;;  %v670_v27 = vadd.f32 1e-05, %v638_v58 }
 0x1b8   : > { %2946 = vmatprep.subr.mxu0 %v858_v14 }
 0x1b9   : > { %1039 = vmatmul.mubr.f32.gmra.mxu0 %v4402_v45  ;;  %1296 = vmatmul.mubr.f32.gmra.mxu1 %v4402_v45  ;;  %v762_v1 = vmul.f32 %v4261_v22, %v724_v12  ;;  %v763_v34 = vmul.f32 %v4261_v22, %v725_v29 }
 0x1ba   : > { %1044 = vmatprep.mubr.f32.mxu0 %v3784_v55  ;;  %1301 = vmatprep.mubr.f32.mxu1 %v3784_v55 }
 0x1bb   : > { %2947 = vmatpush3.msra.mxu0 %v858_v14  ;;  %v3181_v14 = vpop.eup %3180  ;;  %v4447_v23 = vadd.f32 %v4267_v33, %v762_v1  ;;  %v4456_v46 = vadd.f32 %v4267_v33, %v763_v34 }
 0x1bc   : > { %2948 = vmatprep.subr.mxu0 %v853_v42  ;;  %v3183_v16 = vpop.eup %3182 }
 0x1bd   : > { %1045 = vmatmul.mubr.f32.gmra.mxu0 %v4411_v17  ;;  %1302 = vmatmul.mubr.f32.gmra.mxu1 %v4411_v17  ;;  %v727_v19 = vmul.f32 %v3183_v16, %v4224_v59  ;;  %v669_v59 = vadd.f32 1e-05, %v637_v54 }
 0x1be   : > { %1050 = vmatprep.mubr.f32.mxu0 %v3784_v55  ;;  %1307 = vmatprep.mubr.f32.mxu1 %v3784_v55 }
 0x1bf   : > { %2949 = vmatpush3.msra.mxu0 %v853_v42  ;;  %v726_v42 = vmul.f32 %v3181_v14, %v4189_v4  ;;  %v765_v12 = vmul.f32 %v4261_v22, %v727_v19  ;;  %3194 = vrsqrt.f32 %v669_v59 }
 0x1c0   : > { %2950 = vmatprep.subr.mxu0 %v848_v53  ;;  %3196 = vrsqrt.f32 %v670_v27 }
 0x1c1   : > { %1051 = vmatmul.mubr.f32.gmra.mxu0 %v4420_v20  ;;  %1308 = vmatmul.mubr.f32.gmra.mxu1 %v4420_v20  ;;  %v764_v4 = vmul.f32 %v4261_v22, %v726_v42 }
 0x1c2   : > { %1056 = vmatprep.mubr.f32.mxu0 %v3784_v55  ;;  %1313 = vmatprep.mubr.f32.mxu1 %v3784_v55 }
 0x1c3   : > { %2951 = vmatpush3.msra.mxu0 %v848_v53  ;;  %v3185_v53 = vpop.eup %3184  ;;  %v4464_v30 = vadd.f32 %v4267_v33, %v764_v4 }
 0x1c4   : > { %2952 = vmatprep.subr.mxu0 %v843_v57  ;;  %v3187_v60 = vpop.eup %3186 }
 0x1c5   : > { %1057 = vmatmul.mubr.f32.gmra.mxu0 %v4429_v32  ;;  %1314 = vmatmul.mubr.f32.gmra.mxu1 %v4429_v32  ;;  %v729_v39 = vmul.f32 %v3187_v60, %v4229_v2 }
 0x1c6   : > { %1062 = vmatprep.mubr.f32.mxu0 %v3784_v55  ;;  %1319 = vmatprep.mubr.f32.mxu1 %v3784_v55 }
 0x1c7   : > { %2953 = vmatpush3.msra.mxu0 %v843_v57  ;;  %v728_v57 = vmul.f32 %v3185_v53, %v4207_v51  ;;  %v4474_v51 = vadd.f32 %v4267_v33, %v765_v12  ;;  %v767_v1 = vmul.f32 %v4261_v22, %v729_v39 }
 0x1c8   : > { %2954 = vmatprep.subr.mxu0 %v838_v13 }
 0x1c9   : > { %1063 = vmatmul.mubr.f32.gmra.mxu0 %v4438_v40  ;;  %1320 = vmatmul.mubr.f32.gmra.mxu1 %v4438_v40  ;;  %v766_v44 = vmul.f32 %v4261_v22, %v728_v57  ;;  %v4491_v2 = vadd.f32 %v4267_v33, %v767_v1 }
 0x1ca   : > { %1068 = vmatprep.mubr.f32.mxu0 %v3784_v55  ;;  %1325 = vmatprep.mubr.f32.mxu1 %v3784_v55 }
 0x1cb   : > { %2955 = vmatpush3.msra.mxu0 %v838_v13  ;;  %v3189_v13 = vpop.eup %3188  ;;  %v4482_v26 = vadd.f32 %v4267_v33, %v766_v44 }
 0x1cc   : > { %2956 = vmatprep.subr.mxu0 %v833_v48  ;;  %v730_v14 = vmul.f32 %v3189_v13, %v4219_v6  ;;  %v3191_v28 = vpop.eup %3190 }
 0x1cd   : > { %1069 = vmatmul.mubr.f32.gmra.mxu0 %v4447_v23  ;;  %1326 = vmatmul.mubr.f32.gmra.mxu1 %v4447_v23  ;;  %v731_v29 = vmul.f32 %v3191_v28, %v4234_v21 }
 0x1ce   : > { %1074 = vmatprep.mubr.f32.mxu0 %v3784_v55  ;;  %1331 = vmatprep.mubr.f32.mxu1 %v3784_v55  ;;  %v768_v37 = vmul.f32 %v4261_v22, %v730_v14 }
 0x1cf   : > { %2957 = vmatpush3.msra.mxu0 %v833_v48  ;;  %v3193_v48 = vpop.eup %3192  ;;  %v769_v15 = vmul.f32 %v4261_v22, %v731_v29 }
 0x1d0   : > { %2958 = vmatprep.subr.mxu0 %v828_v9  ;;  %v4500_v6 = vadd.f32 %v4267_v33, %v768_v37  ;;  %v732_v42 = vmul.f32 %v3193_v48, %v4237_v24  ;;  %v3195_v43 = vpop.eup %3194 }
 0x1d1   : > { %1075 = vmatmul.mubr.f32.gmra.mxu0 %v4456_v46  ;;  %1332 = vmatmul.mubr.f32.gmra.mxu1 %v4456_v46  ;;  %v807_v21 = vadd.f32 %v4267_v33, %v769_v15  ;;  %v733_v16 = vmul.f32 %v3195_v43, %v4244_v36  ;;  %v3197_v8 = vpop.eup %3196 }
 0x1d2   : > { %1080 = vmatprep.mubr.f32.mxu0 %v3784_v55  ;;  %1337 = vmatprep.mubr.f32.mxu1 %v3784_v55  ;;  %v770_v34 = vmul.f32 %v4261_v22, %v732_v42  ;;  %v734_v63 = vmul.f32 %v3197_v8, %v4249_v41 }
 0x1d3   : > { %2959 = vmatpush3.msra.mxu0 %v828_v9  ;;  %v771_v9 = vmul.f32 %v4261_v22, %v733_v16 }
 0x1d4   : > { %2960 = vmatprep.subr.mxu0 %v823_v62  ;;  %v808_v24 = vadd.f32 %v4267_v33, %v770_v34  ;;  %v772_v4 = vmul.f32 %v4261_v22, %v734_v63 }
 0x1d5   : > { %1081 = vmatmul.mubr.f32.gmra.mxu0 %v4464_v30  ;;  %1338 = vmatmul.mubr.f32.gmra.mxu1 %v4464_v30  ;;  %v809_v36 = vadd.f32 %v4267_v33, %v771_v9 }
 0x1d6   : > { %1086 = vmatprep.mubr.f32.mxu0 %v3784_v55  ;;  %1343 = vmatprep.mubr.f32.mxu1 %v3784_v55  ;;  %v810_v53 = vadd.f32 %v4267_v33, %v772_v4 }
 0x1d7   : > { %2961 = vmatpush3.msra.mxu0 %v823_v62 }
 0x1d9   : > { %1087 = vmatmul.mubr.f32.gmra.mxu0 %v4474_v51  ;;  %1344 = vmatmul.mubr.f32.gmra.mxu1 %v4474_v51 }
 0x1da   : > { %1092 = vmatprep.mubr.f32.mxu0 %v3784_v55  ;;  %1349 = vmatprep.mubr.f32.mxu1 %v3784_v55 }
 0x1dd   : > { %1093 = vmatmul.mubr.f32.gmra.mxu0 %v4482_v26  ;;  %1350 = vmatmul.mubr.f32.gmra.mxu1 %v4482_v26 }
 0x1de   : > { %1098 = vmatprep.mubr.f32.mxu0 %v3784_v55  ;;  %1355 = vmatprep.mubr.f32.mxu1 %v3784_v55 }
 0x1e1   : > { %1099 = vmatmul.mubr.f32.gmra.mxu0 %v4491_v2  ;;  %1356 = vmatmul.mubr.f32.gmra.mxu1 %v4491_v2 }
 0x1e2   : > { %1104 = vmatprep.mubr.f32.mxu0 %v3784_v55  ;;  %1361 = vmatprep.mubr.f32.mxu1 %v3784_v55 }
 0x1e5   : > { %1105 = vmatmul.mubr.f32.gmra.mxu0 %v4500_v6  ;;  %1362 = vmatmul.mubr.f32.gmra.mxu1 %v4500_v6 }
 0x1e6   : > { %1110 = vmatprep.mubr.f32.mxu0 %v3784_v55  ;;  %1367 = vmatprep.mubr.f32.mxu1 %v3784_v55 }
 0x1e9   : > { %1111 = vmatmul.mubr.f32.gmra.mxu0 %v807_v21  ;;  %1368 = vmatmul.mubr.f32.gmra.mxu1 %v807_v21 }
 0x1ea   : > { %1116 = vmatprep.mubr.f32.mxu0 %v3784_v55  ;;  %1373 = vmatprep.mubr.f32.mxu1 %v3784_v55 }
 0x1ed   : > { %1117 = vmatmul.mubr.f32.gmra.mxu0 %v808_v24  ;;  %1374 = vmatmul.mubr.f32.gmra.mxu1 %v808_v24 }
 0x1ee   : > { %1122 = vmatprep.mubr.f32.mxu0 %v3784_v55  ;;  %1379 = vmatprep.mubr.f32.mxu1 %v3784_v55 }
 0x1f1   : > { %1123 = vmatmul.mubr.f32.gmra.mxu0 %v809_v36  ;;  %1380 = vmatmul.mubr.f32.gmra.mxu1 %v809_v36 }
 0x1f2   : > { %1128 = vmatprep.mubr.f32.mxu0 %v3784_v55  ;;  %1385 = vmatprep.mubr.f32.mxu1 %v3784_v55 }
 0x1f5   : > { %1129 = vmatmul.mubr.f32.gmra.mxu0 %v810_v53  ;;  %1386 = vmatmul.mubr.f32.gmra.mxu1 %v810_v53 }
 0x1f6   : > { %2962 = vmatprep.mubr.f32.mxu0 %v4327_v0  ;;  %1391 = vmatprep.mubr.f32.mxu1 %v3784_v55 }
 0x1f9   : > { %1392 = vmatmul.mubr.f32.gmra.mxu1 %v4271_v35  ;;  %2963 = vmatmul.mubr.f32.vlgmr.msra.gmra.mxu0 %v4337_v52 }
 0x1fa   : > { %2965 = vmatprep.mubr.f32.mxu0 %v4346_v47  ;;  %1397 = vmatprep.mubr.f32.mxu1 %v3784_v55 }
 0x1fd   : > { %1398 = vmatmul.mubr.f32.gmra.mxu1 %v4278_v31  ;;  %2966 = vmatmul.mubr.f32.gmra.mxu0 %v4356_v5 }
 0x1fe   : > { %2968 = vmatprep.mubr.f32.mxu0 %v4365_v10  ;;  %1403 = vmatprep.mubr.f32.mxu1 %v3784_v55 }
 0x201   : > { %1404 = vmatmul.mubr.f32.gmra.mxu1 %v4285_v50  ;;  %2969 = vmatmul.mubr.f32.gmra.mxu0 %v4375_v49 }
 0x202   : > { %2971 = vmatprep.mubr.f32.mxu0 %v4384_v25  ;;  %1409 = vmatprep.mubr.f32.mxu1 %v3784_v55  ;;  %v4602_v25 = vld [vmem:[%s5340_s4] sm:$0x1f] }
 0x205   : > { %1410 = vmatmul.mubr.f32.gmra.mxu1 %v4292_v56  ;;  %2972 = vmatmul.mubr.f32.gmra.mxu0 %v4393_v11 }
 0x206   : > { %2974 = vmatprep.mubr.f32.mxu0 %v4402_v45  ;;  %1415 = vmatprep.mubr.f32.mxu1 %v3784_v55 }
 0x209   : > { %1416 = vmatmul.mubr.f32.gmra.mxu1 %v4299_v61  ;;  %2975 = vmatmul.mubr.f32.gmra.mxu0 %v4411_v17 }
 0x20a   : > { %2977 = vmatprep.mubr.f32.mxu0 %v4420_v20  ;;  %1421 = vmatprep.mubr.f32.mxu1 %v3784_v55 }
 0x20d   : > { %1422 = vmatmul.mubr.f32.gmra.mxu1 %v4306_v3  ;;  %2978 = vmatmul.mubr.f32.gmra.mxu0 %v4429_v32 }
 0x20e   : > { %2980 = vmatprep.mubr.f32.mxu0 %v4438_v40  ;;  %1427 = vmatprep.mubr.f32.mxu1 %v3784_v55 }
 0x211   : > { %1428 = vmatmul.mubr.f32.gmra.mxu1 %v4313_v38  ;;  %2981 = vmatmul.mubr.f32.gmra.mxu0 %v4447_v23 }
 0x212   : > { %2983 = vmatprep.mubr.f32.mxu0 %v4456_v46  ;;  %1433 = vmatprep.mubr.f32.mxu1 %v3784_v55 }
 0x215   : > { %1434 = vmatmul.mubr.f32.gmra.mxu1 %v4320_v7  ;;  %2984 = vmatmul.mubr.f32.gmra.mxu0 %v4464_v30 }
 0x216   : > { %2986 = vmatprep.mubr.f32.mxu0 %v4474_v51 }
 0x219   : > { %2987 = vmatmul.mubr.f32.gmra.mxu0 %v4482_v26 }
 0x21a   : > { %2989 = vmatprep.mubr.f32.mxu0 %v4491_v2 }
 0x21d   : > { %2990 = vmatmul.mubr.f32.gmra.mxu0 %v4500_v6 }
 0x21e   : > { %2992 = vmatprep.mubr.f32.mxu0 %v807_v21 }
 0x221   : > { %2993 = vmatmul.mubr.f32.gmra.mxu0 %v808_v24 }
 0x222   : > { %2995 = vmatprep.mubr.f32.mxu0 %v809_v36 }
 0x225   : > { %2996 = vmatmul.mubr.f32.gmra.mxu0 %v810_v53 }
 0x226   : > { %2998 = vmatprep.mubr.f32.mxu0 %v4271_v35 }
 0x229   : > { %2999 = vmatmul.mubr.f32.gmra.mxu0 %v4278_v31 }
 0x22a   : > { %3001 = vmatprep.mubr.f32.mxu0 %v4285_v50 }
 0x22d   : > { %3002 = vmatmul.mubr.f32.gmra.mxu0 %v4292_v56 }
 0x22e   : > { %3004 = vmatprep.mubr.f32.mxu0 %v4299_v61 }
 0x231   : > { %3005 = vmatmul.mubr.f32.gmra.mxu0 %v4306_v3 }
 0x232   : > { %3007 = vmatprep.mubr.f32.mxu0 %v4313_v38  ;;  %v901_v38 = vlaneseq }
 0x234   : > { %v4591_v52 = vshrl.u32 %v901_v38, 7 }
 0x235   : > { %3008 = vmatmul.mubr.f32.gmra.mxu0 %v4320_v7 }
 0x236   : > { %v911_v5 = vsub.s32 2, %v4591_v52  ;;  %v915_v49 = vsub.s32 3, %v4591_v52 }
 0x238   : > { %v4607_v45 = vrot.slane %v4602_v25, %v911_v5  ;;  %v4612_v20 = vrot.slane %v4602_v25, %v915_v49 }
 0x239   : > { %v4567_v55 = vpop.f32.mrf.mxu1 }
 0x23b   : > { %v4569_v41 = vpop.f32.mrf.mxu1 }
 0x23d   : > { %v4571_v22 = vpop.f32.mrf.mxu1 }
 0x23f   : > { %v4573_v33 = vpop.f32.mrf.mxu1 }
 0x240   : > { %5364 = vst [vmem:[#allocation18_spill] sm:$0xff] %v4573_v33 }
 0x241   : > { %v4575_v35 = vpop.f32.mrf.mxu1 }
 0x242   : > { %5365 = vst [vmem:[#allocation19_spill] sm:$0xff] %v4575_v35 }
 0x243   : > { %v4577_v31 = vpop.f32.mrf.mxu1 }
 0x244   : > { %5366 = vst [vmem:[#allocation20_spill] sm:$0xff] %v4577_v31 }
 0x245   : > { %v4579_v50 = vpop.f32.mrf.mxu1 }
 0x246   : > { %5367 = vst [vmem:[#allocation21_spill] sm:$0xff] %v4579_v50 }
 0x247   : > { %v4581_v56 = vpop.f32.mrf.mxu1 }
 0x248   : > { %5368 = vst [vmem:[#allocation22_spill] sm:$0xff] %v4581_v56 }
 0x249   : > { %v4583_v61 = vpop.f32.mrf.mxu1 }
 0x24a   : > { %5369 = vst [vmem:[#allocation23_spill] sm:$0xff] %v4583_v61 }
 0x24b   : > { %v4585_v3 = vpop.f32.mrf.mxu1 }
 0x24c   : > { %5370 = vst [vmem:[#allocation24_spill] sm:$0xff] %v4585_v3 }
 0x24d   : > { %v4587_v7 = vpop.f32.mrf.mxu1 }
 0x24e   : > { %5371 = vst [vmem:[#allocation25_spill] sm:$0xff] %v4587_v7 }
 0x24f   : > { %v4589_v0 = vpop.f32.mrf.mxu1 }
 0x250   : > { %5372 = vst [vmem:[#allocation26_spill] sm:$0xff] %v4589_v0 }
 0x251   : > { %v4593_v47 = vpop.f32.mrf.mxu1 }
 0x252   : > { %5373 = vst [vmem:[#allocation27_spill] sm:$0xff] %v4593_v47 }
 0x253   : > { %v4596_v10 = vpop.f32.mrf.mxu1 }
 0x254   : > { %5374 = vst [vmem:[#allocation28_spill] sm:$0xff] %v4596_v10 }
 0x255   : > { %v4604_v11 = vpop.f32.mrf.mxu1 }
 0x256   : > { %5375 = vst [vmem:[#allocation29_spill] sm:$0xff] %v4604_v11 }
 0x257   : > { %v4609_v17 = vpop.f32.mrf.mxu1 }
 0x258   : > { %5376 = vst [vmem:[#allocation30_spill] sm:$0xff] %v4609_v17 }
 0x259   : > { %v4614_v32 = vpop.f32.mrf.mxu0  ;;  %v1249_v40 = vpop.f32.mrf.mxu1 }
 0x25a   : > { %v1250_v23 = vadd.f32 %v1249_v40, %v4607_v45 }
 0x25b   : > { %v4617_v54 = vpop.f32.mrf.mxu0  ;;  %v1251_v46 = vpop.f32.mrf.mxu1 }
 0x25c   : > { %v2771_v19 = vmul.f32 -1.442695, %v1250_v23  ;;  %v1252_v18 = vadd.f32 %v1251_v46, %v4612_v20 }
 0x25d   : > { %v4620_v62 = vpop.f32.mrf.mxu0  ;;  %v1255_v30 = vpop.f32.mrf.mxu1 }
 0x25e   : > { %3198 = vpow2.f32 %v2771_v19  ;;  %v2803_v57 = vmul.f32 -1.442695, %v1252_v18  ;;  %v1256_v58 = vadd.f32 %v1255_v30, %v4607_v45 }
 0x25f   : > { %v4623_v59 = vpop.f32.mrf.mxu0  ;;  %v1257_v12 = vpop.f32.mrf.mxu1 }
 0x260   : > { %3200 = vpow2.f32 %v2803_v57  ;;  %v2772_v60 = vmul.f32 -1.442695, %v1256_v58  ;;  %v1258_v44 = vadd.f32 %v1257_v12, %v4612_v20 }
 0x261   : > { %v4626_v27 = vpop.f32.mrf.mxu0  ;;  %v1261_v51 = vpop.f32.mrf.mxu1 }
 0x262   : > { %3202 = vpow2.f32 %v2772_v60  ;;  %v2804_v39 = vmul.f32 -1.442695, %v1258_v44  ;;  %v1262_v13 = vadd.f32 %v1261_v51, %v4607_v45 }
 0x263   : > { %v4629_v26 = vpop.f32.mrf.mxu0  ;;  %v1263_v1 = vpop.f32.mrf.mxu1 }
 0x264   : > { %3204 = vpow2.f32 %v2804_v39  ;;  %v2773_v14 = vmul.f32 -1.442695, %v1262_v13  ;;  %v1264_v28 = vadd.f32 %v1263_v1, %v4612_v20 }
 0x265   : > { %v4632_v2 = vpop.f32.mrf.mxu0  ;;  %v1267_v37 = vpop.f32.mrf.mxu1 }
 0x266   : > { %3206 = vpow2.f32 %v2773_v14  ;;  %v2805_v29 = vmul.f32 -1.442695, %v1264_v28  ;;  %v1268_v48 = vadd.f32 %v1267_v37, %v4607_v45 }
 0x267   : > { %v4635_v6 = vpop.f32.mrf.mxu0  ;;  %v1269_v15 = vpop.f32.mrf.mxu1 }
 0x268   : > { %3208 = vpow2.f32 %v2805_v29  ;;  %v2774_v42 = vmul.f32 -1.442695, %v1268_v48  ;;  %v1270_v43 = vadd.f32 %v1269_v15, %v4612_v20 }
 0x269   : > { %v4638_v21 = vpop.f32.mrf.mxu0  ;;  %v1273_v34 = vpop.f32.mrf.mxu1 }
 0x26a   : > { %3210 = vpow2.f32 %v2774_v42  ;;  %v2806_v16 = vmul.f32 -1.442695, %v1270_v43  ;;  %v1274_v8 = vadd.f32 %v1273_v34, %v4607_v45  ;;  %v903_v42 = vsub.s32 0, %v4591_v52 }
 0x26b   : > { %v3199_v24 = vpop.eup %3198  ;;  %v4641_v9 = vpop.f32.mrf.mxu0 }
 0x26c   : > { %v1275_v63 = vpop.f32.mrf.mxu1  ;;  %v1761_v36 = vadd.f32 1.0, %v3199_v24  ;;  %3212 = vpow2.f32 %v2806_v16  ;;  %v2775_v4 = vmul.f32 -1.442695, %v1274_v8 }
 0x26d   : > { %v3201_v53 = vpop.eup %3200  ;;  %v1276_v38 = vadd.f32 %v1275_v63, %v4612_v20  ;;  %v4644_v5 = vpop.f32.mrf.mxu0 }
 0x26e   : > { %v1279_v49 = vpop.f32.mrf.mxu1  ;;  %3214 = vrcp.f32 %v1761_v36  ;;  %v1985_v40 = vadd.f32 1.0, %v3201_v53 }
 0x26f   : > { %v1280_v23 = vadd.f32 %v1279_v49, %v4607_v45  ;;  %v3203_v46 = vpop.eup %3202  ;;  %3216 = vpow2.f32 %v2775_v4  ;;  %v2807_v19 = vmul.f32 -1.442695, %v1276_v38  ;;  %v4647_v18 = vpop.f32.mrf.mxu0 }
 0x270   : > { %v1281_v30 = vpop.f32.mrf.mxu1  ;;  %3218 = vrcp.f32 %v1985_v40  ;;  %v1762_v57 = vadd.f32 1.0, %v3203_v46 }
 0x271   : > { %v2776_v58 = vmul.f32 -1.442695, %v1280_v23  ;;  %v3205_v12 = vpop.eup %3204  ;;  %3220 = vpow2.f32 %v2807_v19  ;;  %v1282_v60 = vadd.f32 %v1281_v30, %v4612_v20  ;;  %v4650_v44 = vpop.f32.mrf.mxu0  ;;  %v4663_v23 = vrot.slane %v4602_v25, %v903_v42 }
 0x272   : > { %v1285_v51 = vpop.f32.mrf.mxu1  ;;  %3222 = vrcp.f32 %v1762_v57  ;;  %v1986_v39 = vadd.f32 1.0, %v3205_v12 }
 0x273   : > { %v1286_v13 = vadd.f32 %v1285_v51, %v4607_v45  ;;  %v3207_v1 = vpop.eup %3206  ;;  %3224 = vpow2.f32 %v2776_v58  ;;  %v2808_v14 = vmul.f32 -1.442695, %v1282_v60  ;;  %v4653_v28 = vpop.f32.mrf.mxu0  ;;  %v993_v60 = vadd.f32 %v4614_v32, %v4663_v23 }
 0x274   : > { %v1287_v37 = vpop.f32.mrf.mxu1  ;;  %3226 = vrcp.f32 %v1986_v39  ;;  %v1763_v29 = vadd.f32 1.0, %v3207_v1 }
 0x275   : > { %v2777_v48 = vmul.f32 -1.442695, %v1286_v13  ;;  %v3209_v15 = vpop.eup %3208  ;;  %3228 = vpow2.f32 %v2808_v14  ;;  %v1288_v43 = vadd.f32 %v1287_v37, %v4612_v20  ;;  %v4657_v34 = vpop.f32.mrf.mxu0 }
 0x276   : > { %v1291_v16 = vpop.f32.mrf.mxu1  ;;  %3230 = vrcp.f32 %v1763_v29  ;;  %v1987_v8 = vadd.f32 1.0, %v3209_v15 }
 0x277   : > { %v1292_v24 = vadd.f32 %v1291_v16, %v4607_v45  ;;  %v3211_v63 = vpop.eup %3210  ;;  %3232 = vpow2.f32 %v2777_v48  ;;  %v2809_v36 = vmul.f32 -1.442695, %v1288_v43  ;;  %v4660_v4 = vpop.f32.mrf.mxu0 }
 0x278   : > { %v1293_v53 = vpop.f32.mrf.mxu1  ;;  %3234 = vrcp.f32 %v1987_v8  ;;  %v1764_v38 = vadd.f32 1.0, %v3211_v63  ;;  %v999_v63 = vadd.f32 %v4620_v62, %v4663_v23 }
 0x279   : > { %v2778_v49 = vmul.f32 -1.442695, %v1292_v24  ;;  %v3213_v40 = vpop.eup %3212  ;;  %3236 = vpow2.f32 %v2809_v36  ;;  %v1294_v46 = vadd.f32 %v1293_v53, %v4612_v20  ;;  %v4666_v19 = vpop.f32.mrf.mxu0 }
 0x27a   : > { %v1297_v30 = vpop.f32.mrf.mxu1  ;;  %3238 = vrcp.f32 %v1764_v38  ;;  %v1988_v57 = vadd.f32 1.0, %v3213_v40 }
 0x27b   : > { %v1298_v58 = vadd.f32 %v1297_v30, %v4607_v45  ;;  %v3215_v12 = vpop.eup %3214  ;;  %3240 = vpow2.f32 %v2778_v49  ;;  %v2810_v51 = vmul.f32 -1.442695, %v1294_v46  ;;  %v4671_v39 = vpop.f32.mrf.mxu0 }
 0x27c   : > { %v1299_v13 = vpop.f32.mrf.mxu1  ;;  %v3217_v1 = vpop.eup %3216  ;;  %3242 = vrcp.f32 %v1988_v57  ;;  %v1857_v43 = vmul.f32 %v3215_v12, %v993_v60 }
 0x27d   : > { %v2779_v14 = vmul.f32 -1.442695, %v1298_v58  ;;  %v1300_v37 = vadd.f32 %v1299_v13, %v4612_v20  ;;  %v4674_v29 = vpop.eup %3218  ;;  %v1765_v48 = vadd.f32 1.0, %v3217_v1  ;;  %3244 = vpow2.f32 %v2810_v51  ;;  %v4676_v15 = vpop.f32.mrf.mxu0 }
 0x27e   : > { %v1303_v42 = vpop.f32.mrf.mxu1  ;;  %v3221_v16 = vpop.eup %3220  ;;  %2113 = vxpose.xlu0.b32.start [1/16] %v1857_v43, 128 }
 0x27f   : > { %3246 = vpow2.f32 %v2779_v14  ;;  %v2811_v32 = vmul.f32 -1.442695, %v1300_v37  ;;  %v1304_v8 = vadd.f32 %v1303_v42, %v4607_v45  ;;  %v3223_v24 = vpop.eup %3222  ;;  %v1989_v36 = vadd.f32 1.0, %v3221_v16  ;;  %v4681_v53 = vpop.f32.mrf.mxu0 }
 0x280   : > { %3248 = vrcp.f32 %v1765_v48  ;;  %v1305_v38 = vpop.f32.mrf.mxu1  ;;  %v3225_v49 = vpop.eup %3224  ;;  %v1858_v60 = vmul.f32 %v3223_v24, %v999_v63  ;;  %v1005_v14 = vadd.f32 %v4626_v27, %v4663_v23 }
 0x281   : > { %3250 = vpow2.f32 %v2811_v32  ;;  %v2780_v40 = vmul.f32 -1.442695, %v1304_v8  ;;  %v1306_v46 = vadd.f32 %v1305_v38, %v4612_v20  ;;  %v4684_v30 = vpop.eup %3226  ;;  %v1766_v57 = vadd.f32 1.0, %v3225_v49  ;;  %v4686_v58 = vpop.f32.mrf.mxu0 }
 0x282   : > { %3252 = vrcp.f32 %v1989_v36  ;;  %v1309_v12 = vpop.f32.mrf.mxu1  ;;  %v3229_v62 = vpop.eup %3228  ;;  %2114 = vxpose.xlu0.b32.cont [2/16] %v1858_v60, 128 }
 0x283   : > { %3254 = vpow2.f32 %v2780_v40  ;;  %v2812_v51 = vmul.f32 -1.442695, %v1306_v46  ;;  %v1310_v13 = vadd.f32 %v1309_v12, %v4607_v45  ;;  %v3231_v1 = vpop.eup %3230  ;;  %v1990_v37 = vadd.f32 1.0, %v3229_v62  ;;  %v4691_v48 = vpop.f32.mrf.mxu0 }
 0x284   : > { %3256 = vrcp.f32 %v1766_v57  ;;  %5377 = vst [vmem:[#allocation31_spill] sm:$0xff] %v4691_v48  ;;  %v1311_v42 = vpop.f32.mrf.mxu1  ;;  %v3233_v43 = vpop.eup %3232  ;;  %v1859_v38 = vmul.f32 %v3231_v1, %v1005_v14  ;;  %v1011_v57 = vadd.f32 %v4632_v2, %v4663_v23 }
 0x285   : > { %3258 = vpow2.f32 %v2812_v51  ;;  %v2781_v16 = vmul.f32 -1.442695, %v1310_v13  ;;  %v1312_v32 = vadd.f32 %v1311_v42, %v4612_v20  ;;  %v4694_v8 = vpop.eup %3234  ;;  %v1767_v24 = vadd.f32 1.0, %v3233_v43  ;;  %v4696_v63 = vpop.f32.mrf.mxu0 }
 0x286   : > { %3260 = vrcp.f32 %v1990_v37  ;;  %v1315_v36 = vpop.f32.mrf.mxu1  ;;  %v3237_v27 = vpop.eup %3236  ;;  %2115 = vxpose.xlu0.b32.cont [3/16] %v1859_v38, 128  ;;  %v1017_v38 = vadd.f32 %v4638_v21, %v4663_v23 }
 0x287   : > { %3262 = vpow2.f32 %v2781_v16  ;;  %v2813_v49 = vmul.f32 -1.442695, %v1312_v32  ;;  %v1316_v40 = vadd.f32 %v1315_v36, %v4607_v45  ;;  %v3239_v46 = vpop.eup %3238  ;;  %v1991_v12 = vadd.f32 1.0, %v3237_v27  ;;  %v4701_v60 = vpop.f32.mrf.mxu0 }
 0x288   : > { %3264 = vrcp.f32 %v1767_v24  ;;  %5378 = vst [vmem:[#allocation32_spill] sm:$0xff] %v4701_v60  ;;  %v1317_v62 = vpop.f32.mrf.mxu1  ;;  %v3241_v51 = vpop.eup %3240  ;;  %v1860_v16 = vmul.f32 %v3239_v46, %v1011_v57 }
 0x289   : > { %3266 = vpow2.f32 %v2813_v49  ;;  %v2782_v13 = vmul.f32 -1.442695, %v1316_v40  ;;  %v1318_v1 = vadd.f32 %v1317_v62, %v4612_v20  ;;  %v4704_v14 = vpop.eup %3242  ;;  %v1768_v37 = vadd.f32 1.0, %v3241_v51  ;;  %v4706_v42 = vpop.f32.mrf.mxu0 }
 0x28a   : > { %3268 = vrcp.f32 %v1991_v12  ;;  %v1321_v43 = vpop.f32.mrf.mxu1  ;;  %v3245_v2 = vpop.eup %3244  ;;  %2116 = vxpose.xlu0.b32.cont [4/16] %v1860_v16, 128 }
 0x28b   : > { %3270 = vpow2.f32 %v2782_v13  ;;  %v2814_v32 = vmul.f32 -1.442695, %v1318_v1  ;;  %v1322_v24 = vadd.f32 %v1321_v43, %v4607_v45  ;;  %v1992_v27 = vadd.f32 1.0, %v3245_v2  ;;  %v4711_v49 = vpop.f32.mrf.mxu0 }
 0x28c   : > { %v3247_v36 = vpop.eup %3246  ;;  %3272 = vrcp.f32 %v1768_v37  ;;  %5379 = vst [vmem:[#allocation33_spill] sm:$0xff] %v4711_v49  ;;  %v1323_v40 = vpop.f32.mrf.mxu1  ;;  %v1023_v2 = vadd.f32 %v4644_v5, %v4663_v23 }
 0x28d   : > { %v3249_v12 = vpop.eup %3248  ;;  %v1769_v62 = vadd.f32 1.0, %v3247_v36  ;;  %3274 = vpow2.f32 %v2814_v32  ;;  %v2783_v51 = vmul.f32 -1.442695, %v1322_v24  ;;  %v1324_v57 = vadd.f32 %v1323_v40, %v4612_v20  ;;  %v4714_v13 = vpop.f32.mrf.mxu0 }
 0x28e   : > { %v3251_v46 = vpop.eup %3250  ;;  %3276 = vrcp.f32 %v1992_v27  ;;  %v1327_v1 = vpop.f32.mrf.mxu1  ;;  %v1861_v43 = vmul.f32 %v3249_v12, %v1017_v38 }
 0x28f   : > { %v4716_v17 = vpop.eup %3252  ;;  %3278 = vrcp.f32 %v1769_v62  ;;  %v1993_v21 = vadd.f32 1.0, %v3251_v46  ;;  %v1328_v37 = vadd.f32 %v1327_v1, %v4607_v45  ;;  %v2815_v32 = vmul.f32 -1.442695, %v1324_v57  ;;  %v4721_v24 = vpop.f32.mrf.mxu0 }
 0x290   : > { %v3255_v16 = vpop.eup %3254  ;;  %3280 = vpow2.f32 %v2783_v51  ;;  %2117 = vxpose.xlu0.b32.cont [5/16] %v1861_v43, 128  ;;  %5380 = vst [vmem:[#allocation34_spill] sm:$0xff] %v4721_v24  ;;  %v1329_v36 = vpop.f32.mrf.mxu1  ;;  %v1029_v43 = vadd.f32 %v4650_v44, %v4663_v23 }
 0x291   : > { %v3257_v27 = vpop.eup %3256  ;;  %3282 = vrcp.f32 %v1993_v21  ;;  %v1770_v40 = vadd.f32 1.0, %v3255_v16  ;;  %v2784_v38 = vmul.f32 -1.442695, %v1328_v37  ;;  %v1330_v62 = vadd.f32 %v1329_v36, %v4612_v20  ;;  %v4724_v46 = vpop.f32.mrf.mxu0 }
 0x292   : > { %v3259_v12 = vpop.eup %3258  ;;  %3284 = vpow2.f32 %v2815_v32  ;;  %v1333_v1 = vpop.f32.mrf.mxu1  ;;  %v1862_v10 = vmul.f32 %v3257_v27, %v1023_v2 }
 0x293   : > { %v4726_v11 = vpop.eup %3260  ;;  %3286 = vrcp.f32 %v1770_v40  ;;  %v1994_v5 = vadd.f32 1.0, %v3259_v12  ;;  %v1334_v51 = vadd.f32 %v1333_v1, %v4607_v45  ;;  %v2816_v21 = vmul.f32 -1.442695, %v1330_v62  ;;  %v4731_v37 = vpop.f32.mrf.mxu0 }
 0x294   : > { %v3263_v57 = vpop.eup %3262  ;;  %3288 = vpow2.f32 %v2784_v38  ;;  %2118 = vxpose.xlu0.b32.cont [6/16] %v1862_v10, 128  ;;  %5381 = vst [vmem:[#allocation35_spill] sm:$0xff] %v4731_v37  ;;  %v1335_v16 = vpop.f32.mrf.mxu1  ;;  %v1035_v62 = vadd.f32 %v4657_v34, %v4663_v23 }
 0x295   : > { %v3265_v32 = vpop.eup %3264  ;;  %3290 = vrcp.f32 %v1994_v5  ;;  %v1771_v36 = vadd.f32 1.0, %v3263_v57  ;;  %v2785_v2 = vmul.f32 -1.442695, %v1334_v51  ;;  %v1336_v40 = vadd.f32 %v1335_v16, %v4612_v20  ;;  %v4734_v12 = vpop.f32.mrf.mxu0 }
 0x296   : > { %v3267_v27 = vpop.eup %3266  ;;  %3292 = vpow2.f32 %v2816_v21  ;;  %v1339_v1 = vpop.f32.mrf.mxu1  ;;  %v1863_v47 = vmul.f32 %v3265_v32, %v1029_v43 }
 0x297   : > { %v4736_v0 = vpop.eup %3268  ;;  %3294 = vrcp.f32 %v1771_v36  ;;  %v1995_v44 = vadd.f32 1.0, %v3267_v27  ;;  %v1340_v10 = vadd.f32 %v1339_v1, %v4607_v45  ;;  %v2817_v5 = vmul.f32 -1.442695, %v1336_v40  ;;  %v4741_v51 = vpop.f32.mrf.mxu0 }
 0x298   : > { %v3271_v38 = vpop.eup %3270  ;;  %3296 = vpow2.f32 %v2785_v2  ;;  %2119 = vxpose.xlu0.b32.cont [7/16] %v1863_v47, 128  ;;  %5382 = vst [vmem:[#allocation36_spill] sm:$0xff] %v4741_v51  ;;  %v1341_v57 = vpop.f32.mrf.mxu1  ;;  %v1041_v40 = vadd.f32 %v4666_v19, %v4663_v23 }
 0x299   : > { %v3273_v21 = vpop.eup %3272  ;;  %3298 = vrcp.f32 %v1995_v44  ;;  %v1772_v16 = vadd.f32 1.0, %v3271_v38  ;;  %v2786_v43 = vmul.f32 -1.442695, %v1340_v10  ;;  %v1342_v36 = vadd.f32 %v1341_v57, %v4612_v20  ;;  %v4744_v27 = vpop.f32.mrf.mxu0 }
 0x29a   : > { %v3275_v32 = vpop.eup %3274  ;;  %3300 = vpow2.f32 %v2817_v5  ;;  %v1345_v1 = vpop.f32.mrf.mxu1  ;;  %v1864_v7 = vmul.f32 %v3273_v21, %v1035_v62 }
 0x29b   : > { %v4746_v3 = vpop.eup %3276  ;;  %3302 = vrcp.f32 %v1772_v16  ;;  %v1996_v34 = vadd.f32 1.0, %v3275_v32  ;;  %v1346_v47 = vadd.f32 %v1345_v1, %v4607_v45  ;;  %v2818_v44 = vmul.f32 -1.442695, %v1342_v36  ;;  %v4751_v10 = vpop.f32.mrf.mxu0 }
 0x29c   : > { %v3279_v2 = vpop.eup %3278  ;;  %3304 = vpow2.f32 %v2786_v43  ;;  %2120 = vxpose.xlu0.b32.cont [8/16] %v1864_v7, 128  ;;  %v1347_v38 = vpop.f32.mrf.mxu1 }
 0x29d   : > { %v3281_v5 = vpop.eup %3280  ;;  %3306 = vrcp.f32 %v1996_v34  ;;  %v2787_v57 = vmul.f32 -1.442695, %v1346_v47  ;;  %v1348_v62 = vadd.f32 %v1347_v38, %v4612_v20  ;;  %v4756_v32 = vpop.f32.mrf.mxu0  ;;  %v1865_v61 = vmul.f32 %v3279_v2, %v1041_v40 }
 0x29e   : > { %v4754_v21 = vpop.eup %3282  ;;  %v1773_v16 = vadd.f32 1.0, %v3281_v5  ;;  %3308 = vpow2.f32 %v2818_v44  ;;  %v1351_v1 = vpop.f32.mrf.mxu1  ;;  %v1047_v34 = vadd.f32 %v4676_v15, %v4663_v23 }
 0x29f   : > { %v3285_v19 = vpop.eup %3284  ;;  %3310 = vpow2.f32 %v2787_v57  ;;  %v2819_v43 = vmul.f32 -1.442695, %v1348_v62  ;;  %v1352_v7 = vadd.f32 %v1351_v1, %v4607_v45  ;;  %v4761_v38 = vpop.f32.mrf.mxu0 }
 0x2a0   : > { %v3287_v36 = vpop.eup %3286  ;;  %3312 = vrcp.f32 %v1773_v16  ;;  %v1997_v47 = vadd.f32 1.0, %v3285_v19  ;;  %2121 = vxpose.xlu0.b32.cont [9/16] %v1865_v61, 128  ;;  %v1353_v5 = vpop.f32.mrf.mxu1 }
 0x2a1   : > { %v3289_v44 = vpop.eup %3288  ;;  %3314 = vpow2.f32 %v2819_v43  ;;  %v2788_v51 = vmul.f32 -1.442695, %v1352_v7  ;;  %v1354_v2 = vadd.f32 %v1353_v5, %v4612_v20  ;;  %v4766_v62 = vpop.f32.mrf.mxu0  ;;  %v1866_v56 = vmul.f32 %v3287_v36, %v1047_v34 }
 0x2a2   : > { %v4764_v40 = vpop.eup %3290  ;;  %3316 = vrcp.f32 %v1997_v47  ;;  %v1774_v57 = vadd.f32 1.0, %v3289_v44  ;;  %v1357_v1 = vpop.f32.mrf.mxu1  ;;  %v1053_v43 = vadd.f32 %v4686_v58, %v4663_v23 }
 0x2a3   : > { %v3293_v15 = vpop.eup %3292  ;;  %3318 = vpow2.f32 %v2788_v51  ;;  %v2820_v16 = vmul.f32 -1.442695, %v1354_v2  ;;  %v1358_v61 = vadd.f32 %v1357_v1, %v4607_v45  ;;  %v4771_v5 = vpop.f32.mrf.mxu0 }
 0x2a4   : > { %v3295_v19 = vpop.eup %3294  ;;  %3320 = vrcp.f32 %v1774_v57  ;;  %v1998_v7 = vadd.f32 1.0, %v3293_v15  ;;  %2122 = vxpose.xlu0.b32.cont [10/16] %v1866_v56, 128  ;;  %v1359_v47 = vpop.f32.mrf.mxu1 }
 0x2a5   : > { %v3297_v44 = vpop.eup %3296  ;;  %3322 = vpow2.f32 %v2820_v16  ;;  %v2789_v50 = vmul.f32 -1.442695, %v1358_v61  ;;  %v1360_v36 = vadd.f32 %v1359_v47, %v4612_v20  ;;  %v4776_v2 = vpop.f32.mrf.mxu0  ;;  %v1867_v37 = vmul.f32 %v3295_v19, %v1053_v43 }
 0x2a6   : > { %v4774_v34 = vpop.eup %3298  ;;  %3324 = vrcp.f32 %v1998_v7  ;;  %v1775_v51 = vadd.f32 1.0, %v3297_v44  ;;  %v1363_v1 = vpop.f32.mrf.mxu1  ;;  %v1059_v16 = vadd.f32 %v4696_v63, %v4663_v23 }
 0x2a7   : > { %5383 = vst [vmem:[#allocation37_spill] sm:$0xff] %v4774_v34  ;;  %v3301_v58 = vpop.eup %3300  ;;  %3326 = vpow2.f32 %v2789_v50  ;;  %v2821_v57 = vmul.f32 -1.442695, %v1360_v36  ;;  %v1364_v56 = vadd.f32 %v1363_v1, %v4607_v45  ;;  %v4781_v47 = vpop.f32.mrf.mxu0 }
 0x2a8   : > { %v3303_v15 = vpop.eup %3302  ;;  %3328 = vrcp.f32 %v1775_v51  ;;  %v1999_v61 = vadd.f32 1.0, %v3301_v58  ;;  %2123 = vxpose.xlu0.b32.cont [11/16] %v1867_v37, 128  ;;  %v1365_v7 = vpop.f32.mrf.mxu1 }
 0x2a9   : > { %v3305_v44 = vpop.eup %3304  ;;  %3330 = vpow2.f32 %v2821_v57  ;;  %v2790_v31 = vmul.f32 -1.442695, %v1364_v56  ;;  %v1366_v19 = vadd.f32 %v1365_v7, %v4612_v20  ;;  %v4786_v36 = vpop.f32.mrf.mxu0  ;;  %v1868_v24 = vmul.f32 %v3303_v15, %v1059_v16 }
 0x2aa   : > { %v4784_v43 = vpop.eup %3306  ;;  %3332 = vrcp.f32 %v1999_v61  ;;  %v1776_v50 = vadd.f32 1.0, %v3305_v44  ;;  %v1369_v1 = vpop.f32.mrf.mxu1  ;;  %v1065_v57 = vadd.f32 %v4706_v42, %v4663_v23 }
 0x2ab   : > { %5384 = vst [vmem:[#allocation38_spill] sm:$0xff] %v4784_v43  ;;  %v3309_v63 = vpop.eup %3308  ;;  %3334 = vpow2.f32 %v2790_v31  ;;  %v2822_v51 = vmul.f32 -1.442695, %v1366_v19  ;;  %v1370_v37 = vadd.f32 %v1369_v1, %v4607_v45  ;;  %v4791_v7 = vpop.f32.mrf.mxu0 }
 0x2ac   : > { %v3311_v58 = vpop.eup %3310  ;;  %3336 = vrcp.f32 %v1776_v50  ;;  %v2000_v56 = vadd.f32 1.0, %v3309_v63  ;;  %2124 = vxpose.xlu0.b32.cont [12/16] %v1868_v24, 128  ;;  %v1371_v61 = vpop.f32.mrf.mxu1  ;;  %v1071_v63 = vadd.f32 %v4714_v13, %v4663_v23 }
 0x2ad   : > { %v3313_v44 = vpop.eup %3312  ;;  %v1777_v35 = vadd.f32 1.0, %v3311_v58  ;;  %3338 = vpow2.f32 %v2822_v51  ;;  %v2791_v49 = vmul.f32 -1.442695, %v1370_v37  ;;  %v1372_v31 = vadd.f32 %v1371_v61, %v4612_v20  ;;  %v4794_v16 = vpop.f32.mrf.mxu0 }
 0x2ae   : > { %v3315_v15 = vpop.eup %3314  ;;  %3340 = vrcp.f32 %v2000_v56  ;;  %v1375_v19 = vpop.f32.mrf.mxu1  ;;  %v1869_v1 = vmul.f32 %v3313_v44, %v1065_v57 }
 0x2af   : > { %v4796_v43 = vpop.eup %3316  ;;  %3342 = vrcp.f32 %v1777_v35  ;;  %v2001_v42 = vadd.f32 1.0, %v3315_v15  ;;  %v1376_v24 = vadd.f32 %v1375_v19, %v4607_v45  ;;  %v2823_v51 = vmul.f32 -1.442695, %v1372_v31  ;;  %v4801_v37 = vpop.f32.mrf.mxu0 }
 0x2b0   : > { %5385 = vst [vmem:[#allocation39_spill] sm:$0xff] %v4796_v43  ;;  %v3319_v50 = vpop.eup %3318  ;;  %3344 = vpow2.f32 %v2791_v49  ;;  %2125 = vxpose.xlu0.b32.cont [13/16] %v1869_v1, 128  ;;  %v1377_v58 = vpop.f32.mrf.mxu1  ;;  %v907_v35 = vsub.s32 1, %v4591_v52  ;;  %v919_v31 = vsub.s32 4, %v4591_v52 }
 0x2b1   : > { %v3321_v56 = vpop.eup %3320  ;;  %3346 = vrcp.f32 %v2001_v42  ;;  %v1778_v61 = vadd.f32 1.0, %v3319_v50  ;;  %v2792_v57 = vmul.f32 -1.442695, %v1376_v24  ;;  %v1378_v15 = vadd.f32 %v1377_v58, %v4612_v20  ;;  %v4805_v19 = vpop.f32.mrf.mxu0 }
 0x2b2   : > { %v3323_v44 = vpop.eup %3322  ;;  %3348 = vpow2.f32 %v2823_v51  ;;  %v1381_v43 = vpop.f32.mrf.mxu1  ;;  %v1870_v13 = vmul.f32 %v3321_v56, %v1071_v63  ;;  %v1077_v24 = vadd.f32 %v4724_v46, %v4663_v23  ;;  %v4816_v52 = vrot.slane %v4602_v25, %v907_v35 }
 0x2b3   : > { %v4807_v49 = vpop.eup %3324  ;;  %3350 = vrcp.f32 %v1778_v61  ;;  %v2002_v1 = vadd.f32 1.0, %v3323_v44  ;;  %v1382_v42 = vadd.f32 %v1381_v43, %v4607_v45  ;;  %v2824_v51 = vmul.f32 -1.442695, %v1378_v15  ;;  %v4813_v58 = vpop.f32.mrf.mxu0 }
 0x2b4   : > { %5386 = vst [vmem:[#allocation40_spill] sm:$0xff] %v4807_v49  ;;  %v3327_v50 = vpop.eup %3326  ;;  %3352 = vpow2.f32 %v2792_v57  ;;  %2126 = vxpose.xlu0.b32.cont [14/16] %v1870_v13, 128  ;;  %v1383_v60 = vpop.f32.mrf.mxu1  ;;  %v995_v35 = vadd.f32 %v4617_v54, %v4816_v52 }
 0x2b5   : > { %v3329_v33 = vpop.eup %3328  ;;  %3354 = vrcp.f32 %v2002_v1  ;;  %v1779_v63 = vadd.f32 1.0, %v3327_v50  ;;  %v2793_v56 = vmul.f32 -1.442695, %v1382_v42  ;;  %v1384_v43 = vadd.f32 %v1383_v60, %v4612_v20  ;;  %v4819_v61 = vpop.f32.mrf.mxu0 }
 0x2b6   : > { %v3331_v49 = vpop.eup %3330  ;;  %3356 = vpow2.f32 %v2824_v51  ;;  %v1387_v46 = vpop.f32.mrf.mxu1  ;;  %v1871_v57 = vmul.f32 %v3329_v33, %v1077_v24  ;;  %v4825_v1 = vrot.slane %v4602_v25, %v919_v31  ;;  %v1083_v60 = vadd.f32 %v4734_v12, %v4663_v23 }
 0x2b7   : > { %v4821_v44 = vpop.eup %3332  ;;  %3358 = vrcp.f32 %v1779_v63  ;;  %v2003_v15 = vadd.f32 1.0, %v3331_v49  ;;  %v1388_v13 = vadd.f32 %v1387_v46, %v4607_v45  ;;  %v2825_v50 = vmul.f32 -1.442695, %v1384_v43  ;;  %v4831_v33 = vpop.f32.mrf.mxu0 }
 0x2b8   : > { %5387 = vst [vmem:[#allocation41_spill] sm:$0xff] %v4821_v44  ;;  %v3335_v42 = vpop.eup %3334  ;;  %3360 = vpow2.f32 %v2793_v56  ;;  %2127 = vxpose.xlu0.b32.cont [15/16] %v1871_v57, 128  ;;  %v1389_v24 = vpop.f32.mrf.mxu1  ;;  %v4835_v49 = vadd.f32 %v4567_v55, %v4663_v23  ;;  %v2081_v43 = vmul.f32 %v4674_v29, %v995_v35 }
 0x2b9   : > { %v3337_v51 = vpop.eup %3336  ;;  %3362 = vrcp.f32 %v2003_v15  ;;  %v1780_v25 = vadd.f32 1.0, %v3335_v42  ;;  %v2794_v31 = vmul.f32 -1.442695, %v1388_v13  ;;  %v1390_v54 = vadd.f32 %v1389_v24, %v4612_v20  ;;  %v2964_v12 = vpop.f32.mrf.mxu0 }
 0x2ba   : > { %v3339_v63 = vpop.eup %3338  ;;  %3364 = vpow2.f32 %v2825_v50  ;;  %v1393_v46 = vpop.f32.mrf.mxu1  ;;  %v1872_v56 = vmul.f32 %v3337_v51, %v1083_v60  ;;  %v1512_v55 = vadd.f32 %v2964_v12, %v4825_v1  ;;  %v1089_v13 = vadd.f32 %v4744_v27, %v4663_v23 }
 0x2bb   : > { %v4839_v57 = vpop.eup %3340  ;;  %3366 = vrcp.f32 %v1780_v25  ;;  %v2004_v44 = vadd.f32 1.0, %v3339_v63  ;;  %v1394_v34 = vadd.f32 %v1393_v46, %v4607_v45  ;;  %v1091_v42 = vadd.f32 %v4751_v10, %v4816_v52  ;;  %v1506_v29 = vpop.f32.mrf.mxu0 }
 0x2bc   : > { %5388 = vst [vmem:[#allocation42_spill] sm:$0xff] %v4839_v57  ;;  %v3343_v15 = vpop.eup %3342  ;;  %3368 = vpow2.f32 %v2794_v31  ;;  %v2826_v50 = vmul.f32 -1.442695, %v1390_v54  ;;  %2128 = vxpose.xlu0.b32.end [16/16] %v1872_v56, 128  ;;  %v1395_v60 = vpop.f32.mrf.mxu1  ;;  %v2836_v51 = vmul.f32 -1.442695, %v1512_v55  ;;  %v1507_v12 = vadd.f32 %v1506_v29, %v4825_v1 }
 0x2bd   : > { %v3345_v35 = vpop.eup %3344  ;;  %3370 = vrcp.f32 %v2004_v44  ;;  %v2795_v24 = vmul.f32 -1.442695, %v1394_v34  ;;  %v1396_v25 = vadd.f32 %v1395_v60, %v4612_v20  ;;  %v2967_v57 = vpop.f32.mrf.mxu0  ;;  %v1873_v48 = vmul.f32 %v3343_v15, %v1089_v13 }
 0x2be   : > { %v3347_v63 = vpop.eup %3346  ;;  %v1781_v46 = vadd.f32 1.0, %v3345_v35  ;;  %3372 = vpow2.f32 %v2826_v50  ;;  %v1399_v27 = vpop.f32.mrf.mxu1  ;;  %v1001_v31 = vadd.f32 %v4623_v59, %v4816_v52  ;;  %v1095_v56 = vadd.f32 %v4756_v32, %v4663_v23 }
 0x2bf   : > { %v3349_v10 = vpop.eup %3348  ;;  %3374 = vpow2.f32 %v2795_v24  ;;  %v2827_v54 = vmul.f32 -1.442695, %v1396_v25  ;;  %v1400_v44 = vadd.f32 %v1399_v27, %v4607_v45  ;;  %2145 = vxpose.xlu1.b32.start [1/16] %v1873_v48, 128  ;;  %v1516_v60 = vpop.f32.mrf.mxu0  ;;  %v4854_v29 = vmul.f32 %v3347_v63, %v1091_v42 }
 0x2c0   : > { %v3351_v34 = vpop.eup %3350  ;;  %3376 = vrcp.f32 %v1781_v46  ;;  %v2005_v55 = vadd.f32 1.0, %v3349_v10  ;;  %2209 = vxpose.xlu0.b32.start [1/16] %v2081_v43, 128  ;;  %v1401_v50 = vpop.f32.mrf.mxu1  ;;  %v2835_v13 = vmul.f32 -1.442695, %v1507_v12  ;;  %v1522_v59 = vadd.f32 %v2967_v57, %v4825_v1 }
 0x2c1   : > { %v3353_v15 = vpop.eup %3352  ;;  %3378 = vpow2.f32 %v2836_v51  ;;  %v2082_v35 = vmul.f32 %v4684_v30, %v1001_v31  ;;  %v1097_v25 = vadd.f32 %v4761_v38, %v4816_v52  ;;  %v2970_v46 = vpop.f32.mrf.mxu0  ;;  %v1874_v43 = vmul.f32 %v3351_v34, %v1095_v56 }
 0x2c2   : > { %v3355_v24 = vpop.eup %3354  ;;  %3380 = vrcp.f32 %v2005_v55  ;;  %v1782_v32 = vadd.f32 1.0, %v3353_v15  ;;  %v1007_v42 = vadd.f32 %v4629_v26, %v4816_v52  ;;  %v2796_v63 = vmul.f32 -1.442695, %v1400_v44  ;;  %v1405_v27 = vpop.f32.mrf.mxu1 }
 0x2c3   : > { %v3357_v48 = vpop.eup %3356  ;;  %3382 = vpow2.f32 %v2827_v54  ;;  %v1402_v51 = vadd.f32 %v1401_v50, %v4612_v20  ;;  %v1101_v30 = vadd.f32 %v4766_v62, %v4663_v23  ;;  %2146 = vxpose.xlu1.b32.cont [2/16] %v1874_v43, 128  ;;  %v1526_v38 = vpop.f32.mrf.mxu0  ;;  %v4865_v10 = vmul.f32 %v3355_v24, %v1097_v25 }
 0x2c4   : > { %v3359_v12 = vpop.eup %3358  ;;  %3384 = vrcp.f32 %v1782_v32  ;;  %v2006_v57 = vadd.f32 1.0, %v3357_v48  ;;  %2210 = vxpose.xlu0.b32.cont [2/16] %v2082_v35, 128  ;;  %v2838_v34 = vmul.f32 -1.442695, %v1522_v59  ;;  %v1517_v26 = vadd.f32 %v1516_v60, %v4825_v1 }
 0x2c5   : > { %v3361_v31 = vpop.eup %3360  ;;  %3386 = vpow2.f32 %v2835_v13  ;;  %v2083_v54 = vmul.f32 %v4694_v8, %v1007_v42  ;;  %v1103_v56 = vadd.f32 %v4771_v5, %v4816_v52  ;;  %v4871_v55 = vpop.f32.mrf.mxu0  ;;  %v1875_v50 = vmul.f32 %v3359_v12, %v1101_v30 }
 0x2c6   : > { %v3363_v44 = vpop.eup %3362  ;;  %3388 = vrcp.f32 %v2006_v57  ;;  %v1783_v62 = vadd.f32 1.0, %v3361_v31  ;;  %v1013_v35 = vadd.f32 %v4635_v6, %v4816_v52  ;;  %v2828_v13 = vmul.f32 -1.442695, %v1402_v51  ;;  %v1407_v5 = vpop.f32.mrf.mxu1 }
 0x2c7   : > { %v3365_v15 = vpop.eup %3364  ;;  %3390 = vpow2.f32 %v2796_v63  ;;  %v1406_v59 = vadd.f32 %v1405_v27, %v4607_v45  ;;  %v1107_v8 = vadd.f32 %v4776_v2, %v4663_v23  ;;  %2147 = vxpose.xlu1.b32.cont [3/16] %v1875_v50, 128  ;;  %v4878_v25 = vpop.f32.mrf.mxu0  ;;  %v4880_v32 = vmul.f32 %v3363_v44, %v1103_v56 }
 0x2c8   : > { %v3367_v60 = vpop.eup %3366  ;;  %3392 = vrcp.f32 %v1783_v62  ;;  %v2007_v24 = vadd.f32 1.0, %v3365_v15  ;;  %2211 = vxpose.xlu0.b32.cont [3/16] %v2083_v54, 128  ;;  %v1109_v6 = vadd.f32 %v4781_v47, %v4816_v52  ;;  %v2837_v48 = vmul.f32 -1.442695, %v1517_v26  ;;  %v1411_v54 = vpop.f32.mrf.mxu1 }
 0x2c9   : > { %v3369_v43 = vpop.eup %3368  ;;  %3394 = vpow2.f32 %v2838_v34  ;;  %v2084_v42 = vmul.f32 %v4704_v14, %v1013_v35  ;;  %v1532_v51 = vadd.f32 %v2970_v46, %v4825_v1  ;;  %v4886_v12 = vpop.f32.mrf.mxu0  ;;  %v1876_v30 = vmul.f32 %v3367_v60, %v1107_v8 }
 0x2ca   : > { %v3371_v63 = vpop.eup %3370  ;;  %3396 = vrcp.f32 %v2007_v24  ;;  %v1784_v2 = vadd.f32 1.0, %v3369_v43  ;;  %v1019_v27 = vadd.f32 %v4641_v9, %v4816_v52  ;;  %v1113_v31 = vadd.f32 %v4786_v36, %v4663_v23 }
 0x2cb   : > { %v3373_v57 = vpop.eup %3372  ;;  %3398 = vpow2.f32 %v2828_v13  ;;  %v2797_v47 = vmul.f32 -1.442695, %v1406_v59  ;;  %v1408_v26 = vadd.f32 %v1407_v5, %v4612_v20  ;;  %2148 = vxpose.xlu1.b32.cont [4/16] %v1876_v30, 128  ;;  %v4893_v46 = vpop.f32.mrf.mxu0  ;;  %v4895_v44 = vmul.f32 %v3371_v63, %v1109_v6 }
 0x2cc   : > { %v3375_v34 = vpop.eup %3374  ;;  %3400 = vrcp.f32 %v1784_v2  ;;  %v2008_v14 = vadd.f32 1.0, %v3373_v57  ;;  %2212 = vxpose.xlu0.b32.cont [4/16] %v2084_v42, 128  ;;  %v1115_v9 = vadd.f32 %v4791_v7, %v4816_v52  ;;  %v2085_v36 = vmul.f32 %v4716_v17, %v1019_v27  ;;  %v1413_v6 = vpop.f32.mrf.mxu1 }
 0x2cd   : > { %v3377_v56 = vpop.eup %3376  ;;  %v1785_v62 = vadd.f32 1.0, %v3375_v34  ;;  %3402 = vpow2.f32 %v2837_v48  ;;  %v2840_v15 = vmul.f32 -1.442695, %v1532_v51  ;;  %v1527_v35 = vadd.f32 %v1526_v38, %v4825_v1  ;;  %v4901_v13 = vpop.f32.mrf.mxu0 }
 0x2ce   : > { %v3379_v50 = vpop.eup %3378  ;;  %3404 = vrcp.f32 %v2008_v14  ;;  %v1877_v59 = vmul.f32 %v3377_v56, %v1113_v31  ;;  %v1025_v8 = vadd.f32 %v4647_v18, %v4816_v52  ;;  %v1119_v24 = vadd.f32 %v4794_v16, %v4663_v23 }
 0x2cf   : > { %v3381_v60 = vpop.eup %3380  ;;  %3406 = vrcp.f32 %v1785_v62  ;;  %v2402_v7 = vadd.f32 1.0, %v3379_v50  ;;  %v2829_v17 = vmul.f32 -1.442695, %v1408_v26  ;;  %v1412_v43 = vadd.f32 %v1411_v54, %v4607_v45  ;;  %v4908_v38 = vpop.f32.mrf.mxu0 }
 0x2d0   : > { %v3383_v5 = vpop.eup %3382  ;;  %3408 = vpow2.f32 %v2797_v47  ;;  %2213 = vxpose.xlu0.b32.cont [5/16] %v2085_v36, 128  ;;  %2149 = vxpose.xlu1.b32.cont [5/16] %v1877_v59, 128  ;;  %v4910_v48 = vmul.f32 %v3381_v60, %v1115_v9  ;;  %v1121_v18 = vadd.f32 %v4801_v37, %v4816_v52  ;;  %v2086_v63 = vmul.f32 %v4726_v11, %v1025_v8  ;;  %v1417_v54 = vpop.f32.mrf.mxu1 }
 0x2d1   : > { %v3385_v42 = vpop.eup %3384  ;;  %3410 = vrcp.f32 %v2402_v7  ;;  %v2009_v16 = vadd.f32 1.0, %v3383_v5  ;;  %v2839_v51 = vmul.f32 -1.442695, %v1527_v35  ;;  %v1542_v30 = vadd.f32 %v4871_v55, %v4825_v1  ;;  %v4917_v57 = vpop.f32.mrf.mxu0 }
 0x2d2   : > { %v3387_v2 = vpop.eup %3386  ;;  %3412 = vpow2.f32 %v2840_v15  ;;  %v1878_v27 = vmul.f32 %v3385_v42, %v1119_v24  ;;  %v1031_v47 = vadd.f32 %v4653_v28, %v4816_v52  ;;  %v1125_v37 = vadd.f32 %v4805_v19, %v4663_v23 }
 0x2d3   : > { %v3389_v31 = vpop.eup %3388  ;;  %3414 = vrcp.f32 %v2009_v16  ;;  %v2401_v34 = vadd.f32 1.0, %v3387_v2  ;;  %v2798_v11 = vmul.f32 -1.442695, %v1412_v43  ;;  %v1414_v26 = vadd.f32 %v1413_v6, %v4612_v20  ;;  %v4924_v55 = vpop.f32.mrf.mxu0 }
 0x2d4   : > { %v3391_v14 = vpop.eup %3390  ;;  %3416 = vpow2.f32 %v2829_v17  ;;  %2214 = vxpose.xlu0.b32.cont [6/16] %v2086_v63, 128  ;;  %2150 = vxpose.xlu1.b32.cont [6/16] %v1878_v27, 128  ;;  %v4926_v56 = vmul.f32 %v3389_v31, %v1121_v18  ;;  %v1127_v28 = vadd.f32 %v4813_v58, %v4816_v52  ;;  %v2087_v62 = vmul.f32 %v4736_v0, %v1031_v47  ;;  %v1419_v17 = vpop.f32.mrf.mxu1 }
 0x2d5   : > { %v3393_v9 = vpop.eup %3392  ;;  %3418 = vrcp.f32 %v2401_v34  ;;  %v1786_v19 = vadd.f32 1.0, %v3391_v14  ;;  %v2842_v50 = vmul.f32 -1.442695, %v1542_v30  ;;  %v1537_v15 = vadd.f32 %v4878_v25, %v4825_v1  ;;  %v4933_v35 = vpop.f32.mrf.mxu0 }
 0x2d6   : > { %v3395_v36 = vpop.eup %3394  ;;  %3420 = vpow2.f32 %v2839_v51  ;;  %v1879_v59 = vmul.f32 %v3393_v9, %v1125_v37  ;;  %v1037_v8 = vadd.f32 %v4660_v4, %v4816_v52  ;;  %v1418_v58 = vadd.f32 %v1417_v54, %v4607_v45 }
 0x2d7   : > { %v3397_v60 = vpop.eup %3396  ;;  %3422 = vrcp.f32 %v1786_v19  ;;  %v2404_v24 = vadd.f32 1.0, %v3395_v36  ;;  %v1131_v0 = vadd.f32 %v4819_v61, %v4663_v23  ;;  %v2830_v5 = vmul.f32 -1.442695, %v1414_v26  ;;  %v4940_v25 = vpop.f32.mrf.mxu0 }
 0x2d8   : > { %v3399_v7 = vpop.eup %3398  ;;  %3424 = vpow2.f32 %v2798_v11  ;;  %2215 = vxpose.xlu0.b32.cont [7/16] %v2087_v62, 128  ;;  %2151 = vxpose.xlu1.b32.cont [7/16] %v1879_v59, 128  ;;  %v4942_v43 = vmul.f32 %v3397_v60, %v1127_v28  ;;  %v1552_v42 = vadd.f32 %v4886_v12, %v4825_v1  ;;  %v2088_v18 = vmul.f32 %v4746_v3, %v1037_v8  ;;  %v1423_v3 = vpop.f32.mrf.mxu1 }
 0x2d9   : > { %v3401_v6 = vpop.eup %3400  ;;  %3426 = vrcp.f32 %v2404_v24  ;;  %v2010_v4 = vadd.f32 1.0, %v3399_v7  ;;  %v1133_v61 = vadd.f32 %v4831_v33, %v4816_v52  ;;  %v2841_v63 = vmul.f32 -1.442695, %v1537_v15  ;;  %v4949_v2 = vpop.f32.mrf.mxu0 }
 0x2da   : > { %v3403_v16 = vpop.eup %3402  ;;  %3428 = vpow2.f32 %v2842_v50  ;;  %v1880_v51 = vmul.f32 %v3401_v6, %v1131_v0  ;;  %v2799_v31 = vmul.f32 -1.442695, %v1418_v58  ;;  %v1420_v47 = vadd.f32 %v1419_v17, %v4612_v20  ;;  %v1425_v59 = vpop.f32.mrf.mxu1 }
 0x2db   : > { %v3405_v30 = vpop.eup %3404  ;;  %3430 = vrcp.f32 %v2010_v4  ;;  %v2403_v27 = vadd.f32 1.0, %v3403_v16  ;;  %v1043_v12 = vadd.f32 %v4671_v39, %v4816_v52  ;;  %v4954_v33 = vpop.f32.mrf.mxu0  ;;  %v2844_v11 = vmul.f32 -1.442695, %v1552_v42 }
 0x2dc   : > { %v3407_v37 = vpop.eup %3406  ;;  %3432 = vpow2.f32 %v2830_v5  ;;  %2216 = vxpose.xlu0.b32.cont [8/16] %v2088_v18, 128  ;;  %2152 = vxpose.xlu1.b32.cont [8/16] %v1880_v51, 128  ;;  %v4956_v34 = vmul.f32 %v3405_v30, %v1133_v61  ;;  %v1547_v26 = vadd.f32 %v4893_v46, %v4825_v1  ;;  %v1139_v62 = vadd.f32 %v4569_v41, %v4816_v52 }
 0x2dd   : > { %v3409_v14 = vpop.eup %3408  ;;  %3434 = vrcp.f32 %v2403_v27  ;;  %v1881_v54 = vmul.f32 %v3407_v37, %v4835_v49  ;;  %v2089_v39 = vmul.f32 %v4754_v21, %v1043_v12  ;;  %v2831_v36 = vmul.f32 -1.442695, %v1420_v47  ;;  %v4969_v46 = vpop.f32.mrf.mxu0  ;;  %v5391_v12 = vld [vmem:[#allocation18_spill] sm:$0xff] }
 0x2de   : > { %v3411_v9 = vpop.eup %3410  ;;  %v1787_v28 = vadd.f32 1.0, %v3409_v14  ;;  %3436 = vpow2.f32 %v2841_v63  ;;  %v1424_v50 = vadd.f32 %v1423_v3, %v4607_v45  ;;  %v1049_v15 = vadd.f32 %v4681_v53, %v4816_v52  ;;  %v1429_v63 = vpop.f32.mrf.mxu1 }
 0x2df   : > { %v3413_v19 = vpop.eup %3412  ;;  %2498 = vst [vmem:[%s4965_s20 + $0x8] sm:$0xff] %v3411_v9  ;;  %3438 = vpow2.f32 %v2799_v31  ;;  %v2843_v60 = vmul.f32 -1.442695, %v1547_v26  ;;  %v1562_v8 = vadd.f32 %v4901_v13, %v4825_v1  ;;  %v1143_v5 = vadd.f32 %v4571_v22, %v4663_v23  ;;  %v4982_v4 = vpop.f32.mrf.mxu0  ;;  %v5389_v13 = vld [vmem:[#allocation31_spill] sm:$0xff]  ;;  %v5390_v31 = vld [vmem:[#allocation37_spill] sm:$0xff] }
 0x2e0   : > { %v3415_v49 = vpop.eup %3414  ;;  %3440 = vrcp.f32 %v1787_v28  ;;  %v2406_v21 = vadd.f32 1.0, %v3413_v19  ;;  %2217 = vxpose.xlu0.b32.cont [9/16] %v2089_v39, 128  ;;  %2153 = vxpose.xlu1.b32.cont [9/16] %v1881_v54, 128  ;;  %v2090_v0 = vmul.f32 %v4764_v40, %v1049_v15  ;;  %v2800_v17 = vmul.f32 -1.442695, %v1424_v50 }
 0x2e1   : > { %v3417_v41 = vpop.eup %3416  ;;  %3442 = vpow2.f32 %v2844_v11  ;;  %v4975_v24 = vmul.f32 %v3415_v49, %v1139_v62  ;;  %v1426_v6 = vadd.f32 %v1425_v59, %v4612_v20  ;;  %v1055_v18 = vadd.f32 %v5389_v13, %v4816_v52  ;;  %v4992_v11 = vpop.f32.mrf.mxu0  ;;  %v5396_v13 = vld [vmem:[#allocation39_spill] sm:$0xff] }
 0x2e2   : > { %v3419_v58 = vpop.eup %3418  ;;  %3444 = vrcp.f32 %v2406_v21  ;;  %v2011_v7 = vadd.f32 1.0, %v3417_v41  ;;  %v2846_v61 = vmul.f32 -1.442695, %v1562_v8  ;;  %v1557_v22 = vadd.f32 %v4908_v38, %v4825_v1  ;;  %v5392_v38 = vld [vmem:[#allocation32_spill] sm:$0xff]  ;;  %v4997_v62 = vpop.f32.mrf.mxu1  ;;  %v5393_v21 = vld [vmem:[#allocation38_spill] sm:$0xff] }
 0x2e3   : > { %v3421_v53 = vpop.eup %3420  ;;  %2497 = vst [vmem:[%s4965_s20] sm:$0xff] %v3419_v58  ;;  %3446 = vpow2.f32 %v2831_v36  ;;  %v2091_v47 = vmul.f32 %v5390_v31, %v1055_v18  ;;  %v1145_v3 = vadd.f32 %v5391_v12, %v4816_v52  ;;  %v2832_v14 = vmul.f32 -1.442695, %v1426_v6  ;;  %v5007_v58 = vpop.f32.mrf.mxu0 }
 0x2e4   : > { %v3423_v42 = vpop.eup %3422  ;;  %3448 = vrcp.f32 %v2011_v7  ;;  %v2405_v16 = vadd.f32 1.0, %v3421_v53  ;;  %2218 = vxpose.xlu0.b32.cont [10/16] %v2090_v0, 128  ;;  %v1061_v54 = vadd.f32 %v5392_v38, %v4816_v52  ;;  %v1430_v28 = vadd.f32 %v1429_v63, %v4607_v45  ;;  %v5395_v0 = vld [vmem:[#allocation19_spill] sm:$0xff] }
 0x2e5   : > { %v3425_v40 = vpop.eup %3424  ;;  %3450 = vpow2.f32 %v2843_v60  ;;  %v1882_v51 = vmul.f32 %v3423_v42, %v1143_v5  ;;  %v2845_v19 = vmul.f32 -1.442695, %v1557_v22  ;;  %v1572_v15 = vadd.f32 %v4917_v57, %v4825_v1  ;;  %v5394_v60 = vld [vmem:[#allocation33_spill] sm:$0xff]  ;;  %v1435_v42 = vpop.f32.mrf.mxu1 }
 0x2e6   : > { %v3427_v30 = vpop.eup %3426  ;;  %3452 = vrcp.f32 %v2405_v16  ;;  %v1788_v27 = vadd.f32 1.0, %v3425_v40  ;;  %v2092_v59 = vmul.f32 %v5393_v21, %v1061_v54  ;;  %v1067_v8 = vadd.f32 %v5394_v60, %v4816_v52  ;;  %v5016_v31 = vpop.f32.mrf.mxu0 }
 0x2e7   : > { %v3429_v37 = vpop.eup %3428  ;;  %2500 = vst [vmem:[%s4965_s20 + $0x18] sm:$0xff] %v3427_v30  ;;  %3454 = vpow2.f32 %v2800_v17  ;;  %2154 = vxpose.xlu1.b32.cont [10/16] %v1882_v51, 128  ;;  %v1149_v53 = vadd.f32 %v5395_v0, %v4663_v23  ;;  %v2801_v17 = vmul.f32 -1.442695, %v1430_v28  ;;  %v2848_v40 = vmul.f32 -1.442695, %v1572_v15  ;;  %v5397_v51 = vld [vmem:[#allocation34_spill] sm:$0xff] }
 0x2e8   : > { %v3431_v26 = vpop.eup %3430  ;;  %3456 = vrcp.f32 %v1788_v27  ;;  %v2408_v9 = vadd.f32 1.0, %v3429_v37  ;;  %2219 = vxpose.xlu0.b32.cont [11/16] %v2091_v47, 128  ;;  %v2093_v18 = vmul.f32 %v5396_v13, %v1067_v8  ;;  %v1073_v30 = vadd.f32 %v5397_v51, %v4816_v52  ;;  %v5398_v37 = vld [vmem:[#allocation20_spill] sm:$0xff]  ;;  %v5029_v15 = vpop.f32.mrf.mxu0  ;;  %v5405_v51 = vld [vmem:[#allocation23_spill] sm:$0xff] }
 0x2e9   : > { %v3433_v39 = vpop.eup %3432  ;;  %3458 = vpow2.f32 %v2846_v61  ;;  %v4999_v36 = vmul.f32 %v3431_v26, %v1145_v3  ;;  %v1567_v61 = vadd.f32 %v4924_v55, %v4825_v1  ;;  %v1151_v12 = vadd.f32 %v5398_v37, %v4816_v52  ;;  %v5399_v26 = vld [vmem:[#allocation40_spill] sm:$0xff] }
 0x2ea   : > { %v3435_v50 = vpop.eup %3434  ;;  %3460 = vrcp.f32 %v2408_v9  ;;  %v2012_v49 = vadd.f32 1.0, %v3433_v39  ;;  %v1436_v3 = vadd.f32 %v1435_v42, %v4607_v45  ;;  %v2094_v38 = vmul.f32 %v5399_v26, %v1073_v30 }
 0x2eb   : > { %v3437_v41 = vpop.eup %3436  ;;  %2499 = vst [vmem:[%s4965_s20 + $0x10] sm:$0xff] %v3435_v50  ;;  %3462 = vpow2.f32 %v2832_v14  ;;  %v2847_v9 = vmul.f32 -1.442695, %v1567_v61  ;;  %v1582_v28 = vadd.f32 %v4933_v35, %v4825_v1  ;;  %v5400_v50 = vld [vmem:[#allocation35_spill] sm:$0xff]  ;;  %v1592_v13 = vadd.f32 %v4949_v2, %v4825_v1 }
 0x2ec   : > { %v3439_v7 = vpop.eup %3438  ;;  %3464 = vrcp.f32 %v2012_v49  ;;  %v2407_v5 = vadd.f32 1.0, %v3437_v41  ;;  %2220 = vxpose.xlu0.b32.cont [12/16] %v2092_v59, 128  ;;  %v1079_v45 = vadd.f32 %v5400_v50, %v4816_v52  ;;  %v5401_v59 = vld [vmem:[#allocation21_spill] sm:$0xff]  ;;  %v2802_v60 = vmul.f32 -1.442695, %v1436_v3 }
 0x2ed   : > { %v3441_v6 = vpop.eup %3440  ;;  %v1789_v57 = vadd.f32 1.0, %v3439_v7  ;;  %3466 = vpow2.f32 %v2845_v19  ;;  %v1155_v41 = vadd.f32 %v5401_v59, %v4663_v23  ;;  %v5402_v7 = vld [vmem:[#allocation41_spill] sm:$0xff]  ;;  %v1161_v30 = vadd.f32 %v5405_v51, %v4663_v23 }
 0x2ee   : > { %v3443_v16 = vpop.eup %3442  ;;  %3468 = vrcp.f32 %v2407_v5  ;;  %v1883_v22 = vmul.f32 %v3441_v6, %v1149_v53  ;;  %v2095_v0 = vmul.f32 %v5402_v7, %v1079_v45  ;;  %v2850_v5 = vmul.f32 -1.442695, %v1582_v28 }
 0x2ef   : > { %v3445_v63 = vpop.eup %3444  ;;  %3470 = vrcp.f32 %v1789_v57  ;;  %v2410_v27 = vadd.f32 1.0, %v3443_v16  ;;  %v1597_v45 = vadd.f32 %v4982_v4, %v4825_v1 }
 0x2f0   : > { %v3447_v47 = vpop.eup %3446  ;;  %2502 = vst [vmem:[%s4965_s20 + $0x28] sm:$0xff] %v3445_v63  ;;  %3472 = vpow2.f32 %v2801_v17  ;;  %2155 = vxpose.xlu1.b32.cont [11/16] %v1883_v22, 128  ;;  %2221 = vxpose.xlu0.b32.cont [13/16] %v2093_v18, 128  ;;  %v1577_v17 = vadd.f32 %v4940_v25, %v4825_v1  ;;  %v5039_v18 = vpop.f32.mrf.mxu0  ;;  %v5404_v22 = vld [vmem:[#allocation36_spill] sm:$0xff] }
 0x2f1   : > { %v3449_v55 = vpop.eup %3448  ;;  %3474 = vrcp.f32 %v2410_v27  ;;  %v2013_v14 = vadd.f32 1.0, %v3447_v47  ;;  %v1085_v63 = vadd.f32 %v5404_v22, %v4816_v52  ;;  %v1587_v27 = vadd.f32 %v4954_v33, %v4825_v1 }
 0x2f2   : > { %v3451_v54 = vpop.eup %3450  ;;  %3476 = vpow2.f32 %v2848_v40  ;;  %v5025_v39 = vmul.f32 %v3449_v55, %v1151_v12  ;;  %v5403_v40 = vld [vmem:[#allocation22_spill] sm:$0xff]  ;;  %v2849_v37 = vmul.f32 -1.442695, %v1577_v17  ;;  %v1607_v17 = vadd.f32 %v5007_v58, %v4825_v1 }
 0x2f3   : > { %v3453_v19 = vpop.eup %3452  ;;  %3478 = vrcp.f32 %v2013_v14  ;;  %v2409_v49 = vadd.f32 1.0, %v3451_v54  ;;  %v1157_v61 = vadd.f32 %v5403_v40, %v4816_v52  ;;  %v5406_v12 = vld [vmem:[#allocation42_spill] sm:$0xff]  ;;  %v1602_v54 = vadd.f32 %v4969_v46, %v4825_v1 }
 0x2f4   : > { %v3455_v21 = vpop.eup %3454  ;;  %2501 = vst [vmem:[%s4965_s20 + $0x20] sm:$0xff] %v3453_v19  ;;  %2222 = vxpose.xlu0.b32.cont [14/16] %v2094_v38, 128  ;;  %v2096_v3 = vmul.f32 %v5406_v12, %v1085_v63  ;;  %v2852_v38 = vmul.f32 -1.442695, %v1592_v13  ;;  %v2851_v50 = vmul.f32 -1.442695, %v1587_v27  ;;  %v1622_v40 = vadd.f32 %v5016_v31, %v4825_v1  ;;  %v5409_v31 = vld [vmem:[#allocation26_spill] sm:$0xff] }
 0x2f5   : > { %v3457_v8 = vpop.eup %3456  ;;  %3480 = vrcp.f32 %v2409_v49  ;;  %v1790_v35 = vadd.f32 1.0, %v3455_v21  ;;  %v2855_v51 = vmul.f32 -1.442695, %v1607_v17  ;;  %v1169_v12 = vadd.f32 %v5409_v31, %v4816_v52 }
 0x2f6   : > { %v3459_v53 = vpop.eup %3458  ;;  %3482 = vpow2.f32 %v2847_v9  ;;  %v1884_v6 = vmul.f32 %v3457_v8, %v1155_v41  ;;  %v5055_v9 = vpop.f32.mrf.mxu0  ;;  %v5407_v41 = vld [vmem:[#allocation24_spill] sm:$0xff]  ;;  %v2854_v8 = vmul.f32 -1.442695, %v1602_v54 }
 0x2f7   : > { %v3461_v57 = vpop.eup %3460  ;;  %3484 = vrcp.f32 %v1790_v35  ;;  %v2412_v42 = vadd.f32 1.0, %v3459_v53  ;;  %v1612_v35 = vadd.f32 %v4992_v11, %v4825_v1  ;;  %v5408_v11 = vld [vmem:[#allocation25_spill] sm:$0xff] }
 0x2f8   : > { %v3463_v16 = vpop.eup %3462  ;;  %2504 = vst [vmem:[%s4965_s20 + $0x38] sm:$0xff] %v3461_v57  ;;  %3486 = vpow2.f32 %v2802_v60  ;;  %2156 = vxpose.xlu1.b32.cont [12/16] %v1884_v6, 128  ;;  %2223 = vxpose.xlu0.b32.cont [15/16] %v2095_v0, 128  ;;  %v1163_v60 = vadd.f32 %v5407_v41, %v4816_v52  ;;  %v3003_v4 = vpop.f32.mrf.mxu0  ;;  %v1167_v13 = vadd.f32 %v5408_v11, %v4663_v23 }
 0x2f9   : > { %v3465_v25 = vpop.eup %3464  ;;  %3488 = vrcp.f32 %v2412_v42  ;;  %v2014_v2 = vadd.f32 1.0, %v3463_v16  ;;  %v2856_v16 = vmul.f32 -1.442695, %v1612_v35 }
 0x2fa   : > { %v3467_v47 = vpop.eup %3466  ;;  %3490 = vpow2.f32 %v2850_v5  ;;  %v5051_v55 = vmul.f32 %v3465_v25, %v1157_v61  ;;  %v2853_v5 = vmul.f32 -1.442695, %v1597_v45  ;;  %v1636_v61 = vpop.f32.mrf.mxu0 }
 0x2fb   : > { %v3469_v14 = vpop.eup %3468  ;;  %3492 = vrcp.f32 %v2014_v2  ;;  %v2411_v26 = vadd.f32 1.0, %v3467_v47 }
 0x2fc   : > { %v3471_v28 = vpop.eup %3470  ;;  %2503 = vst [vmem:[%s4965_s20 + $0x30] sm:$0xff] %v3469_v14  ;;  %2224 = vxpose.xlu0.b32.end [16/16] %v2096_v3, 128  ;;  %v2129_v33 = vpop.trf.xlu0  ;;  %v2858_v3 = vmul.f32 -1.442695, %v1622_v40 }
 0x2fd   : > { %v3473_v19 = vpop.eup %3472  ;;  %3494 = vrcp.f32 %v2411_v26  ;;  %v1885_v49 = vmul.f32 %v3471_v28, %v1161_v30  ;;  %2177 = vst [vmem:[%s5061_s12] sm:$0xff] %v2129_v33  ;;  %v1617_v30 = vadd.f32 %v5029_v15, %v4825_v1  ;;  %v3006_v14 = vpop.f32.mrf.mxu0  ;;  %v1632_v15 = vadd.f32 %v5039_v18, %v4825_v1 }
 0x2fe   : > { %v3475_v21 = vpop.eup %3474  ;;  %v1791_v46 = vadd.f32 1.0, %v3473_v19  ;;  %3496 = vpow2.f32 %v2849_v37 }
 0x2ff   : > { %v3477_v59 = vpop.eup %3476  ;;  %2506 = vst [vmem:[%s4965_s20 + $0x48] sm:$0xff] %v3475_v21  ;;  %3498 = vpow2.f32 %v2852_v38  ;;  %2157 = vxpose.xlu1.b32.cont [13/16] %v1885_v49, 128  ;;  %v2857_v28 = vmul.f32 -1.442695, %v1617_v30  ;;  %v1646_v49 = vpop.f32.mrf.mxu0  ;;  %v2860_v41 = vmul.f32 -1.442695, %v1632_v15 }
 0x300   : > { %v3479_v7 = vpop.eup %3478  ;;  %3500 = vrcp.f32 %v1791_v46  ;;  %v2414_v0 = vadd.f32 1.0, %v3477_v59  ;;  %v2130_v53 = vpop.trf.xlu0  ;;  %v5410_v46 = vld [vmem:[#allocation27_spill] sm:$0xff] }
 0x301   : > { %3502 = vpow2.f32 %v2851_v50  ;;  %v5071_v6 = vmul.f32 %v3479_v7, %v1163_v60  ;;  %2179 = vst [vmem:[%s5061_s12 + $0x10] sm:$0xff] %v2130_v53  ;;  %v1627_v50 = vadd.f32 %v5055_v9, %v4825_v1  ;;  %v1173_v18 = vadd.f32 %v5410_v46, %v4663_v23 }
 0x302   : > { %v3481_v57 = vpop.eup %3480  ;;  %3504 = vrcp.f32 %v2414_v0  ;;  %v1642_v60 = vadd.f32 %v3003_v4, %v4825_v1  ;;  %v1637_v53 = vadd.f32 %v1636_v61, %v4825_v1 }
 0x303   : > { %v3483_v42 = vpop.eup %3482  ;;  %2505 = vst [vmem:[%s4965_s20 + $0x40] sm:$0xff] %v3481_v57  ;;  %3506 = vpow2.f32 %v2854_v8  ;;  %v2859_v9 = vmul.f32 -1.442695, %v1627_v50 }
 0x304   : > { %v3485_v22 = vpop.eup %3484  ;;  %v2413_v58 = vadd.f32 1.0, %v3483_v42  ;;  %v2131_v63 = vpop.trf.xlu0  ;;  %3508 = vpow2.f32 %v2853_v5  ;;  %v2862_v4 = vmul.f32 -1.442695, %v1642_v60  ;;  %v2861_v61 = vmul.f32 -1.442695, %v1637_v53 }
 0x305   : > { %v3487_v25 = vpop.eup %3486  ;;  %v1886_v2 = vmul.f32 %v3485_v22, %v1167_v13  ;;  %2181 = vst [vmem:[%s5061_s12 + $0x20] sm:$0xff] %v2131_v63  ;;  %v3009_v42 = vpop.f32.mrf.mxu0  ;;  %v1652_v13 = vadd.f32 %v3006_v14, %v4825_v1 }
 0x306   : > { %v3489_v27 = vpop.eup %3488  ;;  %3510 = vrcp.f32 %v2413_v58  ;;  %v1792_v47 = vadd.f32 1.0, %v3487_v25  ;;  %v1647_v58 = vadd.f32 %v1646_v49, %v4825_v1 }
 0x307   : > { %v3491_v37 = vpop.eup %3490  ;;  %2508 = vst [vmem:[%s4965_s20 + $0x58] sm:$0xff] %v3489_v27  ;;  %3512 = vpow2.f32 %v2856_v16  ;;  %2158 = vxpose.xlu1.b32.cont [14/16] %v1886_v2, 128  ;;  %v5411_v2 = vld [vmem:[#allocation29_spill] sm:$0xff] }
 0x308   : > { %v3493_v26 = vpop.eup %3492  ;;  %3514 = vrcp.f32 %v1792_v47  ;;  %v2416_v38 = vadd.f32 1.0, %v3491_v37  ;;  %v2132_v54 = vpop.trf.xlu0  ;;  %v1179_v27 = vadd.f32 %v5411_v2, %v4663_v23  ;;  %v2864_v47 = vmul.f32 -1.442695, %v1652_v13 }
 0x309   : > { %3516 = vpow2.f32 %v2855_v51  ;;  %v5087_v33 = vmul.f32 %v3493_v26, %v1169_v12  ;;  %2183 = vst [vmem:[%s5061_s12 + $0x30] sm:$0xff] %v2132_v54  ;;  %v1656_v51 = vpop.f32.mrf.mxu0  ;;  %v1662_v37 = vadd.f32 %v3009_v42, %v4825_v1  ;;  %v2863_v26 = vmul.f32 -1.442695, %v1647_v58 }
 0x30a   : > { %v3495_v19 = vpop.eup %3494  ;;  %3518 = vrcp.f32 %v2416_v38  ;;  %v1657_v38 = vadd.f32 %v1656_v51, %v4825_v1 }
 0x30b   : > { %v3497_v45 = vpop.eup %3496  ;;  %2507 = vst [vmem:[%s4965_s20 + $0x50] sm:$0xff] %v3495_v19  ;;  %3520 = vpow2.f32 %v2858_v3  ;;  %v2866_v19 = vmul.f32 -1.442695, %v1662_v37 }
 0x30c   : > { %v3499_v21 = vpop.eup %3498  ;;  %v2415_v59 = vadd.f32 1.0, %v3497_v45  ;;  %v2133_v8 = vpop.trf.xlu0  ;;  %3522 = vpow2.f32 %v2857_v28 }
 0x30d   : > { %v3501_v35 = vpop.eup %3500  ;;  %v2418_v7 = vadd.f32 1.0, %v3499_v21  ;;  %2185 = vst [vmem:[%s5061_s12 + $0x40] sm:$0xff] %v2133_v8  ;;  %v2865_v21 = vmul.f32 -1.442695, %v1657_v38 }
 0x30e   : > { %v3503_v0 = vpop.eup %3502  ;;  %3524 = vrcp.f32 %v2415_v59  ;;  %v1887_v5 = vmul.f32 %v3501_v35, %v1173_v18 }
 0x30f   : > { %v3505_v17 = vpop.eup %3504  ;;  %3526 = vrcp.f32 %v2418_v7  ;;  %v2417_v57 = vadd.f32 1.0, %v3503_v0 }
 0x310   : > { %v3507_v11 = vpop.eup %3506  ;;  %2510 = vst [vmem:[%s4965_s20 + $0x68] sm:$0xff] %v3505_v17  ;;  %3528 = vpow2.f32 %v2860_v41  ;;  %2159 = vxpose.xlu1.b32.cont [15/16] %v1887_v5, 128  ;;  %v2134_v16 = vpop.trf.xlu0 }
 0x311   : > { %3530 = vrcp.f32 %v2417_v57  ;;  %v2420_v40 = vadd.f32 1.0, %v3507_v11  ;;  %2187 = vst [vmem:[%s5061_s12 + $0x50] sm:$0xff] %v2134_v16  ;;  %v3509_v22 = vpop.eup %3508 }
 0x312   : > { %3532 = vpow2.f32 %v2859_v9  ;;  %v2419_v25 = vadd.f32 1.0, %v3509_v22  ;;  %v1437_v22 = vpop.f32.mrf.mxu1 }
 0x313   : > { %v3511_v63 = vpop.eup %3510  ;;  %3534 = vrcp.f32 %v2420_v40  ;;  %v1438_v51 = vadd.f32 %v1437_v22, %v4612_v20 }
 0x314   : > { %v3513_v30 = vpop.eup %3512  ;;  %2509 = vst [vmem:[%s4965_s20 + $0x60] sm:$0xff] %v3511_v63  ;;  %3536 = vpow2.f32 %v2862_v4  ;;  %v2135_v31 = vpop.trf.xlu0 }
 0x315   : > { %v3515_v12 = vpop.eup %3514  ;;  %3538 = vrcp.f32 %v2419_v25  ;;  %v2422_v3 = vadd.f32 1.0, %v3513_v30  ;;  %2189 = vst [vmem:[%s5061_s12 + $0x60] sm:$0xff] %v2135_v31  ;;  %v2834_v37 = vmul.f32 -1.442695, %v1438_v51 }
 0x316   : > { %v3517_v14 = vpop.eup %3516  ;;  %3540 = vpow2.f32 %v2861_v61  ;;  %v1888_v15 = vmul.f32 %v3515_v12, %v1179_v27 }
 0x317   : > { %v3519_v54 = vpop.eup %3518  ;;  %3542 = vrcp.f32 %v2422_v3  ;;  %v2421_v23 = vadd.f32 1.0, %v3517_v14 }
 0x318   : > { %v3521_v28 = vpop.eup %3520  ;;  %2512 = vst [vmem:[%s4965_s20 + $0x78] sm:$0xff] %v3519_v54  ;;  %3544 = vpow2.f32 %v2864_v47  ;;  %2160 = vxpose.xlu1.b32.end [16/16] %v1888_v15, 128  ;;  %v2136_v50 = vpop.trf.xlu0 }
 0x319   : > { %3546 = vrcp.f32 %v2421_v23  ;;  %v2424_v45 = vadd.f32 1.0, %v3521_v28  ;;  %2191 = vst [vmem:[%s5061_s12 + $0x70] sm:$0xff] %v2136_v50  ;;  %v3523_v49 = vpop.eup %3522 }
 0x31a   : > { %3548 = vpow2.f32 %v2863_v26  ;;  %v2423_v46 = vadd.f32 1.0, %v3523_v49  ;;  %v5412_v49 = vld [vmem:[#allocation28_spill] sm:$0xff] }
 0x31b   : > { %v3525_v1 = vpop.eup %3524  ;;  %3550 = vrcp.f32 %v2424_v45 }
 0x31c   : > { %v3527_v18 = vpop.eup %3526  ;;  %2511 = vst [vmem:[%s4965_s20 + $0x70] sm:$0xff] %v3525_v1  ;;  %3552 = vpow2.f32 %v2866_v19  ;;  %2241 = vxpose.xlu1.b32.start [1/16] %v4854_v29, 128  ;;  %v2137_v59 = vpop.trf.xlu0 }
 0x31d   : > { %v3529_v41 = vpop.eup %3528  ;;  %2514 = vst [vmem:[%s4965_s20 + $0x88] sm:$0xff] %v3527_v18  ;;  %3554 = vrcp.f32 %v2423_v46  ;;  %2193 = vst [vmem:[%s5061_s12 + $0x80] sm:$0xff] %v2137_v59  ;;  %v5413_v46 = vld [vmem:[#allocation30_spill] sm:$0xff] }
 0x31e   : > { %v3531_v60 = vpop.eup %3530  ;;  %v2426_v8 = vadd.f32 1.0, %v3529_v41  ;;  %3556 = vpow2.f32 %v2865_v21  ;;  %v1175_v21 = vadd.f32 %v5412_v49, %v4816_v52  ;;  %v1181_v18 = vadd.f32 %v5413_v46, %v4816_v52 }
 0x31f   : > { %v3533_v35 = vpop.eup %3532  ;;  %2513 = vst [vmem:[%s4965_s20 + $0x80] sm:$0xff] %v3531_v60 }
 0x320   : > { %v3535_v7 = vpop.eup %3534  ;;  %3558 = vrcp.f32 %v2426_v8  ;;  %v2425_v0 = vadd.f32 1.0, %v3533_v35  ;;  %2242 = vxpose.xlu1.b32.cont [2/16] %v4865_v10, 128  ;;  %v2138_v9 = vpop.trf.xlu0  ;;  %v1432_v10 = vadd.f32 %v4997_v62, %v4612_v20 }
 0x321   : > { %v3537_v29 = vpop.eup %3536  ;;  %2516 = vst [vmem:[%s4965_s20 + $0x98] sm:$0xff] %v3535_v7  ;;  %2195 = vst [vmem:[%s5061_s12 + $0x90] sm:$0xff] %v2138_v9 }
 0x322   : > { %v3539_v53 = vpop.eup %3538  ;;  %3560 = vrcp.f32 %v2425_v0  ;;  %v2428_v5 = vadd.f32 1.0, %v3537_v29  ;;  %v2833_v62 = vmul.f32 -1.442695, %v1432_v10 }
 0x323   : > { %v3541_v17 = vpop.eup %3540  ;;  %2515 = vst [vmem:[%s4965_s20 + $0x90] sm:$0xff] %v3539_v53 }
 0x324   : > { %v3543_v57 = vpop.eup %3542  ;;  %3562 = vrcp.f32 %v2428_v5  ;;  %v2427_v42 = vadd.f32 1.0, %v3541_v17  ;;  %2243 = vxpose.xlu1.b32.cont [3/16] %v4880_v32, 128  ;;  %v2139_v11 = vpop.trf.xlu0 }
 0x325   : > { %v3545_v4 = vpop.eup %3544  ;;  %2518 = vst [vmem:[%s4965_s20 + $0xa8] sm:$0xff] %v3543_v57  ;;  %2197 = vst [vmem:[%s5061_s12 + $0xa0] sm:$0xff] %v2139_v11 }
 0x326   : > { %v3547_v13 = vpop.eup %3546  ;;  %3564 = vrcp.f32 %v2427_v42  ;;  %v2430_v16 = vadd.f32 1.0, %v3545_v4 }
 0x327   : > { %v3549_v40 = vpop.eup %3548  ;;  %2517 = vst [vmem:[%s4965_s20 + $0xa0] sm:$0xff] %v3547_v13 }
 0x328   : > { %v3551_v61 = vpop.eup %3550  ;;  %3566 = vrcp.f32 %v2430_v16  ;;  %v2429_v58 = vadd.f32 1.0, %v3549_v40  ;;  %2244 = vxpose.xlu1.b32.cont [4/16] %v4895_v44, 128  ;;  %v2140_v32 = vpop.trf.xlu0 }
 0x329   : > { %v3553_v63 = vpop.eup %3552  ;;  %2520 = vst [vmem:[%s4965_s20 + $0xb8] sm:$0xff] %v3551_v61  ;;  %2199 = vst [vmem:[%s5061_s12 + $0xb0] sm:$0xff] %v2140_v32 }
 0x32a   : > { %v3555_v25 = vpop.eup %3554  ;;  %3568 = vrcp.f32 %v2429_v58  ;;  %v2432_v30 = vadd.f32 1.0, %v3553_v63 }
 0x32b   : > { %v3557_v2 = vpop.eup %3556  ;;  %2519 = vst [vmem:[%s4965_s20 + $0xb0] sm:$0xff] %v3555_v25 }
 0x32c   : > { %3570 = vrcp.f32 %v2432_v30  ;;  %v2431_v27 = vadd.f32 1.0, %v3557_v2  ;;  %2245 = vxpose.xlu1.b32.cont [5/16] %v4910_v48, 128  ;;  %v2141_v44 = vpop.trf.xlu0 }
 0x32d   : > { %v3559_v47 = vpop.eup %3558  ;;  %3572 = vpow2.f32 %v2833_v62  ;;  %2201 = vst [vmem:[%s5061_s12 + $0xc0] sm:$0xff] %v2141_v44 }
 0x32e   : > { %2522 = vst [vmem:[%s4965_s20 + $0xc8] sm:$0xff] %v3559_v47  ;;  %3574 = vrcp.f32 %v2431_v27 }
 0x32f   : > { %v3561_v20 = vpop.eup %3560  ;;  %3576 = vpow2.f32 %v2834_v37 }
 0x330   : > { %2521 = vst [vmem:[%s4965_s20 + $0xc0] sm:$0xff] %v3561_v20  ;;  %2246 = vxpose.xlu1.b32.cont [6/16] %v4926_v56, 128  ;;  %v2142_v31 = vpop.trf.xlu0 }
 0x331   : > { %v3563_v12 = vpop.eup %3562  ;;  %2203 = vst [vmem:[%s5061_s12 + $0xd0] sm:$0xff] %v2142_v31 }
 0x332   : > { %2524 = vst [vmem:[%s4965_s20 + $0xd8] sm:$0xff] %v3563_v12 }
 0x333   : > { %v3565_v48 = vpop.eup %3564 }
 0x334   : > { %2523 = vst [vmem:[%s4965_s20 + $0xd0] sm:$0xff] %v3565_v48  ;;  %2247 = vxpose.xlu1.b32.cont [7/16] %v4942_v43, 128  ;;  %v2143_v3 = vpop.trf.xlu0 }
 0x335   : > { %v3567_v14 = vpop.eup %3566  ;;  %2205 = vst [vmem:[%s5061_s12 + $0xe0] sm:$0xff] %v2143_v3 }
 0x336   : > { %2526 = vst [vmem:[%s4965_s20 + $0xe8] sm:$0xff] %v3567_v14 }
 0x337   : > { %v3569_v26 = vpop.eup %3568 }
 0x338   : > { %2525 = vst [vmem:[%s4965_s20 + $0xe0] sm:$0xff] %v3569_v26  ;;  %2248 = vxpose.xlu1.b32.cont [8/16] %v4956_v34, 128  ;;  %v2144_v56 = vpop.trf.xlu0 }
 0x339   : > { %v3571_v38 = vpop.eup %3570  ;;  %2207 = vst [vmem:[%s5061_s12 + $0xf0] sm:$0xff] %v2144_v56 }
 0x33a   : > { %v3573_v15 = vpop.eup %3572  ;;  %2528 = vst [vmem:[%s4965_s20 + $0xf8] sm:$0xff] %v3571_v38 }
 0x33b   : > { %v3575_v54 = vpop.eup %3574  ;;  %v2015_v43 = vadd.f32 1.0, %v3573_v15 }
 0x33c   : > { %2527 = vst [vmem:[%s4965_s20 + $0xf0] sm:$0xff] %v3575_v54  ;;  %2249 = vxpose.xlu1.b32.cont [9/16] %v4975_v24, 128  ;;  %v2225_v23 = vpop.trf.xlu0  ;;  %v3577_v34 = vpop.eup %3576 }
 0x33d   : > { %2273 = vst [vmem:[%s5148_s21] sm:$0xff] %v2225_v23  ;;  %3578 = vrcp.f32 %v2015_v43  ;;  %v2016_v19 = vadd.f32 1.0, %v3577_v34 }
 0x33f   : > { %3580 = vrcp.f32 %v2016_v19 }
 0x340   : > { %2250 = vxpose.xlu1.b32.cont [10/16] %v4999_v36, 128  ;;  %v2226_v28 = vpop.trf.xlu0 }
 0x341   : > { %2275 = vst [vmem:[%s5148_s21 + $0x10] sm:$0xff] %v2226_v28 }
 0x344   : > { %2251 = vxpose.xlu1.b32.cont [11/16] %v5025_v39, 128  ;;  %v2227_v24 = vpop.trf.xlu0 }
 0x345   : > { %2277 = vst [vmem:[%s5148_s21 + $0x20] sm:$0xff] %v2227_v24 }
 0x348   : > { %2252 = vxpose.xlu1.b32.cont [12/16] %v5051_v55, 128  ;;  %v2228_v50 = vpop.trf.xlu0 }
 0x349   : > { %2279 = vst [vmem:[%s5148_s21 + $0x30] sm:$0xff] %v2228_v50 }
 0x34a   : > { %v3579_v36 = vpop.eup %3578 }
 0x34b   : > { %v2111_v55 = vmul.f32 %v3579_v36, %v1175_v21 }
 0x34c   : > { %2253 = vxpose.xlu1.b32.cont [13/16] %v5071_v6, 128  ;;  %v2229_v45 = vpop.trf.xlu0  ;;  %v3581_v1 = vpop.eup %3580 }
 0x34d   : > { %2281 = vst [vmem:[%s5148_s21 + $0x40] sm:$0xff] %v2229_v45  ;;  %v2112_v59 = vmul.f32 %v3581_v1, %v1181_v18 }
 0x350   : > { %2254 = vxpose.xlu1.b32.cont [14/16] %v5087_v33, 128  ;;  %v2230_v39 = vpop.trf.xlu0 }
 0x351   : > { %2283 = vst [vmem:[%s5148_s21 + $0x50] sm:$0xff] %v2230_v39 }
 0x354   : > { %2255 = vxpose.xlu1.b32.cont [15/16] %v2111_v55, 128  ;;  %v2231_v6 = vpop.trf.xlu0 }
 0x355   : > { %2285 = vst [vmem:[%s5148_s21 + $0x60] sm:$0xff] %v2231_v6 }
 0x358   : > { %2256 = vxpose.xlu1.b32.end [16/16] %v2112_v59, 128  ;;  %v2161_v41 = vpop.trf.xlu1  ;;  %v2232_v33 = vpop.trf.xlu0 }
 0x359   : > { %2178 = vst [vmem:[%s5061_s12 + $0x8] sm:$0xff] %v2161_v41  ;;  %2287 = vst [vmem:[%s5148_s21 + $0x70] sm:$0xff] %v2232_v33 }
 0x35c   : > { %v2162_v60 = vpop.trf.xlu1  ;;  %v2233_v8 = vpop.trf.xlu0 }
 0x35d   : > { %2180 = vst [vmem:[%s5061_s12 + $0x18] sm:$0xff] %v2162_v60  ;;  %2289 = vst [vmem:[%s5148_s21 + $0x80] sm:$0xff] %v2233_v8 }
 0x360   : > { %v2163_v52 = vpop.trf.xlu1  ;;  %v2234_v35 = vpop.trf.xlu0 }
 0x361   : > { %2182 = vst [vmem:[%s5061_s12 + $0x28] sm:$0xff] %v2163_v52  ;;  %2291 = vst [vmem:[%s5148_s21 + $0x90] sm:$0xff] %v2234_v35 }
 0x364   : > { %v2164_v7 = vpop.trf.xlu1  ;;  %v2235_v0 = vpop.trf.xlu0 }
 0x365   : > { %2184 = vst [vmem:[%s5061_s12 + $0x38] sm:$0xff] %v2164_v7  ;;  %2293 = vst [vmem:[%s5148_s21 + $0xa0] sm:$0xff] %v2235_v0 }
 0x368   : > { %v2165_v9 = vpop.trf.xlu1  ;;  %v2236_v29 = vpop.trf.xlu0 }
 0x369   : > { %2186 = vst [vmem:[%s5061_s12 + $0x48] sm:$0xff] %v2165_v9  ;;  %2295 = vst [vmem:[%s5148_s21 + $0xb0] sm:$0xff] %v2236_v29 }
 0x36c   : > { %v2166_v53 = vpop.trf.xlu1  ;;  %v2237_v5 = vpop.trf.xlu0 }
 0x36d   : > { %2188 = vst [vmem:[%s5061_s12 + $0x58] sm:$0xff] %v2166_v53  ;;  %2297 = vst [vmem:[%s5148_s21 + $0xc0] sm:$0xff] %v2237_v5 }
 0x370   : > { %v2167_v17 = vpop.trf.xlu1  ;;  %v2238_v57 = vpop.trf.xlu0 }
 0x371   : > { %2190 = vst [vmem:[%s5061_s12 + $0x68] sm:$0xff] %v2167_v17  ;;  %2299 = vst [vmem:[%s5148_s21 + $0xd0] sm:$0xff] %v2238_v57 }
 0x374   : > { %v2168_v42 = vpop.trf.xlu1  ;;  %v2239_v11 = vpop.trf.xlu0 }
 0x375   : > { %2192 = vst [vmem:[%s5061_s12 + $0x78] sm:$0xff] %v2168_v42  ;;  %2301 = vst [vmem:[%s5148_s21 + $0xe0] sm:$0xff] %v2239_v11 }
 0x378   : > { %v2169_v4 = vpop.trf.xlu1  ;;  %v2240_v10 = vpop.trf.xlu0 }
 0x379   : > { %2194 = vst [vmem:[%s5061_s12 + $0x88] sm:$0xff] %v2169_v4  ;;  %2303 = vst [vmem:[%s5148_s21 + $0xf0] sm:$0xff] %v2240_v10 }
 0x37c   : > { %v2170_v13 = vpop.trf.xlu1 }
 0x37d   : > { %2196 = vst [vmem:[%s5061_s12 + $0x98] sm:$0xff] %v2170_v13 }
 0x380   : > { %v2171_v16 = vpop.trf.xlu1 }
 0x381   : > { %2198 = vst [vmem:[%s5061_s12 + $0xa8] sm:$0xff] %v2171_v16 }
 0x384   : > { %v2172_v40 = vpop.trf.xlu1 }
 0x385   : > { %2200 = vst [vmem:[%s5061_s12 + $0xb8] sm:$0xff] %v2172_v40 }
 0x388   : > { %v2173_v22 = vpop.trf.xlu1 }
 0x389   : > { %2202 = vst [vmem:[%s5061_s12 + $0xc8] sm:$0xff] %v2173_v22 }
 0x38c   : > { %v2174_v61 = vpop.trf.xlu1 }
 0x38d   : > { %2204 = vst [vmem:[%s5061_s12 + $0xd8] sm:$0xff] %v2174_v61 }
 0x390   : > { %v2175_v58 = vpop.trf.xlu1 }
 0x391   : > { %2206 = vst [vmem:[%s5061_s12 + $0xe8] sm:$0xff] %v2175_v58 }
 0x394   : > { %v2176_v32 = vpop.trf.xlu1 }
 0x395   : > { %2208 = vst [vmem:[%s5061_s12 + $0xf8] sm:$0xff] %v2176_v32 }
 0x396   : > { %3649 = shalt.err (!%p3646_p2)
}
 0x397   : > { %s3650_s11 = scalar_lea.hbm %s5198_s28, 4096  ;;  %s3654_s12 = scalar_lea.hbm %s5341_s5, 8192 }
 0x398   : > { %p3651_p6 = scmp.ne.s32.totalorder %s5198_s28, %s3650_s11  ;;  %p3655_p11 = scmp.lt.s32.totalorder %s5198_s28, %s5341_s5 }
 0x399   : > { %p3656_p1 = scmp.lt.s32.totalorder %s3654_s12, %s3650_s11 }
 0x39a   : > { %p3652_p9 = pnand %p3651_p6, %p3917_p0 }
 0x39b   : > { %p3657_p8 = por %p3656_p1, %p3655_p11 }
 0x39c   : > { %p3653_p13 = pneg %p3652_p9 }
 0x39e   : > { %p3658_p4 = pnand %p3657_p8, %p3653_p13 }
 0x3a0   : > { %3661 = shalt.err (!%p3658_p4)
}
 0x3a1   : > { %s3786_s3 = smov 256   ;;  %s3787_s27 = smov 16   ;;  %v2257_v63 = vpop.trf.xlu1 }
 0x3a2   : > { %3048 = dma.vmem_to_hbm [thread:$0]  (%p3917_p0), %s5200_s8, 4096, %s5198_s28, %s2530_s18, %s3786_s3, %s3786_s3, %s3787_s27  }
 0x3a3   : > { %2274 = vst [vmem:[%s5148_s21 + $0x8] sm:$0xff] %v2257_v63  ;;  %s2534_s13 = sand.u32 1, %s3863_s30   ;;  %s2573_s8 = sshll.u32 %s5148_s21, 4  ;;  %s5259_s8 = int_to_ptr.vmem [resolvable:$true] %s2573_s8 }
 0x3a4   : > { %s2591_s28 = sshll.u32 %s4965_s20, 4  ;;  %s5251_s10 = scalar_lea.hbm %s5342_s6, %s5190_s17  ;;  %s5261_s28 = int_to_ptr.vmem [resolvable:$true] %s2591_s28 }
 0x3a5   : > { %v2258_v62 = vpop.trf.xlu1  ;;  %s5257_s19 = scalar_lea.hbm %s5343_s7, %s5190_s17  ;;  %s5264_s30 = scalar_lea.sflag [#allocation9], %s2534_s13 }
 0x3a6   : > { %2276 = vst [vmem:[%s5148_s21 + $0x18] sm:$0xff] %v2258_v62  ;;  %s3662_s20 = scalar_lea.vmem %s5259_s8, 4096  ;;  %s3788_s12 = smov [#allocation8]  }
 0x3a7   : > { %p3663_p10 = scmp.ne.s32.totalorder %s5259_s8, %s3662_s20  ;;  %s3666_s22 = sshll.u32 %s3788_s12, 4  ;;  %s3667_s22 = int_to_ptr.vmem [resolvable:$false] %s3666_s22 }
 0x3a8   : > { %s3668_s17 = scalar_lea.vmem %s3667_s22, 8192  ;;  %p3669_p5 = scmp.lt.s32.totalorder %s5259_s8, %s3667_s22 }
 0x3a9   : > { %v2259_v25 = vpop.trf.xlu1  ;;  %p3664_p12 = pnand %p3663_p10, %p3917_p0  ;;  %p3670_p7 = scmp.lt.s32.totalorder %s3668_s17, %s3662_s20 }
 0x3aa   : > { %2278 = vst [vmem:[%s5148_s21 + $0x28] sm:$0xff] %v2259_v25 }
 0x3ab   : > { %p3665_p3 = pneg %p3664_p12  ;;  %p3671_p2 = por %p3670_p7, %p3669_p5 }
 0x3ad   : > { %v2260_v51 = vpop.trf.xlu1  ;;  %p3672_p6 = pnand %p3671_p2, %p3665_p3 }
 0x3ae   : > { %2280 = vst [vmem:[%s5148_s21 + $0x38] sm:$0xff] %v2260_v51 }
 0x3b1   : > { %v2261_v30 = vpop.trf.xlu1 }
 0x3b2   : > { %2282 = vst [vmem:[%s5148_s21 + $0x48] sm:$0xff] %v2261_v30 }
 0x3b5   : > { %v2262_v2 = vpop.trf.xlu1 }
 0x3b6   : > { %2284 = vst [vmem:[%s5148_s21 + $0x58] sm:$0xff] %v2262_v2 }
 0x3b9   : > { %v2263_v27 = vpop.trf.xlu1 }
 0x3ba   : > { %2286 = vst [vmem:[%s5148_s21 + $0x68] sm:$0xff] %v2263_v27 }
 0x3bd   : > { %v2264_v44 = vpop.trf.xlu1 }
 0x3be   : > { %2288 = vst [vmem:[%s5148_s21 + $0x78] sm:$0xff] %v2264_v44 }
 0x3c1   : > { %v2265_v47 = vpop.trf.xlu1 }
 0x3c2   : > { %2290 = vst [vmem:[%s5148_s21 + $0x88] sm:$0xff] %v2265_v47 }
 0x3c5   : > { %v2266_v37 = vpop.trf.xlu1 }
 0x3c6   : > { %2292 = vst [vmem:[%s5148_s21 + $0x98] sm:$0xff] %v2266_v37 }
 0x3c9   : > { %v2267_v20 = vpop.trf.xlu1 }
 0x3ca   : > { %2294 = vst [vmem:[%s5148_s21 + $0xa8] sm:$0xff] %v2267_v20 }
 0x3cd   : > { %v2268_v31 = vpop.trf.xlu1 }
 0x3ce   : > { %2296 = vst [vmem:[%s5148_s21 + $0xb8] sm:$0xff] %v2268_v31 }
 0x3d1   : > { %v2269_v12 = vpop.trf.xlu1 }
 0x3d2   : > { %2298 = vst [vmem:[%s5148_s21 + $0xc8] sm:$0xff] %v2269_v12 }
 0x3d5   : > { %v2270_v48 = vpop.trf.xlu1 }
 0x3d6   : > { %2300 = vst [vmem:[%s5148_s21 + $0xd8] sm:$0xff] %v2270_v48 }
 0x3d9   : > { %v2271_v3 = vpop.trf.xlu1 }
 0x3da   : > { %2302 = vst [vmem:[%s5148_s21 + $0xe8] sm:$0xff] %v2271_v3 }
 0x3dd   : > { %v2272_v14 = vpop.trf.xlu1 }
 0x3de   : > { %2304 = vst [vmem:[%s5148_s21 + $0xf8] sm:$0xff] %v2272_v14 }
 0x3df   : > { %3675 = shalt.err (!%p3672_p6)
}
 0x3e0   : > { %s3676_s21 = scalar_lea.hbm %s5251_s10, 4096  ;;  %s3680_s18 = scalar_lea.hbm %s5342_s6, 8192 }
 0x3e1   : > { %p3677_p9 = scmp.ne.s32.totalorder %s5251_s10, %s3676_s21  ;;  %p3681_p1 = scmp.lt.s32.totalorder %s5251_s10, %s5342_s6 }
 0x3e2   : > { %p3682_p8 = scmp.lt.s32.totalorder %s3680_s18, %s3676_s21 }
 0x3e3   : > { %p3678_p13 = pnand %p3677_p9, %p3917_p0 }
 0x3e4   : > { %p3683_p4 = por %p3682_p8, %p3681_p1 }
 0x3e5   : > { %p3679_p11 = pneg %p3678_p13 }
 0x3e7   : > { %p3684_p10 = pnand %p3683_p4, %p3679_p11 }
 0x3e9   : > { %3687 = shalt.err (!%p3684_p10)
}
 0x3ea   : > { %3049 = dma.vmem_to_hbm [thread:$0]  (%p3917_p0), %s5259_s8, 4096, %s5251_s10, %s5264_s30, %s3786_s3, %s3786_s3, %s3787_s27  }
 0x3eb   : > { %s3688_s15 = scalar_lea.vmem %s5261_s28, 4096  ;;  %s3789_s20 = smov [#allocation10]  }
 0x3ec   : > { %p3689_p12 = scmp.ne.s32.totalorder %s5261_s28, %s3688_s15  ;;  %s3692_s12 = sshll.u32 %s3789_s20, 4  ;;  %s3693_s12 = int_to_ptr.vmem [resolvable:$false] %s3692_s12 }
 0x3ed   : > { %s3694_s22 = scalar_lea.vmem %s3693_s12, 8192  ;;  %p3695_p7 = scmp.lt.s32.totalorder %s5261_s28, %s3693_s12 }
 0x3ee   : > { %p3690_p3 = pnand %p3689_p12, %p3917_p0  ;;  %p3696_p2 = scmp.lt.s32.totalorder %s3694_s22, %s3688_s15 }
 0x3f0   : > { %p3691_p5 = pneg %p3690_p3  ;;  %p3697_p6 = por %p3696_p2, %p3695_p7 }
 0x3f2   : > { %p3698_p9 = pnand %p3697_p6, %p3691_p5 }
 0x3f4   : > { %3701 = shalt.err (!%p3698_p9)
}
 0x3f5   : > { %s3702_s17 = scalar_lea.hbm %s5257_s19, 4096  ;;  %s3706_s8 = scalar_lea.hbm %s5343_s7, 8192 }
 0x3f6   : > { %p3703_p13 = scmp.ne.s32.totalorder %s5257_s19, %s3702_s17  ;;  %p3707_p8 = scmp.lt.s32.totalorder %s5257_s19, %s5343_s7 }
 0x3f7   : > { %p3708_p4 = scmp.lt.s32.totalorder %s3706_s8, %s3702_s17 }
 0x3f8   : > { %p3704_p11 = pnand %p3703_p13, %p3917_p0 }
 0x3f9   : > { %p3709_p10 = por %p3708_p4, %p3707_p8 }
 0x3fa   : > { %p3705_p1 = pneg %p3704_p11 }
 0x3fc   : > { %p3710_p12 = pnand %p3709_p10, %p3705_p1 }
 0x3fe   : > { %3713 = shalt.err (!%p3710_p12)
}
 0x3ff   : > { %s3790_s14 = smov 128   ;;  %s3791_s13 = smov 8  }
 0x400   : > { %3050 = dma.vmem_to_hbm [thread:$0]  (%p3917_p0), %s5261_s28, 4096, %s5257_s19, %s5264_s30, %s3790_s14, %s3790_s14, %s3791_s13  }
 0x401 PF: > { %s5414_s18 = sld [smem:[#allocation16_spill]]  ;;  %s2606_s9 = sand.u32 1, %s3756_s24  }
 0x402   : > { %p5416_p5 = scmp.ge.s32.totalorder %s3776_s29, 2  ;;  %s2607_s11 = scalar_lea.sflag [#allocation4], %s2606_s9 }
 0x407   : > { %p5415_p3 = scmp.ne.s32.totalorder %s5414_s18, 0 }
 0x409   : > { %p3063_p7 = pnand %p5416_p5, %p5415_p3 }
 0x40b   : > { %p3064_p2 = pneg %p3063_p7 }
 0x40d   : > { %3747 = dma.done.wait (%p3064_p2), %s2607_s11, 4096  }
 0x40e   : > { %3749 = vsyncadd (%p3064_p2), %s2607_s11, 4294963200  ;;  %s5417_s15 = sadd.s32 4294967294, %s3776_s29  }
 0x40f   : > { %s2615_s20 = sand.u32 1, %s5417_s15  }
 0x410   : > { %s2616_s12 = scalar_lea.sflag [#allocation9], %s2615_s20 }
 0x411   : > { %3751 = dma.done.wait (%p3064_p2), %s2616_s12, 8192  }
 0x412   : > { %3753 = vsyncadd (%p3064_p2), %s2616_s12, 4294959104  ;;  %s28_s29 = sadd.s32 1, %s3776_s29   ;;  %s5418_s27 = sld [smem:[#allocation15_spill]] }
 0x413   : > { %p25_p0 = scmp.ge.s32.totalorder %s28_s29, 4   ;;  %s5419_s28 = sld [smem:[#allocation17_spill]] }
 0x414   : > { %s5420_s24 = smov %s3760_s25  ;;  %s5421_s25 = smov %s3764_s26 }
 0x415   : > { %s5422_s26 = smov %s3926_s16  ;;  %27 = sbr.rel (!%p25_p0) target bundleno = 11 (0xb), region = 121 }
 0x41a   :  { %2630 = vsyncpa [#allocation3], 1 }
 0x41b   :  { %2632 = vsyncpa [#allocation3 + $0x1], 1 }
 0x41c   :  { %2633 = vsyncpa [#allocation6], 1 }
 0x41d   :  { %2634 = vsyncpa [#allocation4], 1 }
 0x41e   :  { %2636 = vsyncpa [#allocation4 + $0x1], 1 }
 0x41f   :  { %2637 = vsyncpa [#allocation9], 1 }
 0x420   :  { %2639 = vsyncpa [#allocation9 + $0x1], 1 }

</bundles_post_ra>
